<compile_context>
chip_gen: v7x
topology: tpu7x:2x2x1
jax: 0.10.0
libtpu: 0.0.40
codegen_flags: <defaults>
</compile_context>

<pallas_src>
import math
from functools import partial

import jax
import jax.numpy as jnp
from jax.experimental import pallas as pl
from jax.experimental.pallas import tpu as pltpu

_LN_EPS = 1e-5  # torch LayerNorm default


# --------------------------- hardware-aware sizing ---------------------------

def _vmem_budget():
    """Returns (vmem_limit_bytes, big_vmem). ~100 MiB on 128 MiB chips (v5e/v6e),
    ~48 MiB on 64 MiB chips (v7x); conservative fallback if the query fails."""
    try:
        cap = int(pltpu.get_tpu_info().vmem_capacity_bytes)
    except Exception:
        cap = 64 * 1024 * 1024
    limit = max(32 * 1024 * 1024, min(cap - 16 * 1024 * 1024, 100 * 1024 * 1024))
    return limit, cap >= 96 * 1024 * 1024


def _pick_batch_chunk(n, target):
    """Chunk along a dim that lands in the block's sublane position: it must be a
    multiple of 8 or the full dim (Mosaic (8,128) rule). Prefer >=2 grid steps."""
    target = max(8, (target // 8) * 8)
    if n < 16:
        return n                                   # single full block
    return min(target, max(8, ((n // 2) // 8) * 8))


def _pick_leading_chunk(n, target):
    """Chunk along a leading (non-tiled) dim; prefer >=2 grid steps (megacore)."""
    if n <= 1:
        return 1
    if n <= 2 * target:
        return pl.cdiv(n, 2)
    return target


def _spatial_chunk_target(L, big_vmem):
    # Aim for ~1024 (big-VMEM) / ~384 (v7x) rows per step.
    # For very long L (>~128) the 8-sequence alignment floor dominates; column-
    # chunking the MLP hidden would be needed to shrink further on 64 MiB chips.
    rows = 1024 if big_vmem else 384
    return max(8, min(64, ((rows // max(L, 1)) // 8) * 8))


# ------------------------------ kernel helpers --------------------------------

def _layernorm(x, g, b):
    mu = jnp.mean(x, axis=-1, keepdims=True)
    var = jnp.mean(jnp.square(x - mu), axis=-1, keepdims=True)
    return (x - mu) * jax.lax.rsqrt(var + _LN_EPS) * g + b


def _attend(q, k, v, k_ex, v_ex, n_head):
    """Batched multi-head attention on a chunk of sequences.

    q,k,v   : (B, S, D) bf16 (1/sqrt(Dh) already folded into the Q projection)
    k_ex/v_ex: optional (B, 1, D) bf16 extra key/value row per sequence (its own
               attention output row is never computed -- it is discarded anyway).
    Returns (B*S, D) f32: heads concatenated, ready for one K=D out-projection.
    """
    B, S, D = q.shape
    Dh = D // n_head
    heads = []
    for h in range(n_head):                       # static loop over heads only
        cs = slice(h * Dh, (h + 1) * Dh)
        qh, kh, vh = q[..., cs], k[..., cs], v[..., cs]            # (B, S, Dh)
        s = jax.lax.dot_general(qh, kh, (((2,), (2,)), ((0,), (0,))),
                                preferred_element_type=jnp.float32)  # (B, S, S)
        if k_ex is not None:
            k_eh = k_ex[..., cs].astype(jnp.float32)               # (B, 1, Dh)
            v_eh = v_ex[..., cs].astype(jnp.float32)
            s_ex = jnp.sum(qh.astype(jnp.float32) * k_eh,
                           axis=-1, keepdims=True)                 # (B, S, 1)
            mx = jnp.maximum(jnp.max(s, axis=-1, keepdims=True), s_ex)
            p, p_ex = jnp.exp(s - mx), jnp.exp(s_ex - mx)
            denom = jnp.sum(p, axis=-1, keepdims=True) + p_ex
            oh = jax.lax.dot_general(p.astype(vh.dtype), vh,
                                     (((2,), (1,)), ((0,), (0,))),
                                     preferred_element_type=jnp.float32)
            oh = oh + p_ex * v_eh                                  # (B, S, Dh)
        else:
            s = s - jnp.max(s, axis=-1, keepdims=True)
            p = jnp.exp(s)
            denom = jnp.sum(p, axis=-1, keepdims=True)
            oh = jax.lax.dot_general(p.astype(vh.dtype), vh,
                                     (((2,), (1,)), ((0,), (0,))),
                                     preferred_element_type=jnp.float32)
        oh = oh * pl.reciprocal(denom, approx=True)
        heads.append(oh.reshape(B * S, Dh))
    return jnp.concatenate(heads, axis=-1)                         # (B*S, D)


# --------------------------------- kernels -------------------------------------

def _msg_attn_kernel(x0_ref, wfc_ref, bfc_ref, lng_ref, lnb_ref,
                     wqkv_ref, bqkv_ref, wo_ref, bo_ref, o_ref, *, n_head):
    """message_fc + message_ln + MHA(T) + out-proj + residual for Bv videos."""
    Bv, T, D = x0_ref.shape
    wfc = wfc_ref[...]
    x0 = x0_ref[...].reshape(Bv * T, D)                            # all videos at once
    msg = jnp.dot(x0.astype(wfc.dtype), wfc,
                  preferred_element_type=jnp.float32) + bfc_ref[...]
    mn = _layernorm(msg, lng_ref[...], lnb_ref[...])
    wqkv = wqkv_ref[...]
    qkv = (jnp.dot(mn.astype(wqkv.dtype), wqkv,
                   preferred_element_type=jnp.float32) + bqkv_ref[...]
           ).astype(jnp.bfloat16)                                  # single bf16 cast
    q = qkv[:, :D].reshape(Bv, T, D)
    k = qkv[:, D:2 * D].reshape(Bv, T, D)
    v = qkv[:, 2 * D:].reshape(Bv, T, D)
    attn = _attend(q, k, v, None, None, n_head)                    # (Bv*T, D)
    attn = jnp.dot(attn.astype(wo_ref.dtype), wo_ref[...],
                   preferred_element_type=jnp.float32) + bo_ref[...]
    o_ref[...] = (msg + attn).reshape(Bv, T, D)


def _spatial_mlp_kernel(x_ref, msg_ref, ln1g_ref, ln1b_ref, wqkv_ref, bqkv_ref,
                        wo_ref, bo_ref, ln2g_ref, ln2b_ref, w1_ref, b1_ref,
                        w2_ref, b2_ref, o_ref, *, n_head):
    """ln_1 + attention over L+1 tokens (message K/V folded in) + residual,
    then ln_2 + MLP(QuickGELU) + residual -- all on one VMEM-resident chunk of
    Bc sequences; only the L spatial rows are produced (== torch's x[:l])."""
    L, Bc, D = x_ref.shape

    # Regroup the (L, Bc, D) block into batch-major (Bc*L, D) rows with per-sequence
    # strided ref loads (replaces the former XLA-level transpose of the full tensor).
    xf = jnp.concatenate([x_ref[:, i, :] for i in range(Bc)], axis=0)   # (Bc*L, D)
    msg = msg_ref[...]                                                  # (Bc, D)

    # ---- ln_1 + fused QKV (spatial rows); K/V only for the message row ----
    wqkv, bqkv = wqkv_ref[...], bqkv_ref[...]
    xn = _layernorm(xf, ln1g_ref[...], ln1b_ref[...])
    mn = _layernorm(msg, ln1g_ref[...], ln1b_ref[...])
    qkv = (jnp.dot(xn.astype(wqkv.dtype), wqkv,
                   preferred_element_type=jnp.float32) + bqkv
           ).astype(jnp.bfloat16)                                       # (Bc*L, 3D)
    kv_m = (jnp.dot(mn.astype(wqkv.dtype), wqkv[:, D:],
                    preferred_element_type=jnp.float32) + bqkv[:, D:]
            ).astype(jnp.bfloat16)                                      # (Bc, 2D)
    q = qkv[:, :D].reshape(Bc, L, D)
    k = qkv[:, D:2 * D].reshape(Bc, L, D)
    v = qkv[:, 2 * D:].reshape(Bc, L, D)
    k_m = kv_m[:, :D].reshape(Bc, 1, D)
    v_m = kv_m[:, D:].reshape(Bc, 1, D)

    # ---- attention (softmax over L+1 keys via two-part max/sum) + out-proj ----
    attn = _attend(q, k, v, k_m, v_m, n_head)                           # (Bc*L, D)
    attn = jnp.dot(attn.astype(wo_ref.dtype), wo_ref[...],
                   preferred_element_type=jnp.float32) + bo_ref[...]
    x1 = xf + attn                                                      # residual 1

    # ---- ln_2 + MLP + residual (fused: no HBM round trip for x1) ----
    hn = _layernorm(x1, ln2g_ref[...], ln2b_ref[...])
    hid = jnp.dot(hn.astype(w1_ref.dtype), w1_ref[...],
                  preferred_element_type=jnp.float32) + b1_ref[...]
    hid = hid * jax.nn.sigmoid(1.702 * hid)                             # QuickGELU
    y = x1 + jnp.dot(hid.astype(w2_ref.dtype), w2_ref[...],
                     preferred_element_type=jnp.float32) + b2_ref[...]  # (Bc*L, D)

    # Scatter back to the (L, Bc, D) output block (strided per-sequence stores).
    for i in range(Bc):
        o_ref[:, i, :] = y[i * L:(i + 1) * L, :]


# -------------------------------- wrappers --------------------------------------

def _const(arr):
    nd = arr.ndim
    return pl.BlockSpec(arr.shape, lambda i: (0,) * nd)


def message_attention(x0, pp, n_head, vmem_limit):
    b, T, D = x0.shape
    Bv = _pick_leading_chunk(b, 16)
    a = pp["msg_attn"]
    return pl.pallas_call(
        partial(_msg_attn_kernel, n_head=n_head),
        out_shape=jax.ShapeDtypeStruct((b, T, D), jnp.float32),
        grid=(pl.cdiv(b, Bv),),
        in_specs=[
            pl.BlockSpec((Bv, T, D), lambda i: (i, 0, 0)),
            _const(pp["msg_fc_w"]), _const(pp["msg_fc_b"]),
            _const(pp["msg_ln_g"]), _const(pp["msg_ln_b"]),
            _const(a["wqkv"]), _const(a["bqkv"]),
            _const(a["wo"]), _const(a["bo"]),
        ],
        out_specs=pl.BlockSpec((Bv, T, D), lambda i: (i, 0, 0)),
        compiler_params=pltpu.CompilerParams(
            dimension_semantics=("parallel",),
            vmem_limit_bytes=vmem_limit),
    )(x0, pp["msg_fc_w"], pp["msg_fc_b"], pp["msg_ln_g"], pp["msg_ln_b"],
      a["wqkv"], a["bqkv"], a["wo"], a["bo"])


def spatial_attention_mlp(x, msg, pp, n_head, vmem_limit, big_vmem):
    L, bt, D = x.shape
    Bc = _pick_batch_chunk(bt, _spatial_chunk_target(L, big_vmem))
    a = pp["attn"]
    return pl.pallas_call(
        partial(_spatial_mlp_kernel, n_head=n_head),
        out_shape=jax.ShapeDtypeStruct((L, bt, D), jnp.float32),
        grid=(pl.cdiv(bt, Bc),),
        in_specs=[
            pl.BlockSpec((L, Bc, D), lambda i: (0, i, 0)),   # (L, B*T, D) consumed directly
            pl.BlockSpec((Bc, D), lambda i: (i, 0)),
            _const(pp["ln1_g"]), _const(pp["ln1_b"]),
            _const(a["wqkv"]), _const(a["bqkv"]),
            _const(a["wo"]), _const(a["bo"]),
            _const(pp["ln2_g"]), _const(pp["ln2_b"]),
            _const(pp["mlp_w1"]), _const(pp["mlp_b1"]),
            _const(pp["mlp_w2"]), _const(pp["mlp_b2"]),
        ],
        out_specs=pl.BlockSpec((L, Bc, D), lambda i: (0, i, 0)),
        compiler_params=pltpu.CompilerParams(
            dimension_semantics=("parallel",),
            vmem_limit_bytes=vmem_limit),
    )(x, msg, pp["ln1_g"], pp["ln1_b"],
      a["wqkv"], a["bqkv"], a["wo"], a["bo"],
      pp["ln2_g"], pp["ln2_b"],
      pp["mlp_w1"], pp["mlp_b1"], pp["mlp_w2"], pp["mlp_b2"])


# --------------------------- block forward pass ----------------------------------

def cross_frame_attention_block(x, pp, T, n_head):
    """x: (L, B*T, D) -> (L, B*T, D), matching the PyTorch module in eval mode."""
    L, bt, D = x.shape
    b = bt // T
    vmem_limit, big_vmem = _vmem_budget()

    x0 = x[0].reshape(b, T, D)                        # per-frame class tokens (cheap slice)
    msg = message_attention(x0, pp, n_head, vmem_limit)            # (B, T, D)
    return spatial_attention_mlp(x, msg.reshape(bt, D), pp, n_head,
                                 vmem_limit, big_vmem)             # (L, B*T, D)


# ------------------------------- parameters --------------------------------------

def init_raw_params(key, d):
    """Raw parameters in PyTorch conventions (weights are (out, in))."""
    ks = jax.random.split(key, 16)

    def w(k, shape, scale=0.02):
        return scale * jax.random.normal(k, shape, dtype=jnp.float32)

    return {
        "message_fc_w": w(ks[0], (d, d)),
        "message_fc_b": w(ks[1], (d,)),
        "message_ln_g": jnp.ones((d,), jnp.float32),
        "message_ln_b": jnp.zeros((d,), jnp.float32),
        "message_attn": {
            "in_proj_weight": w(ks[2], (3 * d, d)),
            "in_proj_bias":   w(ks[3], (3 * d,)),
            "out_proj_weight": w(ks[4], (d, d)),
            "out_proj_bias":   w(ks[5], (d,)),
        },
        "attn": {
            "in_proj_weight": w(ks[6], (3 * d, d)),
            "in_proj_bias":   w(ks[7], (3 * d,)),
            "out_proj_weight": w(ks[8], (d, d)),
            "out_proj_bias":   w(ks[9], (d,)),
        },
        "ln1_g": jnp.ones((d,), jnp.float32),
        "ln1_b": jnp.zeros((d,), jnp.float32),
        "ln2_g": jnp.ones((d,), jnp.float32),
        "ln2_b": jnp.zeros((d,), jnp.float32),
        "mlp_w1": w(ks[10], (4 * d, d)),
        "mlp_b1": w(ks[11], (4 * d,)),
        "mlp_w2": w(ks[12], (d, 4 * d)),
        "mlp_b2": w(ks[13], (d,)),
    }


def pack_params(raw, n_head):
    """One-time pre-pack outside the jitted forward: transposes, fused QKV columns,
    1/sqrt(Dh) folded into Wq/bq, full (D, D) out-proj, bf16 matmul weights."""
    d = raw["ln1_g"].shape[0]
    dh = d // n_head
    scale = 1.0 / math.sqrt(dh)
    bf16, f32 = jnp.bfloat16, jnp.float32

    def pack_mha(p):
        w_in = p["in_proj_weight"].astype(f32)                 # (3D, D)
        b_in = p["in_proj_bias"].astype(f32)                   # (3D,)
        wq, wk, wv = w_in[:d] * scale, w_in[d:2 * d], w_in[2 * d:]
        bq, bk, bv = b_in[:d] * scale, b_in[d:2 * d], b_in[2 * d:]
        wqkv = jnp.concatenate([wq, wk, wv], axis=0).T.astype(bf16)     # (D, 3D)
        bqkv = jnp.concatenate([bq, bk, bv]).reshape(1, 3 * d).astype(f32)
        wo = p["out_proj_weight"].astype(f32).T.astype(bf16)            # (D, D), single K=D matmul
        bo = p["out_proj_bias"].reshape(1, d).astype(f32)
        return {"wqkv": wqkv, "bqkv": bqkv, "wo": wo, "bo": bo}

    return {
        "msg_fc_w": raw["message_fc_w"].T.astype(bf16),        # (D, D)
        "msg_fc_b": raw["message_fc_b"].reshape(1, d).astype(f32),
        "msg_ln_g": raw["message_ln_g"].reshape(1, d).astype(f32),
        "msg_ln_b": raw["message_ln_b"].reshape(1, d).astype(f32),
        "msg_attn": pack_mha(raw["message_attn"]),
        "ln1_g": raw["ln1_g"].reshape(1, d).astype(f32),
        "ln1_b": raw["ln1_b"].reshape(1, d).astype(f32),
        "attn": pack_mha(raw["attn"]),
        "ln2_g": raw["ln2_g"].reshape(1, d).astype(f32),
        "ln2_b": raw["ln2_b"].reshape(1, d).astype(f32),
        "mlp_w1": raw["mlp_w1"].T.astype(bf16),                # (D, 4D)
        "mlp_b1": raw["mlp_b1"].reshape(1, 4 * d).astype(f32),
        "mlp_w2": raw["mlp_w2"].T.astype(bf16),                # (4D, D)
        "mlp_b2": raw["mlp_b2"].reshape(1, d).astype(f32),
    }


# ----------------------------------- main -----------------------------------------

if __name__ == "__main__":
    D_MODEL = 32
    N_HEAD = 4
    T = 2            # frames per video
    B = 2            # videos
    L = 8            # spatial tokens per frame

    key = jax.random.PRNGKey(0)
    k_x, k_p = jax.random.split(key)

    raw = init_raw_params(k_p, D_MODEL)
    packed = pack_params(raw, N_HEAD)          # pre-pack once, outside jit
    x = jax.random.normal(k_x, (L, B * T, D_MODEL), dtype=jnp.float32)

    fwd = jax.jit(partial(cross_frame_attention_block, T=T, n_head=N_HEAD))
    out = jax.block_until_ready(fwd(x, packed))

    assert out.shape == (L, B * T, D_MODEL), out.shape
    assert bool(jnp.all(jnp.isfinite(out)))
    print("KERNEL_OK")
</pallas_src>

<mosaic_0001>
module attributes {stable_mosaic.version = 11 : i64} {
  func.func @_spatial_mlp_kernel(%arg0: i32, %arg1: memref<8x4x32xf32, #tpu.memory_space<vmem>>, %arg2: memref<4x32xf32, #tpu.memory_space<vmem>>, %arg3: memref<1x32xf32, #tpu.memory_space<vmem>>, %arg4: memref<1x32xf32, #tpu.memory_space<vmem>>, %arg5: memref<32x96xbf16, #tpu.memory_space<vmem>>, %arg6: memref<1x96xf32, #tpu.memory_space<vmem>>, %arg7: memref<32x32xbf16, #tpu.memory_space<vmem>>, %arg8: memref<1x32xf32, #tpu.memory_space<vmem>>, %arg9: memref<1x32xf32, #tpu.memory_space<vmem>>, %arg10: memref<1x32xf32, #tpu.memory_space<vmem>>, %arg11: memref<32x128xbf16, #tpu.memory_space<vmem>>, %arg12: memref<1x128xf32, #tpu.memory_space<vmem>>, %arg13: memref<128x32xbf16, #tpu.memory_space<vmem>>, %arg14: memref<1x32xf32, #tpu.memory_space<vmem>>, %arg15: memref<8x4x32xf32, #tpu.memory_space<vmem>>) attributes {dimension_semantics = [#tpu.dimension_semantics<parallel>], iteration_bounds = array<i64: 1>, scalar_prefetch = 0 : i64, scratch_operands = 0 : i64, tpu.core_type = #tpu.core_type<tc>, window_params = [{transform_indices = @transform_0, window_bounds = array<i64: 8, 4, 32>}, {transform_indices = @transform_1, window_bounds = array<i64: 4, 32>}, {pipeline_mode = #tpu.pipeline_mode<synchronous>, transform_indices = @transform_2, window_bounds = array<i64: 1, 32>}, {pipeline_mode = #tpu.pipeline_mode<synchronous>, transform_indices = @transform_3, window_bounds = array<i64: 1, 32>}, {pipeline_mode = #tpu.pipeline_mode<synchronous>, transform_indices = @transform_4, window_bounds = array<i64: 32, 96>}, {pipeline_mode = #tpu.pipeline_mode<synchronous>, transform_indices = @transform_5, window_bounds = array<i64: 1, 96>}, {pipeline_mode = #tpu.pipeline_mode<synchronous>, transform_indices = @transform_6, window_bounds = array<i64: 32, 32>}, {pipeline_mode = #tpu.pipeline_mode<synchronous>, transform_indices = @transform_7, window_bounds = array<i64: 1, 32>}, {pipeline_mode = #tpu.pipeline_mode<synchronous>, transform_indices = @transform_8, window_bounds = array<i64: 1, 32>}, {pipeline_mode = #tpu.pipeline_mode<synchronous>, transform_indices = @transform_9, window_bounds = array<i64: 1, 32>}, {pipeline_mode = #tpu.pipeline_mode<synchronous>, transform_indices = @transform_10, window_bounds = array<i64: 32, 128>}, {pipeline_mode = #tpu.pipeline_mode<synchronous>, transform_indices = @transform_11, window_bounds = array<i64: 1, 128>}, {pipeline_mode = #tpu.pipeline_mode<synchronous>, transform_indices = @transform_12, window_bounds = array<i64: 128, 32>}, {pipeline_mode = #tpu.pipeline_mode<synchronous>, transform_indices = @transform_13, window_bounds = array<i64: 1, 32>}, {transform_indices = @transform_14, window_bounds = array<i64: 8, 4, 32>}]} {
    %c0 = arith.constant 0 : index
    %c0_0 = arith.constant 0 : index
    %c0_1 = arith.constant 0 : index
    %0 = vector.load %arg1[%c0, %c0_0, %c0_1] : memref<8x4x32xf32, #tpu.memory_space<vmem>>, vector<8x1x32xf32>
    %1 = vector.shape_cast %0 : vector<8x1x32xf32> to vector<8x32xf32>
    %c0_2 = arith.constant 0 : index
    %c1 = arith.constant 1 : index
    %c0_3 = arith.constant 0 : index
    %2 = vector.load %arg1[%c0_2, %c1, %c0_3] : memref<8x4x32xf32, #tpu.memory_space<vmem>>, vector<8x1x32xf32>
    %3 = vector.shape_cast %2 : vector<8x1x32xf32> to vector<8x32xf32>
    %c0_4 = arith.constant 0 : index
    %c2 = arith.constant 2 : index
    %c0_5 = arith.constant 0 : index
    %4 = vector.load %arg1[%c0_4, %c2, %c0_5] : memref<8x4x32xf32, #tpu.memory_space<vmem>>, vector<8x1x32xf32>
    %5 = vector.shape_cast %4 : vector<8x1x32xf32> to vector<8x32xf32>
    %c0_6 = arith.constant 0 : index
    %c3 = arith.constant 3 : index
    %c0_7 = arith.constant 0 : index
    %6 = vector.load %arg1[%c0_6, %c3, %c0_7] : memref<8x4x32xf32, #tpu.memory_space<vmem>>, vector<8x1x32xf32>
    %7 = vector.shape_cast %6 : vector<8x1x32xf32> to vector<8x32xf32>
    %8 = tpu.concatenate %1, %3, %5, %7 in 0 : vector<8x32xf32>, vector<8x32xf32>, vector<8x32xf32>, vector<8x32xf32> -> vector<32x32xf32>
    %c0_8 = arith.constant 0 : index
    %c0_9 = arith.constant 0 : index
    %9 = vector.load %arg2[%c0_8, %c0_9] : memref<4x32xf32, #tpu.memory_space<vmem>>, vector<4x32xf32>
    %c0_10 = arith.constant 0 : index
    %c0_11 = arith.constant 0 : index
    %10 = vector.load %arg5[%c0_10, %c0_11] : memref<32x96xbf16, #tpu.memory_space<vmem>>, vector<32x96xbf16>
    %c0_12 = arith.constant 0 : index
    %c0_13 = arith.constant 0 : index
    %11 = vector.load %arg6[%c0_12, %c0_13] : memref<1x96xf32, #tpu.memory_space<vmem>>, vector<1x96xf32>
    %c0_14 = arith.constant 0 : index
    %c0_15 = arith.constant 0 : index
    %12 = vector.load %arg3[%c0_14, %c0_15] : memref<1x32xf32, #tpu.memory_space<vmem>>, vector<1x32xf32>
    %c0_16 = arith.constant 0 : index
    %c0_17 = arith.constant 0 : index
    %13 = vector.load %arg4[%c0_16, %c0_17] : memref<1x32xf32, #tpu.memory_space<vmem>>, vector<1x32xf32>
    %cst = arith.constant dense<0.000000e+00> : vector<32xf32>
    %14 = vector.multi_reduction <add>, %8, %cst [1] : vector<32x32xf32> to vector<32xf32>
    %15 = vector.shape_cast %14 : vector<32xf32> to vector<32x1xf32>
    %cst_18 = arith.constant 3.200000e+01 : f32
    %16 = vector.broadcast %cst_18 : f32 to vector<32x1xf32>
    %17 = arith.divf %15, %16 : vector<32x1xf32>
    %18 = vector.broadcast %17 : vector<32x1xf32> to vector<32x32xf32>
    %19 = arith.subf %8, %18 : vector<32x32xf32>
    %20 = arith.mulf %19, %19 : vector<32x32xf32>
    %cst_19 = arith.constant dense<0.000000e+00> : vector<32xf32>
    %21 = vector.multi_reduction <add>, %20, %cst_19 [1] : vector<32x32xf32> to vector<32xf32>
    %22 = vector.shape_cast %21 : vector<32xf32> to vector<32x1xf32>
    %cst_20 = arith.constant 3.200000e+01 : f32
    %23 = vector.broadcast %cst_20 : f32 to vector<32x1xf32>
    %24 = arith.divf %22, %23 : vector<32x1xf32>
    %25 = vector.broadcast %17 : vector<32x1xf32> to vector<32x32xf32>
    %26 = arith.subf %8, %25 : vector<32x32xf32>
    %cst_21 = arith.constant 9.99999974E-6 : f32
    %27 = vector.broadcast %cst_21 : f32 to vector<32x1xf32>
    %28 = arith.addf %24, %27 : vector<32x1xf32>
    %29 = math.rsqrt %28 : vector<32x1xf32>
    %30 = vector.broadcast %29 : vector<32x1xf32> to vector<32x32xf32>
    %31 = arith.mulf %26, %30 : vector<32x32xf32>
    %32 = vector.broadcast %12 : vector<1x32xf32> to vector<32x32xf32>
    %33 = arith.mulf %31, %32 : vector<32x32xf32>
    %34 = vector.broadcast %13 : vector<1x32xf32> to vector<32x32xf32>
    %35 = arith.addf %33, %34 : vector<32x32xf32>
    %c0_22 = arith.constant 0 : index
    %c0_23 = arith.constant 0 : index
    %36 = vector.load %arg3[%c0_22, %c0_23] : memref<1x32xf32, #tpu.memory_space<vmem>>, vector<1x32xf32>
    %c0_24 = arith.constant 0 : index
    %c0_25 = arith.constant 0 : index
    %37 = vector.load %arg4[%c0_24, %c0_25] : memref<1x32xf32, #tpu.memory_space<vmem>>, vector<1x32xf32>
    %cst_26 = arith.constant dense<0.000000e+00> : vector<4xf32>
    %38 = vector.multi_reduction <add>, %9, %cst_26 [1] : vector<4x32xf32> to vector<4xf32>
    %39 = vector.shape_cast %38 : vector<4xf32> to vector<4x1xf32>
    %cst_27 = arith.constant 3.200000e+01 : f32
    %40 = vector.broadcast %cst_27 : f32 to vector<4x1xf32>
    %41 = arith.divf %39, %40 : vector<4x1xf32>
    %42 = vector.broadcast %41 : vector<4x1xf32> to vector<4x32xf32>
    %43 = arith.subf %9, %42 : vector<4x32xf32>
    %44 = arith.mulf %43, %43 : vector<4x32xf32>
    %cst_28 = arith.constant dense<0.000000e+00> : vector<4xf32>
    %45 = vector.multi_reduction <add>, %44, %cst_28 [1] : vector<4x32xf32> to vector<4xf32>
    %46 = vector.shape_cast %45 : vector<4xf32> to vector<4x1xf32>
    %cst_29 = arith.constant 3.200000e+01 : f32
    %47 = vector.broadcast %cst_29 : f32 to vector<4x1xf32>
    %48 = arith.divf %46, %47 : vector<4x1xf32>
    %49 = vector.broadcast %41 : vector<4x1xf32> to vector<4x32xf32>
    %50 = arith.subf %9, %49 : vector<4x32xf32>
    %cst_30 = arith.constant 9.99999974E-6 : f32
    %51 = vector.broadcast %cst_30 : f32 to vector<4x1xf32>
    %52 = arith.addf %48, %51 : vector<4x1xf32>
    %53 = math.rsqrt %52 : vector<4x1xf32>
    %54 = vector.broadcast %53 : vector<4x1xf32> to vector<4x32xf32>
    %55 = arith.mulf %50, %54 : vector<4x32xf32>
    %56 = vector.broadcast %36 : vector<1x32xf32> to vector<4x32xf32>
    %57 = arith.mulf %55, %56 : vector<4x32xf32>
    %58 = vector.broadcast %37 : vector<1x32xf32> to vector<4x32xf32>
    %59 = arith.addf %57, %58 : vector<4x32xf32>
    %60 = arith.truncf %35 : vector<32x32xf32> to vector<32x32xbf16>
    %cst_31 = arith.constant dense<0.000000e+00> : vector<32x96xf32>
    %61 = tpu.matmul %60, %10, %cst_31 {dimension_numbers = #tpu.dot_dimension_numbers<[1], [0], [0], [1], [0, 0, 1, 1], [], []>} : vector<32x32xbf16>, vector<32x96xbf16>, vector<32x96xf32> -> vector<32x96xf32>
    %62 = vector.broadcast %11 : vector<1x96xf32> to vector<32x96xf32>
    %63 = arith.addf %61, %62 : vector<32x96xf32>
    %64 = arith.truncf %63 : vector<32x96xf32> to vector<32x96xbf16>
    %65 = arith.truncf %59 : vector<4x32xf32> to vector<4x32xbf16>
    %66 = vector.extract_strided_slice %10 {offsets = [0, 32], sizes = [32, 64], strides = [1, 1]} : vector<32x96xbf16> to vector<32x64xbf16>
    %cst_32 = arith.constant dense<0.000000e+00> : vector<4x64xf32>
    %67 = tpu.matmul %65, %66, %cst_32 {dimension_numbers = #tpu.dot_dimension_numbers<[1], [0], [0], [1], [0, 0, 1, 1], [], []>} : vector<4x32xbf16>, vector<32x64xbf16>, vector<4x64xf32> -> vector<4x64xf32>
    %68 = vector.extract_strided_slice %11 {offsets = [0, 32], sizes = [1, 64], strides = [1, 1]} : vector<1x96xf32> to vector<1x64xf32>
    %69 = vector.broadcast %68 : vector<1x64xf32> to vector<4x64xf32>
    %70 = arith.addf %67, %69 : vector<4x64xf32>
    %71 = arith.truncf %70 : vector<4x64xf32> to vector<4x64xbf16>
    %72 = vector.extract_strided_slice %64 {offsets = [0, 0], sizes = [32, 32], strides = [1, 1]} : vector<32x96xbf16> to vector<32x32xbf16>
    %73 = vector.shape_cast %72 : vector<32x32xbf16> to vector<4x8x32xbf16>
    %74 = vector.extract_strided_slice %64 {offsets = [0, 32], sizes = [32, 32], strides = [1, 1]} : vector<32x96xbf16> to vector<32x32xbf16>
    %75 = vector.shape_cast %74 : vector<32x32xbf16> to vector<4x8x32xbf16>
    %76 = vector.extract_strided_slice %64 {offsets = [0, 64], sizes = [32, 32], strides = [1, 1]} : vector<32x96xbf16> to vector<32x32xbf16>
    %77 = vector.shape_cast %76 : vector<32x32xbf16> to vector<4x8x32xbf16>
    %78 = vector.extract_strided_slice %71 {offsets = [0, 0], sizes = [4, 32], strides = [1, 1]} : vector<4x64xbf16> to vector<4x32xbf16>
    %79 = vector.shape_cast %78 : vector<4x32xbf16> to vector<4x1x32xbf16>
    %80 = vector.extract_strided_slice %71 {offsets = [0, 32], sizes = [4, 32], strides = [1, 1]} : vector<4x64xbf16> to vector<4x32xbf16>
    %81 = vector.shape_cast %80 : vector<4x32xbf16> to vector<4x1x32xbf16>
    %82 = vector.extract_strided_slice %73 {offsets = [0, 0, 0], sizes = [4, 8, 8], strides = [1, 1, 1]} : vector<4x8x32xbf16> to vector<4x8x8xbf16>
    %83 = vector.extract_strided_slice %75 {offsets = [0, 0, 0], sizes = [4, 8, 8], strides = [1, 1, 1]} : vector<4x8x32xbf16> to vector<4x8x8xbf16>
    %84 = vector.extract_strided_slice %77 {offsets = [0, 0, 0], sizes = [4, 8, 8], strides = [1, 1, 1]} : vector<4x8x32xbf16> to vector<4x8x8xbf16>
    %cst_33 = arith.constant dense<0.000000e+00> : vector<4x8x8xf32>
    %85 = tpu.matmul %82, %83, %cst_33 {dimension_numbers = #tpu.dot_dimension_numbers<[2], [2], [1], [1], [0, 0, 0, 1, 1, 1], [0], [0]>} : vector<4x8x8xbf16>, vector<4x8x8xbf16>, vector<4x8x8xf32> -> vector<4x8x8xf32>
    %86 = vector.extract_strided_slice %79 {offsets = [0, 0, 0], sizes = [4, 1, 8], strides = [1, 1, 1]} : vector<4x1x32xbf16> to vector<4x1x8xbf16>
    %87 = arith.extf %86 : vector<4x1x8xbf16> to vector<4x1x8xf32>
    %88 = vector.extract_strided_slice %81 {offsets = [0, 0, 0], sizes = [4, 1, 8], strides = [1, 1, 1]} : vector<4x1x32xbf16> to vector<4x1x8xbf16>
    %89 = arith.extf %88 : vector<4x1x8xbf16> to vector<4x1x8xf32>
    %90 = arith.extf %82 : vector<4x8x8xbf16> to vector<4x8x8xf32>
    %91 = vector.broadcast %87 : vector<4x1x8xf32> to vector<4x8x8xf32>
    %92 = arith.mulf %90, %91 : vector<4x8x8xf32>
    %cst_34 = arith.constant dense<0.000000e+00> : vector<4x8xf32>
    %93 = vector.multi_reduction <add>, %92, %cst_34 [2] : vector<4x8x8xf32> to vector<4x8xf32>
    %94 = vector.shape_cast %93 : vector<4x8xf32> to vector<4x8x1xf32>
    %cst_35 = arith.constant dense<0xFF800000> : vector<4x8xf32>
    %95 = vector.multi_reduction <maximumf>, %85, %cst_35 [2] : vector<4x8x8xf32> to vector<4x8xf32>
    %96 = vector.shape_cast %95 : vector<4x8xf32> to vector<4x8x1xf32>
    %97 = arith.maximumf %96, %94 : vector<4x8x1xf32>
    %98 = vector.broadcast %97 : vector<4x8x1xf32> to vector<4x8x8xf32>
    %99 = arith.subf %85, %98 : vector<4x8x8xf32>
    %100 = math.exp %99 : vector<4x8x8xf32>
    %101 = arith.subf %94, %97 : vector<4x8x1xf32>
    %102 = math.exp %101 : vector<4x8x1xf32>
    %cst_36 = arith.constant dense<0.000000e+00> : vector<4x8xf32>
    %103 = vector.multi_reduction <add>, %100, %cst_36 [2] : vector<4x8x8xf32> to vector<4x8xf32>
    %104 = vector.shape_cast %103 : vector<4x8xf32> to vector<4x8x1xf32>
    %105 = arith.addf %104, %102 : vector<4x8x1xf32>
    %106 = arith.truncf %100 : vector<4x8x8xf32> to vector<4x8x8xbf16>
    %cst_37 = arith.constant dense<0.000000e+00> : vector<4x8x8xf32>
    %107 = tpu.matmul %106, %84, %cst_37 {dimension_numbers = #tpu.dot_dimension_numbers<[2], [1], [1], [2], [0, 0, 0, 1, 1, 2], [0], [0]>} : vector<4x8x8xbf16>, vector<4x8x8xbf16>, vector<4x8x8xf32> -> vector<4x8x8xf32>
    %108 = vector.broadcast %102 : vector<4x8x1xf32> to vector<4x8x8xf32>
    %109 = vector.broadcast %89 : vector<4x1x8xf32> to vector<4x8x8xf32>
    %110 = arith.mulf %108, %109 : vector<4x8x8xf32>
    %111 = arith.addf %107, %110 : vector<4x8x8xf32>
    %112 = tpu.reciprocal %105 {approx = true} : vector<4x8x1xf32> -> vector<4x8x1xf32>
    %113 = vector.broadcast %112 : vector<4x8x1xf32> to vector<4x8x8xf32>
    %114 = arith.mulf %111, %113 : vector<4x8x8xf32>
    %115 = vector.shape_cast %114 : vector<4x8x8xf32> to vector<32x8xf32>
    %116 = vector.extract_strided_slice %73 {offsets = [0, 0, 8], sizes = [4, 8, 8], strides = [1, 1, 1]} : vector<4x8x32xbf16> to vector<4x8x8xbf16>
    %117 = vector.extract_strided_slice %75 {offsets = [0, 0, 8], sizes = [4, 8, 8], strides = [1, 1, 1]} : vector<4x8x32xbf16> to vector<4x8x8xbf16>
    %118 = vector.extract_strided_slice %77 {offsets = [0, 0, 8], sizes = [4, 8, 8], strides = [1, 1, 1]} : vector<4x8x32xbf16> to vector<4x8x8xbf16>
    %cst_38 = arith.constant dense<0.000000e+00> : vector<4x8x8xf32>
    %119 = tpu.matmul %116, %117, %cst_38 {dimension_numbers = #tpu.dot_dimension_numbers<[2], [2], [1], [1], [0, 0, 0, 1, 1, 1], [0], [0]>} : vector<4x8x8xbf16>, vector<4x8x8xbf16>, vector<4x8x8xf32> -> vector<4x8x8xf32>
    %120 = vector.extract_strided_slice %79 {offsets = [0, 0, 8], sizes = [4, 1, 8], strides = [1, 1, 1]} : vector<4x1x32xbf16> to vector<4x1x8xbf16>
    %121 = arith.extf %120 : vector<4x1x8xbf16> to vector<4x1x8xf32>
    %122 = vector.extract_strided_slice %81 {offsets = [0, 0, 8], sizes = [4, 1, 8], strides = [1, 1, 1]} : vector<4x1x32xbf16> to vector<4x1x8xbf16>
    %123 = arith.extf %122 : vector<4x1x8xbf16> to vector<4x1x8xf32>
    %124 = arith.extf %116 : vector<4x8x8xbf16> to vector<4x8x8xf32>
    %125 = vector.broadcast %121 : vector<4x1x8xf32> to vector<4x8x8xf32>
    %126 = arith.mulf %124, %125 : vector<4x8x8xf32>
    %cst_39 = arith.constant dense<0.000000e+00> : vector<4x8xf32>
    %127 = vector.multi_reduction <add>, %126, %cst_39 [2] : vector<4x8x8xf32> to vector<4x8xf32>
    %128 = vector.shape_cast %127 : vector<4x8xf32> to vector<4x8x1xf32>
    %cst_40 = arith.constant dense<0xFF800000> : vector<4x8xf32>
    %129 = vector.multi_reduction <maximumf>, %119, %cst_40 [2] : vector<4x8x8xf32> to vector<4x8xf32>
    %130 = vector.shape_cast %129 : vector<4x8xf32> to vector<4x8x1xf32>
    %131 = arith.maximumf %130, %128 : vector<4x8x1xf32>
    %132 = vector.broadcast %131 : vector<4x8x1xf32> to vector<4x8x8xf32>
    %133 = arith.subf %119, %132 : vector<4x8x8xf32>
    %134 = math.exp %133 : vector<4x8x8xf32>
    %135 = arith.subf %128, %131 : vector<4x8x1xf32>
    %136 = math.exp %135 : vector<4x8x1xf32>
    %cst_41 = arith.constant dense<0.000000e+00> : vector<4x8xf32>
    %137 = vector.multi_reduction <add>, %134, %cst_41 [2] : vector<4x8x8xf32> to vector<4x8xf32>
    %138 = vector.shape_cast %137 : vector<4x8xf32> to vector<4x8x1xf32>
    %139 = arith.addf %138, %136 : vector<4x8x1xf32>
    %140 = arith.truncf %134 : vector<4x8x8xf32> to vector<4x8x8xbf16>
    %cst_42 = arith.constant dense<0.000000e+00> : vector<4x8x8xf32>
    %141 = tpu.matmul %140, %118, %cst_42 {dimension_numbers = #tpu.dot_dimension_numbers<[2], [1], [1], [2], [0, 0, 0, 1, 1, 2], [0], [0]>} : vector<4x8x8xbf16>, vector<4x8x8xbf16>, vector<4x8x8xf32> -> vector<4x8x8xf32>
    %142 = vector.broadcast %136 : vector<4x8x1xf32> to vector<4x8x8xf32>
    %143 = vector.broadcast %123 : vector<4x1x8xf32> to vector<4x8x8xf32>
    %144 = arith.mulf %142, %143 : vector<4x8x8xf32>
    %145 = arith.addf %141, %144 : vector<4x8x8xf32>
    %146 = tpu.reciprocal %139 {approx = true} : vector<4x8x1xf32> -> vector<4x8x1xf32>
    %147 = vector.broadcast %146 : vector<4x8x1xf32> to vector<4x8x8xf32>
    %148 = arith.mulf %145, %147 : vector<4x8x8xf32>
    %149 = vector.shape_cast %148 : vector<4x8x8xf32> to vector<32x8xf32>
    %150 = vector.extract_strided_slice %73 {offsets = [0, 0, 16], sizes = [4, 8, 8], strides = [1, 1, 1]} : vector<4x8x32xbf16> to vector<4x8x8xbf16>
    %151 = vector.extract_strided_slice %75 {offsets = [0, 0, 16], sizes = [4, 8, 8], strides = [1, 1, 1]} : vector<4x8x32xbf16> to vector<4x8x8xbf16>
    %152 = vector.extract_strided_slice %77 {offsets = [0, 0, 16], sizes = [4, 8, 8], strides = [1, 1, 1]} : vector<4x8x32xbf16> to vector<4x8x8xbf16>
    %cst_43 = arith.constant dense<0.000000e+00> : vector<4x8x8xf32>
    %153 = tpu.matmul %150, %151, %cst_43 {dimension_numbers = #tpu.dot_dimension_numbers<[2], [2], [1], [1], [0, 0, 0, 1, 1, 1], [0], [0]>} : vector<4x8x8xbf16>, vector<4x8x8xbf16>, vector<4x8x8xf32> -> vector<4x8x8xf32>
    %154 = vector.extract_strided_slice %79 {offsets = [0, 0, 16], sizes = [4, 1, 8], strides = [1, 1, 1]} : vector<4x1x32xbf16> to vector<4x1x8xbf16>
    %155 = arith.extf %154 : vector<4x1x8xbf16> to vector<4x1x8xf32>
    %156 = vector.extract_strided_slice %81 {offsets = [0, 0, 16], sizes = [4, 1, 8], strides = [1, 1, 1]} : vector<4x1x32xbf16> to vector<4x1x8xbf16>
    %157 = arith.extf %156 : vector<4x1x8xbf16> to vector<4x1x8xf32>
    %158 = arith.extf %150 : vector<4x8x8xbf16> to vector<4x8x8xf32>
    %159 = vector.broadcast %155 : vector<4x1x8xf32> to vector<4x8x8xf32>
    %160 = arith.mulf %158, %159 : vector<4x8x8xf32>
    %cst_44 = arith.constant dense<0.000000e+00> : vector<4x8xf32>
    %161 = vector.multi_reduction <add>, %160, %cst_44 [2] : vector<4x8x8xf32> to vector<4x8xf32>
    %162 = vector.shape_cast %161 : vector<4x8xf32> to vector<4x8x1xf32>
    %cst_45 = arith.constant dense<0xFF800000> : vector<4x8xf32>
    %163 = vector.multi_reduction <maximumf>, %153, %cst_45 [2] : vector<4x8x8xf32> to vector<4x8xf32>
    %164 = vector.shape_cast %163 : vector<4x8xf32> to vector<4x8x1xf32>
    %165 = arith.maximumf %164, %162 : vector<4x8x1xf32>
    %166 = vector.broadcast %165 : vector<4x8x1xf32> to vector<4x8x8xf32>
    %167 = arith.subf %153, %166 : vector<4x8x8xf32>
    %168 = math.exp %167 : vector<4x8x8xf32>
    %169 = arith.subf %162, %165 : vector<4x8x1xf32>
    %170 = math.exp %169 : vector<4x8x1xf32>
    %cst_46 = arith.constant dense<0.000000e+00> : vector<4x8xf32>
    %171 = vector.multi_reduction <add>, %168, %cst_46 [2] : vector<4x8x8xf32> to vector<4x8xf32>
    %172 = vector.shape_cast %171 : vector<4x8xf32> to vector<4x8x1xf32>
    %173 = arith.addf %172, %170 : vector<4x8x1xf32>
    %174 = arith.truncf %168 : vector<4x8x8xf32> to vector<4x8x8xbf16>
    %cst_47 = arith.constant dense<0.000000e+00> : vector<4x8x8xf32>
    %175 = tpu.matmul %174, %152, %cst_47 {dimension_numbers = #tpu.dot_dimension_numbers<[2], [1], [1], [2], [0, 0, 0, 1, 1, 2], [0], [0]>} : vector<4x8x8xbf16>, vector<4x8x8xbf16>, vector<4x8x8xf32> -> vector<4x8x8xf32>
    %176 = vector.broadcast %170 : vector<4x8x1xf32> to vector<4x8x8xf32>
    %177 = vector.broadcast %157 : vector<4x1x8xf32> to vector<4x8x8xf32>
    %178 = arith.mulf %176, %177 : vector<4x8x8xf32>
    %179 = arith.addf %175, %178 : vector<4x8x8xf32>
    %180 = tpu.reciprocal %173 {approx = true} : vector<4x8x1xf32> -> vector<4x8x1xf32>
    %181 = vector.broadcast %180 : vector<4x8x1xf32> to vector<4x8x8xf32>
    %182 = arith.mulf %179, %181 : vector<4x8x8xf32>
    %183 = vector.shape_cast %182 : vector<4x8x8xf32> to vector<32x8xf32>
    %184 = vector.extract_strided_slice %73 {offsets = [0, 0, 24], sizes = [4, 8, 8], strides = [1, 1, 1]} : vector<4x8x32xbf16> to vector<4x8x8xbf16>
    %185 = vector.extract_strided_slice %75 {offsets = [0, 0, 24], sizes = [4, 8, 8], strides = [1, 1, 1]} : vector<4x8x32xbf16> to vector<4x8x8xbf16>
    %186 = vector.extract_strided_slice %77 {offsets = [0, 0, 24], sizes = [4, 8, 8], strides = [1, 1, 1]} : vector<4x8x32xbf16> to vector<4x8x8xbf16>
    %cst_48 = arith.constant dense<0.000000e+00> : vector<4x8x8xf32>
    %187 = tpu.matmul %184, %185, %cst_48 {dimension_numbers = #tpu.dot_dimension_numbers<[2], [2], [1], [1], [0, 0, 0, 1, 1, 1], [0], [0]>} : vector<4x8x8xbf16>, vector<4x8x8xbf16>, vector<4x8x8xf32> -> vector<4x8x8xf32>
    %188 = vector.extract_strided_slice %79 {offsets = [0, 0, 24], sizes = [4, 1, 8], strides = [1, 1, 1]} : vector<4x1x32xbf16> to vector<4x1x8xbf16>
    %189 = arith.extf %188 : vector<4x1x8xbf16> to vector<4x1x8xf32>
    %190 = vector.extract_strided_slice %81 {offsets = [0, 0, 24], sizes = [4, 1, 8], strides = [1, 1, 1]} : vector<4x1x32xbf16> to vector<4x1x8xbf16>
    %191 = arith.extf %190 : vector<4x1x8xbf16> to vector<4x1x8xf32>
    %192 = arith.extf %184 : vector<4x8x8xbf16> to vector<4x8x8xf32>
    %193 = vector.broadcast %189 : vector<4x1x8xf32> to vector<4x8x8xf32>
    %194 = arith.mulf %192, %193 : vector<4x8x8xf32>
    %cst_49 = arith.constant dense<0.000000e+00> : vector<4x8xf32>
    %195 = vector.multi_reduction <add>, %194, %cst_49 [2] : vector<4x8x8xf32> to vector<4x8xf32>
    %196 = vector.shape_cast %195 : vector<4x8xf32> to vector<4x8x1xf32>
    %cst_50 = arith.constant dense<0xFF800000> : vector<4x8xf32>
    %197 = vector.multi_reduction <maximumf>, %187, %cst_50 [2] : vector<4x8x8xf32> to vector<4x8xf32>
    %198 = vector.shape_cast %197 : vector<4x8xf32> to vector<4x8x1xf32>
    %199 = arith.maximumf %198, %196 : vector<4x8x1xf32>
    %200 = vector.broadcast %199 : vector<4x8x1xf32> to vector<4x8x8xf32>
    %201 = arith.subf %187, %200 : vector<4x8x8xf32>
    %202 = math.exp %201 : vector<4x8x8xf32>
    %203 = arith.subf %196, %199 : vector<4x8x1xf32>
    %204 = math.exp %203 : vector<4x8x1xf32>
    %cst_51 = arith.constant dense<0.000000e+00> : vector<4x8xf32>
    %205 = vector.multi_reduction <add>, %202, %cst_51 [2] : vector<4x8x8xf32> to vector<4x8xf32>
    %206 = vector.shape_cast %205 : vector<4x8xf32> to vector<4x8x1xf32>
    %207 = arith.addf %206, %204 : vector<4x8x1xf32>
    %208 = arith.truncf %202 : vector<4x8x8xf32> to vector<4x8x8xbf16>
    %cst_52 = arith.constant dense<0.000000e+00> : vector<4x8x8xf32>
    %209 = tpu.matmul %208, %186, %cst_52 {dimension_numbers = #tpu.dot_dimension_numbers<[2], [1], [1], [2], [0, 0, 0, 1, 1, 2], [0], [0]>} : vector<4x8x8xbf16>, vector<4x8x8xbf16>, vector<4x8x8xf32> -> vector<4x8x8xf32>
    %210 = vector.broadcast %204 : vector<4x8x1xf32> to vector<4x8x8xf32>
    %211 = vector.broadcast %191 : vector<4x1x8xf32> to vector<4x8x8xf32>
    %212 = arith.mulf %210, %211 : vector<4x8x8xf32>
    %213 = arith.addf %209, %212 : vector<4x8x8xf32>
    %214 = tpu.reciprocal %207 {approx = true} : vector<4x8x1xf32> -> vector<4x8x1xf32>
    %215 = vector.broadcast %214 : vector<4x8x1xf32> to vector<4x8x8xf32>
    %216 = arith.mulf %213, %215 : vector<4x8x8xf32>
    %217 = vector.shape_cast %216 : vector<4x8x8xf32> to vector<32x8xf32>
    %218 = tpu.concatenate %115, %149, %183, %217 in 1 : vector<32x8xf32>, vector<32x8xf32>, vector<32x8xf32>, vector<32x8xf32> -> vector<32x32xf32>
    %219 = arith.truncf %218 : vector<32x32xf32> to vector<32x32xbf16>
    %c0_53 = arith.constant 0 : index
    %c0_54 = arith.constant 0 : index
    %220 = vector.load %arg7[%c0_53, %c0_54] : memref<32x32xbf16, #tpu.memory_space<vmem>>, vector<32x32xbf16>
    %cst_55 = arith.constant dense<0.000000e+00> : vector<32x32xf32>
    %221 = tpu.matmul %219, %220, %cst_55 {dimension_numbers = #tpu.dot_dimension_numbers<[1], [0], [0], [1], [0, 0, 1, 1], [], []>} : vector<32x32xbf16>, vector<32x32xbf16>, vector<32x32xf32> -> vector<32x32xf32>
    %c0_56 = arith.constant 0 : index
    %c0_57 = arith.constant 0 : index
    %222 = vector.load %arg8[%c0_56, %c0_57] : memref<1x32xf32, #tpu.memory_space<vmem>>, vector<1x32xf32>
    %223 = vector.broadcast %222 : vector<1x32xf32> to vector<32x32xf32>
    %224 = arith.addf %221, %223 : vector<32x32xf32>
    %225 = arith.addf %8, %224 : vector<32x32xf32>
    %c0_58 = arith.constant 0 : index
    %c0_59 = arith.constant 0 : index
    %226 = vector.load %arg9[%c0_58, %c0_59] : memref<1x32xf32, #tpu.memory_space<vmem>>, vector<1x32xf32>
    %c0_60 = arith.constant 0 : index
    %c0_61 = arith.constant 0 : index
    %227 = vector.load %arg10[%c0_60, %c0_61] : memref<1x32xf32, #tpu.memory_space<vmem>>, vector<1x32xf32>
    %cst_62 = arith.constant dense<0.000000e+00> : vector<32xf32>
    %228 = vector.multi_reduction <add>, %225, %cst_62 [1] : vector<32x32xf32> to vector<32xf32>
    %229 = vector.shape_cast %228 : vector<32xf32> to vector<32x1xf32>
    %cst_63 = arith.constant 3.200000e+01 : f32
    %230 = vector.broadcast %cst_63 : f32 to vector<32x1xf32>
    %231 = arith.divf %229, %230 : vector<32x1xf32>
    %232 = vector.broadcast %231 : vector<32x1xf32> to vector<32x32xf32>
    %233 = arith.subf %225, %232 : vector<32x32xf32>
    %234 = arith.mulf %233, %233 : vector<32x32xf32>
    %cst_64 = arith.constant dense<0.000000e+00> : vector<32xf32>
    %235 = vector.multi_reduction <add>, %234, %cst_64 [1] : vector<32x32xf32> to vector<32xf32>
    %236 = vector.shape_cast %235 : vector<32xf32> to vector<32x1xf32>
    %cst_65 = arith.constant 3.200000e+01 : f32
    %237 = vector.broadcast %cst_65 : f32 to vector<32x1xf32>
    %238 = arith.divf %236, %237 : vector<32x1xf32>
    %239 = vector.broadcast %231 : vector<32x1xf32> to vector<32x32xf32>
    %240 = arith.subf %225, %239 : vector<32x32xf32>
    %cst_66 = arith.constant 9.99999974E-6 : f32
    %241 = vector.broadcast %cst_66 : f32 to vector<32x1xf32>
    %242 = arith.addf %238, %241 : vector<32x1xf32>
    %243 = math.rsqrt %242 : vector<32x1xf32>
    %244 = vector.broadcast %243 : vector<32x1xf32> to vector<32x32xf32>
    %245 = arith.mulf %240, %244 : vector<32x32xf32>
    %246 = vector.broadcast %226 : vector<1x32xf32> to vector<32x32xf32>
    %247 = arith.mulf %245, %246 : vector<32x32xf32>
    %248 = vector.broadcast %227 : vector<1x32xf32> to vector<32x32xf32>
    %249 = arith.addf %247, %248 : vector<32x32xf32>
    %250 = arith.truncf %249 : vector<32x32xf32> to vector<32x32xbf16>
    %c0_67 = arith.constant 0 : index
    %c0_68 = arith.constant 0 : index
    %251 = vector.load %arg11[%c0_67, %c0_68] : memref<32x128xbf16, #tpu.memory_space<vmem>>, vector<32x128xbf16>
    %cst_69 = arith.constant dense<0.000000e+00> : vector<32x128xf32>
    %252 = tpu.matmul %250, %251, %cst_69 {dimension_numbers = #tpu.dot_dimension_numbers<[1], [0], [0], [1], [0, 0, 1, 1], [], []>} : vector<32x32xbf16>, vector<32x128xbf16>, vector<32x128xf32> -> vector<32x128xf32>
    %c0_70 = arith.constant 0 : index
    %c0_71 = arith.constant 0 : index
    %253 = vector.load %arg12[%c0_70, %c0_71] : memref<1x128xf32, #tpu.memory_space<vmem>>, vector<1x128xf32>
    %254 = vector.broadcast %253 : vector<1x128xf32> to vector<32x128xf32>
    %255 = arith.addf %252, %254 : vector<32x128xf32>
    %cst_72 = arith.constant 1.702000e+00 : f32
    %256 = vector.broadcast %cst_72 : f32 to vector<32x128xf32>
    %257 = arith.mulf %256, %255 : vector<32x128xf32>
    %258 = arith.negf %257 : vector<32x128xf32>
    %259 = math.exp %258 : vector<32x128xf32>
    %cst_73 = arith.constant 1.000000e+00 : f32
    %260 = vector.broadcast %cst_73 : f32 to vector<32x128xf32>
    %261 = arith.addf %260, %259 : vector<32x128xf32>
    %262 = arith.divf %260, %261 : vector<32x128xf32>
    %263 = arith.mulf %255, %262 : vector<32x128xf32>
    %264 = arith.truncf %263 : vector<32x128xf32> to vector<32x128xbf16>
    %c0_74 = arith.constant 0 : index
    %c0_75 = arith.constant 0 : index
    %265 = vector.load %arg13[%c0_74, %c0_75] : memref<128x32xbf16, #tpu.memory_space<vmem>>, vector<128x32xbf16>
    %cst_76 = arith.constant dense<0.000000e+00> : vector<32x32xf32>
    %266 = tpu.matmul %264, %265, %cst_76 {dimension_numbers = #tpu.dot_dimension_numbers<[1], [0], [0], [1], [0, 0, 1, 1], [], []>} : vector<32x128xbf16>, vector<128x32xbf16>, vector<32x32xf32> -> vector<32x32xf32>
    %267 = arith.addf %225, %266 : vector<32x32xf32>
    %c0_77 = arith.constant 0 : index
    %c0_78 = arith.constant 0 : index
    %268 = vector.load %arg14[%c0_77, %c0_78] : memref<1x32xf32, #tpu.memory_space<vmem>>, vector<1x32xf32>
    %269 = vector.broadcast %268 : vector<1x32xf32> to vector<32x32xf32>
    %270 = arith.addf %267, %269 : vector<32x32xf32>
    %271 = vector.extract_strided_slice %270 {offsets = [0, 0], sizes = [8, 32], strides = [1, 1]} : vector<32x32xf32> to vector<8x32xf32>
    %c0_79 = arith.constant 0 : index
    %c0_80 = arith.constant 0 : index
    %c0_81 = arith.constant 0 : index
    %272 = vector.load %arg15[%c0_79, %c0_80, %c0_81] : memref<8x4x32xf32, #tpu.memory_space<vmem>>, vector<8x1x32xf32>
    %273 = vector.shape_cast %272 : vector<8x1x32xf32> to vector<8x32xf32>
    %274 = vector.shape_cast %271 : vector<8x32xf32> to vector<8x1x32xf32>
    tpu.vector_store %arg15[%c0_79, %c0_80, %c0_81], %274 {strides = array<i32>} : memref<8x4x32xf32, #tpu.memory_space<vmem>>, vector<8x1x32xf32>,
    %275 = vector.extract_strided_slice %270 {offsets = [8, 0], sizes = [8, 32], strides = [1, 1]} : vector<32x32xf32> to vector<8x32xf32>
    %c0_82 = arith.constant 0 : index
    %c1_83 = arith.constant 1 : index
    %c0_84 = arith.constant 0 : index
    %276 = vector.load %arg15[%c0_82, %c1_83, %c0_84] : memref<8x4x32xf32, #tpu.memory_space<vmem>>, vector<8x1x32xf32>
    %277 = vector.shape_cast %276 : vector<8x1x32xf32> to vector<8x32xf32>
    %278 = vector.shape_cast %275 : vector<8x32xf32> to vector<8x1x32xf32>
    tpu.vector_store %arg15[%c0_82, %c1_83, %c0_84], %278 {strides = array<i32>} : memref<8x4x32xf32, #tpu.memory_space<vmem>>, vector<8x1x32xf32>,
    %279 = vector.extract_strided_slice %270 {offsets = [16, 0], sizes = [8, 32], strides = [1, 1]} : vector<32x32xf32> to vector<8x32xf32>
    %c0_85 = arith.constant 0 : index
    %c2_86 = arith.constant 2 : index
    %c0_87 = arith.constant 0 : index
    %280 = vector.load %arg15[%c0_85, %c2_86, %c0_87] : memref<8x4x32xf32, #tpu.memory_space<vmem>>, vector<8x1x32xf32>
    %281 = vector.shape_cast %280 : vector<8x1x32xf32> to vector<8x32xf32>
    %282 = vector.shape_cast %279 : vector<8x32xf32> to vector<8x1x32xf32>
    tpu.vector_store %arg15[%c0_85, %c2_86, %c0_87], %282 {strides = array<i32>} : memref<8x4x32xf32, #tpu.memory_space<vmem>>, vector<8x1x32xf32>,
    %283 = vector.extract_strided_slice %270 {offsets = [24, 0], sizes = [8, 32], strides = [1, 1]} : vector<32x32xf32> to vector<8x32xf32>
    %c0_88 = arith.constant 0 : index
    %c3_89 = arith.constant 3 : index
    %c0_90 = arith.constant 0 : index
    %284 = vector.load %arg15[%c0_88, %c3_89, %c0_90] : memref<8x4x32xf32, #tpu.memory_space<vmem>>, vector<8x1x32xf32>
    %285 = vector.shape_cast %284 : vector<8x1x32xf32> to vector<8x32xf32>
    %286 = vector.shape_cast %283 : vector<8x32xf32> to vector<8x1x32xf32>
    tpu.vector_store %arg15[%c0_88, %c3_89, %c0_90], %286 {strides = array<i32>} : memref<8x4x32xf32, #tpu.memory_space<vmem>>, vector<8x1x32xf32>,
    return
  }
  func.func @transform_0(%arg0: i32) -> (i32, i32, i32) {
    %c0_i32 = arith.constant 0 : i32
    %c0_i32_0 = arith.constant 0 : i32
    %c0_i32_1 = arith.constant 0 : i32
    return %c0_i32, %arg0, %c0_i32_0 : i32, i32, i32
  }
  func.func @transform_1(%arg0: i32) -> (i32, i32) {
    %c0_i32 = arith.constant 0 : i32
    %c0_i32_0 = arith.constant 0 : i32
    return %arg0, %c0_i32 : i32, i32
  }
  func.func @transform_2(%arg0: i32) -> (i32, i32) {
    %c0_i32 = arith.constant 0 : i32
    %c0_i32_0 = arith.constant 0 : i32
    %c0_i32_1 = arith.constant 0 : i32
    return %c0_i32, %c0_i32_0 : i32, i32
  }
  func.func @transform_3(%arg0: i32) -> (i32, i32) {
    %c0_i32 = arith.constant 0 : i32
    %c0_i32_0 = arith.constant 0 : i32
    %c0_i32_1 = arith.constant 0 : i32
    return %c0_i32, %c0_i32_0 : i32, i32
  }
  func.func @transform_4(%arg0: i32) -> (i32, i32) {
    %c0_i32 = arith.constant 0 : i32
    %c0_i32_0 = arith.constant 0 : i32
    %c0_i32_1 = arith.constant 0 : i32
    return %c0_i32, %c0_i32_0 : i32, i32
  }
  func.func @transform_5(%arg0: i32) -> (i32, i32) {
    %c0_i32 = arith.constant 0 : i32
    %c0_i32_0 = arith.constant 0 : i32
    %c0_i32_1 = arith.constant 0 : i32
    return %c0_i32, %c0_i32_0 : i32, i32
  }
  func.func @transform_6(%arg0: i32) -> (i32, i32) {
    %c0_i32 = arith.constant 0 : i32
    %c0_i32_0 = arith.constant 0 : i32
    %c0_i32_1 = arith.constant 0 : i32
    return %c0_i32, %c0_i32_0 : i32, i32
  }
  func.func @transform_7(%arg0: i32) -> (i32, i32) {
    %c0_i32 = arith.constant 0 : i32
    %c0_i32_0 = arith.constant 0 : i32
    %c0_i32_1 = arith.constant 0 : i32
    return %c0_i32, %c0_i32_0 : i32, i32
  }
  func.func @transform_8(%arg0: i32) -> (i32, i32) {
    %c0_i32 = arith.constant 0 : i32
    %c0_i32_0 = arith.constant 0 : i32
    %c0_i32_1 = arith.constant 0 : i32
    return %c0_i32, %c0_i32_0 : i32, i32
  }
  func.func @transform_9(%arg0: i32) -> (i32, i32) {
    %c0_i32 = arith.constant 0 : i32
    %c0_i32_0 = arith.constant 0 : i32
    %c0_i32_1 = arith.constant 0 : i32
    return %c0_i32, %c0_i32_0 : i32, i32
  }
  func.func @transform_10(%arg0: i32) -> (i32, i32) {
    %c0_i32 = arith.constant 0 : i32
    %c0_i32_0 = arith.constant 0 : i32
    %c0_i32_1 = arith.constant 0 : i32
    return %c0_i32, %c0_i32_0 : i32, i32
  }
  func.func @transform_11(%arg0: i32) -> (i32, i32) {
    %c0_i32 = arith.constant 0 : i32
    %c0_i32_0 = arith.constant 0 : i32
    %c0_i32_1 = arith.constant 0 : i32
    return %c0_i32, %c0_i32_0 : i32, i32
  }
  func.func @transform_12(%arg0: i32) -> (i32, i32) {
    %c0_i32 = arith.constant 0 : i32
    %c0_i32_0 = arith.constant 0 : i32
    %c0_i32_1 = arith.constant 0 : i32
    return %c0_i32, %c0_i32_0 : i32, i32
  }
  func.func @transform_13(%arg0: i32) -> (i32, i32) {
    %c0_i32 = arith.constant 0 : i32
    %c0_i32_0 = arith.constant 0 : i32
    %c0_i32_1 = arith.constant 0 : i32
    return %c0_i32, %c0_i32_0 : i32, i32
  }
  func.func @transform_14(%arg0: i32) -> (i32, i32, i32) {
    %c0_i32 = arith.constant 0 : i32
    %c0_i32_0 = arith.constant 0 : i32
    %c0_i32_1 = arith.constant 0 : i32
    return %c0_i32, %arg0, %c0_i32_0 : i32, i32, i32
  }
}

module attributes {stable_mosaic.version = 11 : i64} {
  func.func @_msg_attn_kernel(%arg0: i32, %arg1: memref<1x2x32xf32, #tpu.memory_space<vmem>>, %arg2: memref<32x32xbf16, #tpu.memory_space<vmem>>, %arg3: memref<1x32xf32, #tpu.memory_space<vmem>>, %arg4: memref<1x32xf32, #tpu.memory_space<vmem>>, %arg5: memref<1x32xf32, #tpu.memory_space<vmem>>, %arg6: memref<32x96xbf16, #tpu.memory_space<vmem>>, %arg7: memref<1x96xf32, #tpu.memory_space<vmem>>, %arg8: memref<32x32xbf16, #tpu.memory_space<vmem>>, %arg9: memref<1x32xf32, #tpu.memory_space<vmem>>, %arg10: memref<1x2x32xf32, #tpu.memory_space<vmem>>) attributes {dimension_semantics = [#tpu.dimension_semantics<parallel>], iteration_bounds = array<i64: 2>, scalar_prefetch = 0 : i64, scratch_operands = 0 : i64, tpu.core_type = #tpu.core_type<tc>, window_params = [{transform_indices = @transform_0, window_bounds = array<i64: 1, 2, 32>}, {pipeline_mode = #tpu.pipeline_mode<synchronous>, transform_indices = @transform_1, window_bounds = array<i64: 32, 32>}, {pipeline_mode = #tpu.pipeline_mode<synchronous>, transform_indices = @transform_2, window_bounds = array<i64: 1, 32>}, {pipeline_mode = #tpu.pipeline_mode<synchronous>, transform_indices = @transform_3, window_bounds = array<i64: 1, 32>}, {pipeline_mode = #tpu.pipeline_mode<synchronous>, transform_indices = @transform_4, window_bounds = array<i64: 1, 32>}, {pipeline_mode = #tpu.pipeline_mode<synchronous>, transform_indices = @transform_5, window_bounds = array<i64: 32, 96>}, {pipeline_mode = #tpu.pipeline_mode<synchronous>, transform_indices = @transform_6, window_bounds = array<i64: 1, 96>}, {pipeline_mode = #tpu.pipeline_mode<synchronous>, transform_indices = @transform_7, window_bounds = array<i64: 32, 32>}, {pipeline_mode = #tpu.pipeline_mode<synchronous>, transform_indices = @transform_8, window_bounds = array<i64: 1, 32>}, {transform_indices = @transform_9, window_bounds = array<i64: 1, 2, 32>}]} {
    %c0 = arith.constant 0 : index
    %c0_0 = arith.constant 0 : index
    %0 = vector.load %arg2[%c0, %c0_0] : memref<32x32xbf16, #tpu.memory_space<vmem>>, vector<32x32xbf16>
    %c0_1 = arith.constant 0 : index
    %c0_2 = arith.constant 0 : index
    %c0_3 = arith.constant 0 : index
    %1 = vector.load %arg1[%c0_1, %c0_2, %c0_3] : memref<1x2x32xf32, #tpu.memory_space<vmem>>, vector<1x2x32xf32>
    %2 = vector.shape_cast %1 : vector<1x2x32xf32> to vector<2x32xf32>
    %3 = arith.truncf %2 : vector<2x32xf32> to vector<2x32xbf16>
    %cst = arith.constant dense<0.000000e+00> : vector<2x32xf32>
    %4 = tpu.matmul %3, %0, %cst {dimension_numbers = #tpu.dot_dimension_numbers<[1], [0], [0], [1], [0, 0, 1, 1], [], []>} : vector<2x32xbf16>, vector<32x32xbf16>, vector<2x32xf32> -> vector<2x32xf32>
    %c0_4 = arith.constant 0 : index
    %c0_5 = arith.constant 0 : index
    %5 = vector.load %arg3[%c0_4, %c0_5] : memref<1x32xf32, #tpu.memory_space<vmem>>, vector<1x32xf32>
    %6 = vector.broadcast %5 : vector<1x32xf32> to vector<2x32xf32>
    %7 = arith.addf %4, %6 : vector<2x32xf32>
    %c0_6 = arith.constant 0 : index
    %c0_7 = arith.constant 0 : index
    %8 = vector.load %arg4[%c0_6, %c0_7] : memref<1x32xf32, #tpu.memory_space<vmem>>, vector<1x32xf32>
    %c0_8 = arith.constant 0 : index
    %c0_9 = arith.constant 0 : index
    %9 = vector.load %arg5[%c0_8, %c0_9] : memref<1x32xf32, #tpu.memory_space<vmem>>, vector<1x32xf32>
    %cst_10 = arith.constant dense<0.000000e+00> : vector<2xf32>
    %10 = vector.multi_reduction <add>, %7, %cst_10 [1] : vector<2x32xf32> to vector<2xf32>
    %11 = vector.shape_cast %10 : vector<2xf32> to vector<2x1xf32>
    %cst_11 = arith.constant 3.200000e+01 : f32
    %12 = vector.broadcast %cst_11 : f32 to vector<2x1xf32>
    %13 = arith.divf %11, %12 : vector<2x1xf32>
    %14 = vector.broadcast %13 : vector<2x1xf32> to vector<2x32xf32>
    %15 = arith.subf %7, %14 : vector<2x32xf32>
    %16 = arith.mulf %15, %15 : vector<2x32xf32>
    %cst_12 = arith.constant dense<0.000000e+00> : vector<2xf32>
    %17 = vector.multi_reduction <add>, %16, %cst_12 [1] : vector<2x32xf32> to vector<2xf32>
    %18 = vector.shape_cast %17 : vector<2xf32> to vector<2x1xf32>
    %cst_13 = arith.constant 3.200000e+01 : f32
    %19 = vector.broadcast %cst_13 : f32 to vector<2x1xf32>
    %20 = arith.divf %18, %19 : vector<2x1xf32>
    %21 = vector.broadcast %13 : vector<2x1xf32> to vector<2x32xf32>
    %22 = arith.subf %7, %21 : vector<2x32xf32>
    %cst_14 = arith.constant 9.99999974E-6 : f32
    %23 = vector.broadcast %cst_14 : f32 to vector<2x1xf32>
    %24 = arith.addf %20, %23 : vector<2x1xf32>
    %25 = math.rsqrt %24 : vector<2x1xf32>
    %26 = vector.broadcast %25 : vector<2x1xf32> to vector<2x32xf32>
    %27 = arith.mulf %22, %26 : vector<2x32xf32>
    %28 = vector.broadcast %8 : vector<1x32xf32> to vector<2x32xf32>
    %29 = arith.mulf %27, %28 : vector<2x32xf32>
    %30 = vector.broadcast %9 : vector<1x32xf32> to vector<2x32xf32>
    %31 = arith.addf %29, %30 : vector<2x32xf32>
    %c0_15 = arith.constant 0 : index
    %c0_16 = arith.constant 0 : index
    %32 = vector.load %arg6[%c0_15, %c0_16] : memref<32x96xbf16, #tpu.memory_space<vmem>>, vector<32x96xbf16>
    %33 = arith.truncf %31 : vector<2x32xf32> to vector<2x32xbf16>
    %cst_17 = arith.constant dense<0.000000e+00> : vector<2x96xf32>
    %34 = tpu.matmul %33, %32, %cst_17 {dimension_numbers = #tpu.dot_dimension_numbers<[1], [0], [0], [1], [0, 0, 1, 1], [], []>} : vector<2x32xbf16>, vector<32x96xbf16>, vector<2x96xf32> -> vector<2x96xf32>
    %c0_18 = arith.constant 0 : index
    %c0_19 = arith.constant 0 : index
    %35 = vector.load %arg7[%c0_18, %c0_19] : memref<1x96xf32, #tpu.memory_space<vmem>>, vector<1x96xf32>
    %36 = vector.broadcast %35 : vector<1x96xf32> to vector<2x96xf32>
    %37 = arith.addf %34, %36 : vector<2x96xf32>
    %38 = arith.truncf %37 : vector<2x96xf32> to vector<2x96xbf16>
    %39 = vector.extract_strided_slice %38 {offsets = [0, 0], sizes = [2, 32], strides = [1, 1]} : vector<2x96xbf16> to vector<2x32xbf16>
    %40 = vector.shape_cast %39 : vector<2x32xbf16> to vector<1x2x32xbf16>
    %41 = vector.extract_strided_slice %38 {offsets = [0, 32], sizes = [2, 32], strides = [1, 1]} : vector<2x96xbf16> to vector<2x32xbf16>
    %42 = vector.shape_cast %41 : vector<2x32xbf16> to vector<1x2x32xbf16>
    %43 = vector.extract_strided_slice %38 {offsets = [0, 64], sizes = [2, 32], strides = [1, 1]} : vector<2x96xbf16> to vector<2x32xbf16>
    %44 = vector.shape_cast %43 : vector<2x32xbf16> to vector<1x2x32xbf16>
    %45 = vector.extract_strided_slice %40 {offsets = [0, 0, 0], sizes = [1, 2, 8], strides = [1, 1, 1]} : vector<1x2x32xbf16> to vector<1x2x8xbf16>
    %46 = vector.extract_strided_slice %42 {offsets = [0, 0, 0], sizes = [1, 2, 8], strides = [1, 1, 1]} : vector<1x2x32xbf16> to vector<1x2x8xbf16>
    %47 = vector.extract_strided_slice %44 {offsets = [0, 0, 0], sizes = [1, 2, 8], strides = [1, 1, 1]} : vector<1x2x32xbf16> to vector<1x2x8xbf16>
    %cst_20 = arith.constant dense<0.000000e+00> : vector<1x2x2xf32>
    %48 = tpu.matmul %45, %46, %cst_20 {dimension_numbers = #tpu.dot_dimension_numbers<[2], [2], [1], [1], [0, 0, 0, 1, 1, 1], [0], [0]>} : vector<1x2x8xbf16>, vector<1x2x8xbf16>, vector<1x2x2xf32> -> vector<1x2x2xf32>
    %cst_21 = arith.constant dense<0xFF800000> : vector<1x2xf32>
    %49 = vector.multi_reduction <maximumf>, %48, %cst_21 [2] : vector<1x2x2xf32> to vector<1x2xf32>
    %50 = vector.shape_cast %49 : vector<1x2xf32> to vector<1x2x1xf32>
    %51 = vector.broadcast %50 : vector<1x2x1xf32> to vector<1x2x2xf32>
    %52 = arith.subf %48, %51 : vector<1x2x2xf32>
    %53 = math.exp %52 : vector<1x2x2xf32>
    %cst_22 = arith.constant dense<0.000000e+00> : vector<1x2xf32>
    %54 = vector.multi_reduction <add>, %53, %cst_22 [2] : vector<1x2x2xf32> to vector<1x2xf32>
    %55 = vector.shape_cast %54 : vector<1x2xf32> to vector<1x2x1xf32>
    %56 = arith.truncf %53 : vector<1x2x2xf32> to vector<1x2x2xbf16>
    %cst_23 = arith.constant dense<0.000000e+00> : vector<1x2x8xf32>
    %57 = tpu.matmul %56, %47, %cst_23 {dimension_numbers = #tpu.dot_dimension_numbers<[2], [1], [1], [2], [0, 0, 0, 1, 1, 2], [0], [0]>} : vector<1x2x2xbf16>, vector<1x2x8xbf16>, vector<1x2x8xf32> -> vector<1x2x8xf32>
    %58 = tpu.reciprocal %55 {approx = true} : vector<1x2x1xf32> -> vector<1x2x1xf32>
    %59 = vector.broadcast %58 : vector<1x2x1xf32> to vector<1x2x8xf32>
    %60 = arith.mulf %57, %59 : vector<1x2x8xf32>
    %61 = vector.shape_cast %60 : vector<1x2x8xf32> to vector<2x8xf32>
    %62 = vector.extract_strided_slice %40 {offsets = [0, 0, 8], sizes = [1, 2, 8], strides = [1, 1, 1]} : vector<1x2x32xbf16> to vector<1x2x8xbf16>
    %63 = vector.extract_strided_slice %42 {offsets = [0, 0, 8], sizes = [1, 2, 8], strides = [1, 1, 1]} : vector<1x2x32xbf16> to vector<1x2x8xbf16>
    %64 = vector.extract_strided_slice %44 {offsets = [0, 0, 8], sizes = [1, 2, 8], strides = [1, 1, 1]} : vector<1x2x32xbf16> to vector<1x2x8xbf16>
    %cst_24 = arith.constant dense<0.000000e+00> : vector<1x2x2xf32>
    %65 = tpu.matmul %62, %63, %cst_24 {dimension_numbers = #tpu.dot_dimension_numbers<[2], [2], [1], [1], [0, 0, 0, 1, 1, 1], [0], [0]>} : vector<1x2x8xbf16>, vector<1x2x8xbf16>, vector<1x2x2xf32> -> vector<1x2x2xf32>
    %cst_25 = arith.constant dense<0xFF800000> : vector<1x2xf32>
    %66 = vector.multi_reduction <maximumf>, %65, %cst_25 [2] : vector<1x2x2xf32> to vector<1x2xf32>
    %67 = vector.shape_cast %66 : vector<1x2xf32> to vector<1x2x1xf32>
    %68 = vector.broadcast %67 : vector<1x2x1xf32> to vector<1x2x2xf32>
    %69 = arith.subf %65, %68 : vector<1x2x2xf32>
    %70 = math.exp %69 : vector<1x2x2xf32>
    %cst_26 = arith.constant dense<0.000000e+00> : vector<1x2xf32>
    %71 = vector.multi_reduction <add>, %70, %cst_26 [2] : vector<1x2x2xf32> to vector<1x2xf32>
    %72 = vector.shape_cast %71 : vector<1x2xf32> to vector<1x2x1xf32>
    %73 = arith.truncf %70 : vector<1x2x2xf32> to vector<1x2x2xbf16>
    %cst_27 = arith.constant dense<0.000000e+00> : vector<1x2x8xf32>
    %74 = tpu.matmul %73, %64, %cst_27 {dimension_numbers = #tpu.dot_dimension_numbers<[2], [1], [1], [2], [0, 0, 0, 1, 1, 2], [0], [0]>} : vector<1x2x2xbf16>, vector<1x2x8xbf16>, vector<1x2x8xf32> -> vector<1x2x8xf32>
    %75 = tpu.reciprocal %72 {approx = true} : vector<1x2x1xf32> -> vector<1x2x1xf32>
    %76 = vector.broadcast %75 : vector<1x2x1xf32> to vector<1x2x8xf32>
    %77 = arith.mulf %74, %76 : vector<1x2x8xf32>
    %78 = vector.shape_cast %77 : vector<1x2x8xf32> to vector<2x8xf32>
    %79 = vector.extract_strided_slice %40 {offsets = [0, 0, 16], sizes = [1, 2, 8], strides = [1, 1, 1]} : vector<1x2x32xbf16> to vector<1x2x8xbf16>
    %80 = vector.extract_strided_slice %42 {offsets = [0, 0, 16], sizes = [1, 2, 8], strides = [1, 1, 1]} : vector<1x2x32xbf16> to vector<1x2x8xbf16>
    %81 = vector.extract_strided_slice %44 {offsets = [0, 0, 16], sizes = [1, 2, 8], strides = [1, 1, 1]} : vector<1x2x32xbf16> to vector<1x2x8xbf16>
    %cst_28 = arith.constant dense<0.000000e+00> : vector<1x2x2xf32>
    %82 = tpu.matmul %79, %80, %cst_28 {dimension_numbers = #tpu.dot_dimension_numbers<[2], [2], [1], [1], [0, 0, 0, 1, 1, 1], [0], [0]>} : vector<1x2x8xbf16>, vector<1x2x8xbf16>, vector<1x2x2xf32> -> vector<1x2x2xf32>
    %cst_29 = arith.constant dense<0xFF800000> : vector<1x2xf32>
    %83 = vector.multi_reduction <maximumf>, %82, %cst_29 [2] : vector<1x2x2xf32> to vector<1x2xf32>
    %84 = vector.shape_cast %83 : vector<1x2xf32> to vector<1x2x1xf32>
    %85 = vector.broadcast %84 : vector<1x2x1xf32> to vector<1x2x2xf32>
    %86 = arith.subf %82, %85 : vector<1x2x2xf32>
    %87 = math.exp %86 : vector<1x2x2xf32>
    %cst_30 = arith.constant dense<0.000000e+00> : vector<1x2xf32>
    %88 = vector.multi_reduction <add>, %87, %cst_30 [2] : vector<1x2x2xf32> to vector<1x2xf32>
    %89 = vector.shape_cast %88 : vector<1x2xf32> to vector<1x2x1xf32>
    %90 = arith.truncf %87 : vector<1x2x2xf32> to vector<1x2x2xbf16>
    %cst_31 = arith.constant dense<0.000000e+00> : vector<1x2x8xf32>
    %91 = tpu.matmul %90, %81, %cst_31 {dimension_numbers = #tpu.dot_dimension_numbers<[2], [1], [1], [2], [0, 0, 0, 1, 1, 2], [0], [0]>} : vector<1x2x2xbf16>, vector<1x2x8xbf16>, vector<1x2x8xf32> -> vector<1x2x8xf32>
    %92 = tpu.reciprocal %89 {approx = true} : vector<1x2x1xf32> -> vector<1x2x1xf32>
    %93 = vector.broadcast %92 : vector<1x2x1xf32> to vector<1x2x8xf32>
    %94 = arith.mulf %91, %93 : vector<1x2x8xf32>
    %95 = vector.shape_cast %94 : vector<1x2x8xf32> to vector<2x8xf32>
    %96 = vector.extract_strided_slice %40 {offsets = [0, 0, 24], sizes = [1, 2, 8], strides = [1, 1, 1]} : vector<1x2x32xbf16> to vector<1x2x8xbf16>
    %97 = vector.extract_strided_slice %42 {offsets = [0, 0, 24], sizes = [1, 2, 8], strides = [1, 1, 1]} : vector<1x2x32xbf16> to vector<1x2x8xbf16>
    %98 = vector.extract_strided_slice %44 {offsets = [0, 0, 24], sizes = [1, 2, 8], strides = [1, 1, 1]} : vector<1x2x32xbf16> to vector<1x2x8xbf16>
    %cst_32 = arith.constant dense<0.000000e+00> : vector<1x2x2xf32>
    %99 = tpu.matmul %96, %97, %cst_32 {dimension_numbers = #tpu.dot_dimension_numbers<[2], [2], [1], [1], [0, 0, 0, 1, 1, 1], [0], [0]>} : vector<1x2x8xbf16>, vector<1x2x8xbf16>, vector<1x2x2xf32> -> vector<1x2x2xf32>
    %cst_33 = arith.constant dense<0xFF800000> : vector<1x2xf32>
    %100 = vector.multi_reduction <maximumf>, %99, %cst_33 [2] : vector<1x2x2xf32> to vector<1x2xf32>
    %101 = vector.shape_cast %100 : vector<1x2xf32> to vector<1x2x1xf32>
    %102 = vector.broadcast %101 : vector<1x2x1xf32> to vector<1x2x2xf32>
    %103 = arith.subf %99, %102 : vector<1x2x2xf32>
    %104 = math.exp %103 : vector<1x2x2xf32>
    %cst_34 = arith.constant dense<0.000000e+00> : vector<1x2xf32>
    %105 = vector.multi_reduction <add>, %104, %cst_34 [2] : vector<1x2x2xf32> to vector<1x2xf32>
    %106 = vector.shape_cast %105 : vector<1x2xf32> to vector<1x2x1xf32>
    %107 = arith.truncf %104 : vector<1x2x2xf32> to vector<1x2x2xbf16>
    %cst_35 = arith.constant dense<0.000000e+00> : vector<1x2x8xf32>
    %108 = tpu.matmul %107, %98, %cst_35 {dimension_numbers = #tpu.dot_dimension_numbers<[2], [1], [1], [2], [0, 0, 0, 1, 1, 2], [0], [0]>} : vector<1x2x2xbf16>, vector<1x2x8xbf16>, vector<1x2x8xf32> -> vector<1x2x8xf32>
    %109 = tpu.reciprocal %106 {approx = true} : vector<1x2x1xf32> -> vector<1x2x1xf32>
    %110 = vector.broadcast %109 : vector<1x2x1xf32> to vector<1x2x8xf32>
    %111 = arith.mulf %108, %110 : vector<1x2x8xf32>
    %112 = vector.shape_cast %111 : vector<1x2x8xf32> to vector<2x8xf32>
    %113 = tpu.concatenate %61, %78, %95, %112 in 1 : vector<2x8xf32>, vector<2x8xf32>, vector<2x8xf32>, vector<2x8xf32> -> vector<2x32xf32>
    %114 = arith.truncf %113 : vector<2x32xf32> to vector<2x32xbf16>
    %c0_36 = arith.constant 0 : index
    %c0_37 = arith.constant 0 : index
    %115 = vector.load %arg8[%c0_36, %c0_37] : memref<32x32xbf16, #tpu.memory_space<vmem>>, vector<32x32xbf16>
    %cst_38 = arith.constant dense<0.000000e+00> : vector<2x32xf32>
    %116 = tpu.matmul %114, %115, %cst_38 {dimension_numbers = #tpu.dot_dimension_numbers<[1], [0], [0], [1], [0, 0, 1, 1], [], []>} : vector<2x32xbf16>, vector<32x32xbf16>, vector<2x32xf32> -> vector<2x32xf32>
    %c0_39 = arith.constant 0 : index
    %c0_40 = arith.constant 0 : index
    %117 = vector.load %arg9[%c0_39, %c0_40] : memref<1x32xf32, #tpu.memory_space<vmem>>, vector<1x32xf32>
    %118 = vector.broadcast %117 : vector<1x32xf32> to vector<2x32xf32>
    %119 = arith.addf %116, %118 : vector<2x32xf32>
    %120 = arith.addf %7, %119 : vector<2x32xf32>
    %121 = vector.shape_cast %120 : vector<2x32xf32> to vector<1x2x32xf32>
    %c0_41 = arith.constant 0 : index
    %c0_42 = arith.constant 0 : index
    %c0_43 = arith.constant 0 : index
    %122 = vector.load %arg10[%c0_41, %c0_42, %c0_43] : memref<1x2x32xf32, #tpu.memory_space<vmem>>, vector<1x2x32xf32>
    tpu.vector_store %arg10[%c0_41, %c0_42, %c0_43], %121 {strides = array<i32>} : memref<1x2x32xf32, #tpu.memory_space<vmem>>, vector<1x2x32xf32>,
    return
  }
  func.func @transform_0(%arg0: i32) -> (i32, i32, i32) {
    %c0_i32 = arith.constant 0 : i32
    %c0_i32_0 = arith.constant 0 : i32
    %c0_i32_1 = arith.constant 0 : i32
    return %arg0, %c0_i32, %c0_i32_0 : i32, i32, i32
  }
  func.func @transform_1(%arg0: i32) -> (i32, i32) {
    %c0_i32 = arith.constant 0 : i32
    %c0_i32_0 = arith.constant 0 : i32
    %c0_i32_1 = arith.constant 0 : i32
    return %c0_i32, %c0_i32_0 : i32, i32
  }
  func.func @transform_2(%arg0: i32) -> (i32, i32) {
    %c0_i32 = arith.constant 0 : i32
    %c0_i32_0 = arith.constant 0 : i32
    %c0_i32_1 = arith.constant 0 : i32
    return %c0_i32, %c0_i32_0 : i32, i32
  }
  func.func @transform_3(%arg0: i32) -> (i32, i32) {
    %c0_i32 = arith.constant 0 : i32
    %c0_i32_0 = arith.constant 0 : i32
    %c0_i32_1 = arith.constant 0 : i32
    return %c0_i32, %c0_i32_0 : i32, i32
  }
  func.func @transform_4(%arg0: i32) -> (i32, i32) {
    %c0_i32 = arith.constant 0 : i32
    %c0_i32_0 = arith.constant 0 : i32
    %c0_i32_1 = arith.constant 0 : i32
    return %c0_i32, %c0_i32_0 : i32, i32
  }
  func.func @transform_5(%arg0: i32) -> (i32, i32) {
    %c0_i32 = arith.constant 0 : i32
    %c0_i32_0 = arith.constant 0 : i32
    %c0_i32_1 = arith.constant 0 : i32
    return %c0_i32, %c0_i32_0 : i32, i32
  }
  func.func @transform_6(%arg0: i32) -> (i32, i32) {
    %c0_i32 = arith.constant 0 : i32
    %c0_i32_0 = arith.constant 0 : i32
    %c0_i32_1 = arith.constant 0 : i32
    return %c0_i32, %c0_i32_0 : i32, i32
  }
  func.func @transform_7(%arg0: i32) -> (i32, i32) {
    %c0_i32 = arith.constant 0 : i32
    %c0_i32_0 = arith.constant 0 : i32
    %c0_i32_1 = arith.constant 0 : i32
    return %c0_i32, %c0_i32_0 : i32, i32
  }
  func.func @transform_8(%arg0: i32) -> (i32, i32) {
    %c0_i32 = arith.constant 0 : i32
    %c0_i32_0 = arith.constant 0 : i32
    %c0_i32_1 = arith.constant 0 : i32
    return %c0_i32, %c0_i32_0 : i32, i32
  }
  func.func @transform_9(%arg0: i32) -> (i32, i32, i32) {
    %c0_i32 = arith.constant 0 : i32
    %c0_i32_0 = arith.constant 0 : i32
    %c0_i32_1 = arith.constant 0 : i32
    return %arg0, %c0_i32, %c0_i32_0 : i32, i32, i32
  }
}

</mosaic_0001>

<bundles_post_ra>
// kernel: cross_frame_attention_block.2
= control target key start
LH: loop header
LB: loop body
LE: loop exit
PB: predicated region body
PF: predicated region fallthrough
CT: control target
= control target key end

     0   :  { %s1329_s30 = smov 0   ;;  %s1472_s0 = inlined_call_operand.vmem [shape: f32[2,2,32], index: 0, kind: input, shape index: {}]   ;;  %s1473_s1 = inlined_call_operand.vmem [shape: bf16[32,32], index: 1, kind: input, shape index: {}]   ;;  %s1474_s2 = inlined_call_operand.vmem [shape: f32[1,32], index: 2, kind: input, shape index: {}]   ;;  %s1475_s3 = inlined_call_operand.vmem [shape: f32[1,32], index: 3, kind: input, shape index: {}]   ;;  %s1476_s4 = inlined_call_operand.vmem [shape: f32[1,32], index: 4, kind: input, shape index: {}]   ;;  %s1477_s5 = inlined_call_operand.vmem [shape: bf16[32,96], index: 5, kind: input, shape index: {}]   ;;  %s1478_s6 = inlined_call_operand.vmem [shape: f32[1,96], index: 6, kind: input, shape index: {}]   ;;  %s1479_s7 = inlined_call_operand.vmem [shape: bf16[32,32], index: 7, kind: input, shape index: {}]   ;;  %s1480_s8 = inlined_call_operand.vmem [shape: f32[1,32], index: 8, kind: input, shape index: {}]   ;;  %s1481_s9 = inlined_call_operand.vmem [shape: f32[2,2,32], index: 9, kind: output, shape index: {}]  }
   0x1 LB: > { %s1079_s10 = sadd.s32 4294967295, %s1261_s30   ;;  %p1083_p0 = scmp.ge.s32.totalorder %s1261_s30, 1  ;;  %s1261_s30 = sphi %s1329_s30, %s19_s30  }
   0x2   : > { %p286_p1 = scmp.lt.s32.totalorder %s1261_s30, 3 }
   0x4   : > { %p287_p2 = pnand %p1083_p0, %p286_p1 }
   0x5   : > { %v1231_v0 = vld [vmem:[%s1473_s1] sm:$0xff] (!%p287_p2)   ;;  %v1263_v1 = vmov (!%p287_p2), 0.0   ;;  %v1232_v2 = vld [vmem:[%s1473_s1 + $0x8] sm:$0xff] (!%p287_p2)   ;;  %vm1264_vm0 = vmmov (!%p287_p2), 0   ;;  %p320_p3 = scmp.lt.s32.totalorder (!%p287_p2), %s1079_s10, 1  ;;  %vm354_vm1 = vcmask (!%p287_p2), 261120  }
   0x6   : > { %290 = sbr.rel (%p287_p2) target bundleno = 1869 (0x74d), region = 56  ;;  %1135 = vmatprep.subr.bf16.mxu0 (!%p287_p2), %v1263_v1  ;;  %1143 = vmatprep.subr.bf16.mxu1 (!%p287_p2), %v1263_v1  ;;  %v1086_v5 = vld [vmem:[%s1474_s2] ss:$0 sm:$0xff] (!%p287_p2)  ;;  %vm400_vm2 = vcmask (!%p287_p2), 254976   ;;  %v1234_v18 = vld [vmem:[%s1477_s5 + $0x8] sm:$0xff] (!%p287_p2)   ;;  %s1265_s12 = smov (!%p287_p2), 120  }
   0x7   : > { %1136 = vmatpush3.bf16.msra.mxu0 (!%p287_p2), %v1231_v0  ;;  %1139 = vmatprep.mubr.msk.bf16.mxu0 (!%p287_p2), %vm1264_vm0, %v1263_v1  ;;  %v1233_v17 = vld [vmem:[%s1477_s5] sm:$0xff] (!%p287_p2)   ;;  %s1266_s13 = smov (!%p287_p2), 96   ;;  %s1267_s14 = smov (!%p287_p2), 88   ;;  %vm500_vm3 = vcmask (!%p287_p2), 64512   ;;  %vm547_vm4 = vcmask (!%p287_p2), 9216   ;;  %vm564_vm5 = vcmask (!%p287_p2), 1040384  }
   0x8   : > { %1137 = vmatprep.subr.bf16.mxu0 (!%p287_p2), %v1263_v1  ;;  %1147 = vmatprep.mubr.msk.bf16.mxu1 (!%p287_p2), %vm1264_vm0, %v1263_v1  ;;  %v1090_v23 = vld [vmem:[%s1475_s3] ss:$0 sm:$0xff] (!%p287_p2)  ;;  %s1268_s16 = smov (!%p287_p2), 80   ;;  %s1269_s17 = smov (!%p287_p2), 112   ;;  %vm560_vm6 = vcmask (!%p287_p2), 15360   ;;  %vm953_vm7 = vcmask (!%p287_p2), 130048  }
   0x9   : > { %1144 = vmatpush3.bf16.msra.mxu1 (!%p287_p2), %v1233_v17  ;;  %v1091_v25 = vld [vmem:[%s1476_s4] ss:$0 sm:$0xff] (!%p287_p2)  ;;  %s1271_s19 = smov (!%p287_p2), 104   ;;  %s1272_s20 = smov (!%p287_p2), 64   ;;  %vm955_vm8 = vcmask (!%p287_p2), 195584  }
   0xa   : > { %1145 = vmatprep.subr.bf16.mxu1 (!%p287_p2), %v1263_v1  ;;  %v1092_v29 = vld [vmem:[%s1478_s6] ss:$0 sm:$0xff] (!%p287_p2)  ;;  %s1273_s21 = smov (!%p287_p2), 56   ;;  %s1274_s22 = smov (!%p287_p2), 48  }
   0xb   : > { %1138 = vmatpush3.bf16.msra.mxu0 (!%p287_p2), %v1232_v2  ;;  %s1275_s23 = smov (!%p287_p2), 40   ;;  %s1276_s24 = smov (!%p287_p2), 8  }
   0xc   : > { %1151 = vmatprep.subr.bf16.mxu0 (!%p287_p2), %v1263_v1  ;;  %s1277_s29 = smov (!%p287_p2), 16   ;;  %s1278_s11 = smov (!%p287_p2), 24  }
   0xd   : > { %s1483_s10 = smov (!%p320_p3, %s1079_s10), 1  ;;  %1146 = vmatpush3.bf16.msra.mxu1 %v1234_v18 }
   0xe   : > { %s1084_s15 = sshll.u32 %s1483_s10, 1  ;;  %1157 = vmatprep.subr.bf16.mxu1 %v1263_v1 }
   0xf   : > { %s323_s18 = scalar_lea.vmem %s1472_s0, %s1084_s15 }
  0x10   : > { %v333_v3 = vld [vmem:[%s323_s18] sm:$0x3]  ;;  %s1270_s18 = smov 72  }
  0x11   : > { %v334_v4 = vpack.c.bf16 %v333_v3, %v333_v3 }
  0x13   : > { %1140 = vmatmul.mubr.msk.bf16.vlgmr.msra.gmra.mrb[0].mxu0 %vm354_vm1, %v334_v4 }
  0x14   : > { %1153 = vmatprep.mubr.msk.bf16.mxu0 %vm1264_vm0, %v1263_v1 }
  0xe6   : > { %v392_v6 = vpop.f32.mrb[0].mxu0 }
  0xe7   : > { %v1365_v7 = vadd.f32 %v1086_v5, %v392_v6  ;;  %v1141_v8 = vpop.f32.mrb[1].mxu0 }
  0xe8   : > { %v395_v9 = vpop.f32.mrb[2].mxu0 }
  0xe9   : > { %v1142_v10 = vpop.f32.mrb[3].mxu0  ;;  %v401_v11 = vsel %vm400_vm2, %v1365_v7, 0.0 }
  0xea   : > { %402 = vadd.xlane.f32.xlu0 %v401_v11 }
 0x177   : > { %v403_v12 = vpop.xlane.xlu0 %402 }
 0x178   : > { %v405_v13 = vmul.f32 0.03125, %v403_v12 }
 0x17a   : > { %v406_v14 = vsub.f32 %v1365_v7, %v405_v13 }
 0x17c   : > { %v407_v15 = vmul.f32 %v406_v14, %v406_v14 }
 0x17e   : > { %v408_v16 = vsel %vm400_vm2, %v407_v15, 0.0 }
 0x17f   : > { %409 = vadd.xlane.f32.xlu0 %v408_v16 }
 0x20c   : > { %v410_v19 = vpop.xlane.xlu0 %409 }
 0x20d   : > { %v411_v20 = vmul.f32 0.03125, %v410_v19 }
 0x20f   : > { %v412_v21 = vadd.f32 1e-05, %v411_v20 }
 0x211   : > { %1237 = vrsqrt.f32 %v412_v21 }
 0x21b   : > { %v1238_v22 = vpop.eup %1237 }
 0x21c   : > { %v414_v24 = vmul.f32 %v1238_v22, %v406_v14 }
 0x21e   : > { %v421_v26 = vmul.f32 %v1090_v23, %v414_v24 }
 0x220   : > { %v428_v27 = vadd.f32 %v1091_v25, %v421_v26 }
 0x222   : > { %v433_v28 = vpack.c.bf16 %v428_v27, %v428_v27 }
 0x224   : > { %1148 = vmatmul.mubr.msk.bf16.vlgmr.msra.gmra.mrb[0].mxu1 %vm354_vm1, %v433_v28 }
 0x225   : > { %1159 = vmatprep.mubr.msk.bf16.mxu1 %vm1264_vm0, %v1263_v1 }
 0x2f7   : > { %v490_v30 = vpop.f32.mrb[0].mxu1 }
 0x2f8   : > { %v491_v31 = vadd.f32 %v1092_v29, %v490_v30  ;;  %v1149_v32 = vpop.f32.mrb[1].mxu1 }
 0x2f9   : > { %v493_v33 = vpop.f32.mrb[2].mxu1 }
 0x2fa   : > { %v1391_v34 = vpack.c.bf16 %v491_v31, %v491_v31  ;;  %v1150_v35 = vpop.f32.mrb[3].mxu1 }
 0x2fc   : > { %610 = vrot.lane.b32.xlu0 %v1391_v34, %s1265_s12  ;;  %498 = vrot.lane.b32.xlu1 %v1391_v34, %s1266_s13 }
 0x300   : > { %612 = vrot.lane.b32.xlu1 %v1391_v34, %s1267_s14 }
 0x304   : > { %722 = vrot.lane.b32.xlu1 %v1391_v34, %s1268_s16 }
 0x308   : > { %720 = vrot.lane.b32.xlu1 %v1391_v34, %s1269_s17  ;;  %s327_s17 = scalar_lea.vmem %s1481_s9, %s1084_s15 }
 0x30c   : > { %832 = vrot.lane.b32.xlu1 %v1391_v34, %s1270_s18 }
 0x310   : > { %830 = vrot.lane.b32.xlu1 %v1391_v34, %s1271_s19 }
 0x36e   : > { %v499_v36 = vpop.permute.xlu1 %498  ;;  %v611_v41 = vpop.permute.xlu0 %610 }
 0x36f   : > { %v505_v37 = vsel %vm500_vm3, %v499_v36, 0 }
 0x370   : > { %1152 = vmatpush3.bf16.xpose.msra.mxu0 %v505_v37 }
 0x371   : > { %1163 = vmatprep.subr.bf16.mxu0 %v1263_v1 }
 0x372   : > { %v613_v38 = vpop.permute.xlu1 %612 }
 0x373   : > { %v618_v39 = vsel %vm500_vm3, %v613_v38, 0 }
 0x376   : > { %v723_v40 = vpop.permute.xlu1 %722 }
 0x377   : > { %1154 = vmatmul.mubr.msk.bf16.vlgmr.msra.gmra.mrb[4].mxu0 %vm500_vm3, %v1391_v34  ;;  %v728_v43 = vsel %vm500_vm3, %v723_v40, 0 }
 0x378   : > { %1164 = vmatpush3.bf16.xpose.msra.mxu0 %v618_v39  ;;  %1165 = vmatprep.mubr.msk.bf16.mxu0 %vm1264_vm0, %v1263_v1 }
 0x379   : > { %1175 = vmatprep.subr.bf16.mxu0 %v1263_v1 }
 0x37a   : > { %v721_v42 = vpop.permute.xlu1 %720 }
 0x37e   : > { %v833_v44 = vpop.permute.xlu1 %832 }
 0x37f   : > { %1166 = vmatmul.mubr.msk.bf16.vlgmr.msra.gmra.mrb[8].mxu0 %vm500_vm3, %v611_v41  ;;  %v838_v45 = vsel %vm500_vm3, %v833_v44, 0 }
 0x380   : > { %1176 = vmatpush3.bf16.xpose.msra.mxu0 %v728_v43  ;;  %1177 = vmatprep.mubr.msk.bf16.mxu0 %vm1264_vm0, %v1263_v1 }
 0x381   : > { %1187 = vmatprep.subr.bf16.mxu0 %v1263_v1 }
 0x382   : > { %v831_v46 = vpop.permute.xlu1 %830 }
 0x387   : > { %1178 = vmatmul.mubr.msk.bf16.vlgmr.msra.gmra.mrb[12].mxu0 %vm500_vm3, %v721_v42 }
 0x388   : > { %1188 = vmatpush3.bf16.xpose.msra.mxu0 %v838_v45  ;;  %1189 = vmatprep.mubr.msk.bf16.mxu0 %vm1264_vm0, %v1263_v1 }
 0x389   : > { %1199 = vmatprep.subr.bf16.mxu0 %v1263_v1 }
 0x38f   : > { %1190 = vmatmul.mubr.msk.bf16.vlgmr.msra.gmra.mrb[16].mxu0 %vm500_vm3, %v831_v46 }
 0x390   : > { %1203 = vmatprep.mubr.msk.bf16.mxu0 %vm1264_vm0, %v1263_v1 }
 0x44a   : > { %v541_v47 = vpop.f32.mrb[4].mxu0 }
 0x44b   : > { %v1155_v48 = vpop.f32.mrb[5].mxu0  ;;  %v548_v49 = vsel %vm547_vm4, %v541_v47, -inf }
 0x44c   : > { %549 = vmax.xlane.f32.xlu1 %v548_v49  ;;  %v544_v50 = vpop.f32.mrb[6].mxu0  ;;  %v1235_v49 = vld [vmem:[%s1479_s7] sm:$0xff]  }
 0x44d   : > { %v1156_v51 = vpop.f32.mrb[7].mxu0  ;;  %1200 = vmatpush3.bf16.msra.mxu0 %v1235_v49 }
 0x44e   : > { %1201 = vmatprep.subr.bf16.mxu0 %v1263_v1  ;;  %v1236_v51 = vld [vmem:[%s1479_s7 + $0x8] sm:$0xff]  }
 0x451   : > { %1202 = vmatpush3.bf16.msra.mxu0 %v1236_v51 }
 0x452   : > { %v654_v52 = vpop.f32.mrb[8].mxu0 }
 0x453   : > { %v1167_v53 = vpop.f32.mrb[9].mxu0  ;;  %v660_v54 = vsel %vm547_vm4, %v654_v52, -inf }
 0x454   : > { %661 = vmax.xlane.f32.xlu0 %v660_v54  ;;  %v657_v55 = vpop.f32.mrb[10].mxu0 }
 0x455   : > { %v1168_v56 = vpop.f32.mrb[11].mxu0 }
 0x45a   : > { %v764_v57 = vpop.f32.mrb[12].mxu0 }
 0x45b   : > { %v1179_v58 = vpop.f32.mrb[13].mxu0  ;;  %v770_v3 = vsel %vm547_vm4, %v764_v57, -inf }
 0x45c   : > { %v767_v59 = vpop.f32.mrb[14].mxu0 }
 0x45d   : > { %558 = vrot.lane.b32.xlu1 %v1391_v34, %s1272_s20  ;;  %v1180_v60 = vpop.f32.mrb[15].mxu0 }
 0x462   : > { %v874_v61 = vpop.f32.mrb[16].mxu0 }
 0x463   : > { %v1191_v62 = vpop.f32.mrb[17].mxu0  ;;  %v880_v63 = vsel %vm547_vm4, %v874_v61, -inf }
 0x464   : > { %881 = vmax.xlane.f32.xlu0 %v880_v63  ;;  %v877_v0 = vpop.f32.mrb[18].mxu0 }
 0x465   : > { %v1192_v2 = vpop.f32.mrb[19].mxu0 }
 0x47a   : > { %670 = vrot.lane.b32.xlu0 %v1391_v34, %s1273_s21 }
 0x481   : > { %771 = vmax.xlane.f32.xlu1 %v770_v3 }
 0x492   : > { %780 = vrot.lane.b32.xlu1 %v1391_v34, %s1274_s22 }
 0x496   : > { %890 = vrot.lane.b32.xlu1 %v1391_v34, %s1275_s23 }
 0x4d9   : > { %v550_v4 = vpop.xlane.xlu1 %549 }
 0x4da   : > { %v551_v5 = vsub.f32 %v541_v47, %v550_v4 }
 0x4dc   : > { %v552_v6 = vmul.f32 1.442695, %v551_v5 }
 0x4dd   : > { %v559_v8 = vpop.permute.xlu1 %558 }
 0x4de   : > { %1239 = vpow2.f32 %v552_v6  ;;  %v566_v9 = vsel %vm564_vm5, %v559_v8, 0 }
 0x4df   : > { %1158 = vmatpush3.bf16.msra.mxu1 %v566_v9 }
 0x4e0   : > { %1169 = vmatprep.subr.bf16.mxu1 %v1263_v1 }
 0x4e1   : > { %v662_v10 = vpop.xlane.xlu0 %661 }
 0x4e2   : > { %v663_v11 = vsub.f32 %v654_v52, %v662_v10 }
 0x4e4   : > { %v664_v12 = vmul.f32 1.442695, %v663_v11  ;;  %v1104_v11 = vld [vmem:[%s1480_s8] ss:$0 sm:$0xff] }
 0x4e6   : > { %1241 = vpow2.f32 %v664_v12 }
 0x4e8   : > { %v1240_v13 = vpop.eup %1239 }
 0x4e9   : > { %v557_v14 = vpack.c.bf16 %v1240_v13, %v1240_v13  ;;  %v554_v25 = vsel %vm547_vm4, %v1240_v13, 0.0 }
 0x4eb   : > { %1160 = vmatmul.mubr.msk.bf16.vlgmr.msra.gmra.mrb[4].mxu1 %vm560_vm6, %v557_v14 }
 0x4ec   : > { %1171 = vmatprep.mubr.msk.bf16.mxu1 %vm1264_vm0, %v1263_v1 }
 0x4f0   : > { %v1242_v15 = vpop.eup %1241 }
 0x4f1   : > { %v882_v16 = vpop.xlane.xlu0 %881  ;;  %v666_v17 = vsel %vm547_vm4, %v1242_v15, 0.0  ;;  %v669_v22 = vpack.c.bf16 %v1242_v15, %v1242_v15 }
 0x4f2   : > { %v883_v18 = vsub.f32 %v874_v61, %v882_v16  ;;  %667 = vadd.xlane.f32.xlu0 %v666_v17 }
 0x4f4   : > { %v884_v19 = vmul.f32 1.442695, %v883_v18 }
 0x4f5   : > { %v671_v20 = vpop.permute.xlu0 %670 }
 0x4f6   : > { %1243 = vpow2.f32 %v884_v19  ;;  %v676_v21 = vsel %vm564_vm5, %v671_v20, 0 }
 0x4f7   : > { %1170 = vmatpush3.bf16.msra.mxu1 %v676_v21 }
 0x4f8   : > { %1181 = vmatprep.subr.bf16.mxu1 %v1263_v1 }
 0x4fa   : > { %1172 = vmatmul.mubr.msk.bf16.vlgmr.msra.gmra.mrb[8].mxu1 %vm560_vm6, %v669_v22 }
 0x4fb   : > { %1183 = vmatprep.mubr.msk.bf16.mxu1 %vm1264_vm0, %v1263_v1 }
 0x500   : > { %v1244_v23 = vpop.eup %1243 }
 0x501   : > { %v886_v24 = vsel %vm547_vm4, %v1244_v23, 0.0  ;;  %v889_v36 = vpack.c.bf16 %v1244_v23, %v1244_v23 }
 0x502   : > { %887 = vadd.xlane.f32.xlu0 %v886_v24 }
 0x506   : > { %555 = vadd.xlane.f32.xlu0 %v554_v25 }
 0x50e   : > { %v772_v26 = vpop.xlane.xlu1 %771 }
 0x50f   : > { %v773_v27 = vsub.f32 %v764_v57, %v772_v26 }
 0x511   : > { %v774_v28 = vmul.f32 1.442695, %v773_v27 }
 0x512   : > { %v781_v29 = vpop.permute.xlu1 %780 }
 0x513   : > { %1245 = vpow2.f32 %v774_v28  ;;  %v786_v30 = vsel %vm564_vm5, %v781_v29, 0 }
 0x514   : > { %1182 = vmatpush3.bf16.msra.mxu1 %v786_v30 }
 0x515   : > { %1193 = vmatprep.subr.bf16.mxu1 %v1263_v1 }
 0x516   : > { %v891_v32 = vpop.permute.xlu1 %890 }
 0x517   : > { %v896_v35 = vsel %vm564_vm5, %v891_v32, 0 }
 0x51d   : > { %v1246_v31 = vpop.eup %1245 }
 0x51e   : > { %v776_v33 = vsel %vm547_vm4, %v1246_v31, 0.0  ;;  %v779_v34 = vpack.c.bf16 %v1246_v31, %v1246_v31 }
 0x51f   : > { %777 = vadd.xlane.f32.xlu1 %v776_v33 }
 0x520   : > { %1184 = vmatmul.mubr.msk.bf16.vlgmr.msra.gmra.mrb[12].mxu1 %vm560_vm6, %v779_v34 }
 0x521   : > { %1194 = vmatpush3.bf16.msra.mxu1 %v896_v35  ;;  %1195 = vmatprep.mubr.msk.bf16.mxu1 %vm1264_vm0, %v1263_v1 }
 0x528   : > { %1196 = vmatmul.mubr.msk.bf16.vlgmr.msra.gmra.mrb[16].mxu1 %vm560_vm6, %v889_v36 }
 0x57f   : > { %v668_v39 = vpop.xlane.xlu0 %667 }
 0x580   : > { %1247 = vrcp.f32 %v668_v39 }
 0x58a   : > { %v1248_v42 = vpop.eup %1247 }
 0x58f   : > { %v888_v50 = vpop.xlane.xlu0 %887 }
 0x593   : > { %v556_v63 = vpop.xlane.xlu0 %555 }
 0x5ac   : > { %v778_v48 = vpop.xlane.xlu1 %777 }
 0x5ad   : > { %1249 = vrcp.f32 %v778_v48 }
 0x5ae   : > { %1251 = vrcp.f32 %v888_v50 }
 0x5af   : > { %1253 = vrcp.f32 %v556_v63 }
 0x5b7   : > { %v1250_v52 = vpop.eup %1249 }
 0x5b8   : > { %v1252_v58 = vpop.eup %1251 }
 0x5b9   : > { %v1254_v0 = vpop.eup %1253 }
 0x5be   : > { %v602_v37 = vpop.f32.mrb[4].mxu1 }
 0x5bf   : > { %v1161_v38 = vpop.f32.mrb[5].mxu1  ;;  %v609_v3 = vmul.f32 %v1254_v0, %v602_v37 }
 0x5c0   : > { %v605_v40 = vpop.f32.mrb[6].mxu1 }
 0x5c1   : > { %v1162_v41 = vpop.f32.mrb[7].mxu1 }
 0x5cd   : > { %v712_v43 = vpop.f32.mrb[8].mxu1 }
 0x5ce   : > { %v719_v44 = vmul.f32 %v1248_v42, %v712_v43  ;;  %v1173_v45 = vpop.f32.mrb[9].mxu1 }
 0x5cf   : > { %v715_v46 = vpop.f32.mrb[10].mxu1 }
 0x5d0   : > { %v1174_v47 = vpop.f32.mrb[11].mxu1  ;;  %941 = vrot.lane.b32.xlu1 %v719_v44, %s1276_s24 }
 0x5f3   : > { %v822_v53 = vpop.f32.mrb[12].mxu1 }
 0x5f4   : > { %v829_v54 = vmul.f32 %v1250_v52, %v822_v53  ;;  %v1185_v55 = vpop.f32.mrb[13].mxu1 }
 0x5f5   : > { %v825_v56 = vpop.f32.mrb[14].mxu1 }
 0x5f6   : > { %945 = vrot.lane.b32.xlu0 %v829_v54, %s1277_s29  ;;  %v1186_v57 = vpop.f32.mrb[15].mxu1 }
 0x5fb   : > { %v932_v59 = vpop.f32.mrb[16].mxu1 }
 0x5fc   : > { %v939_v60 = vmul.f32 %v1252_v58, %v932_v59  ;;  %v1197_v61 = vpop.f32.mrb[17].mxu1 }
 0x5fd   : > { %v935_v1 = vpop.f32.mrb[18].mxu1 }
 0x5fe   : > { %v1198_v62 = vpop.f32.mrb[19].mxu1  ;;  %949 = vrot.lane.b32.xlu1 %v939_v60, %s1278_s11 }
 0x642   : > { %v942_v2 = vpop.permute.xlu1 %941 }
 0x643   : > { %v952_v5 = vsel %vm500_vm3, %v609_v3, %v942_v2 }
 0x668   : > { %v946_v4 = vpop.permute.xlu0 %945 }
 0x669   : > { %v954_v6 = vsel %vm953_vm7, %v952_v5, %v946_v4 }
 0x670   : > { %v950_v8 = vpop.permute.xlu1 %949 }
 0x671   : > { %v956_v9 = vsel %vm955_vm8, %v954_v6, %v950_v8 }
 0x672   : > { %v957_v10 = vpack.c.bf16 %v956_v9, %v956_v9 }
 0x674   : > { %1204 = vmatmul.mubr.msk.bf16.vlgmr.msra.gmra.mrb[20].mxu0 %vm354_vm1, %v957_v10 }
 0x747   : > { %v1018_v12 = vpop.f32.mrb[20].mxu0 }
 0x748   : > { %v1019_v13 = vadd.f32 %v1104_v11, %v1018_v12  ;;  %v1205_v14 = vpop.f32.mrb[21].mxu0 }
 0x749   : > { %v1021_v15 = vpop.f32.mrb[22].mxu0 }
 0x74a   : > { %v1024_v16 = vadd.f32 %v1019_v13, %v1365_v7  ;;  %v1206_v17 = vpop.f32.mrb[23].mxu0 }
 0x74c   : > { %1025 = vst.msk [vmem:[%s327_s17] sm:$0x3] %vm400_vm2, %v1024_v16 }
 0x74d PF: > { %s19_s30 = sadd.s32 1, %s1261_s30  }
 0x74e   : > { %p16_p4 = scmp.ge.s32.totalorder %s19_s30, 4  }
 0x750   :  { %18 = sbr.rel (!%p16_p4) target bundleno = 1 (0x1), region = 86 }

// kernel: cross_frame_attention_block.3
= control target key start
LH: loop header
LB: loop body
LE: loop exit
PB: predicated region body
PF: predicated region fallthrough
CT: control target
= control target key end

     0   :  { %vm90_vm0 = vcmask 1041409   ;;  %vm93_vm1 = vcmask 1042434   ;;  %vm96_vm2 = vcmask 1043459   ;;  %vm99_vm3 = vcmask 1044484   ;;  %s4990_s0 = inlined_call_operand.vmem [shape: f32[8,4,32], index: 0, kind: input, shape index: {}]   ;;  %s4991_s1 = inlined_call_operand.vmem [shape: f32[4,32], index: 1, kind: input, shape index: {}]   ;;  %s4992_s2 = inlined_call_operand.vmem [shape: f32[1,32], index: 2, kind: input, shape index: {}]   ;;  %s4993_s3 = inlined_call_operand.vmem [shape: f32[1,32], index: 3, kind: input, shape index: {}]   ;;  %s4994_s4 = inlined_call_operand.vmem [shape: bf16[32,96], index: 4, kind: input, shape index: {}]   ;;  %s4995_s5 = inlined_call_operand.vmem [shape: f32[1,96], index: 5, kind: input, shape index: {}]   ;;  %s4996_s6 = inlined_call_operand.vmem [shape: bf16[32,32], index: 6, kind: input, shape index: {}]   ;;  %s4997_s7 = inlined_call_operand.vmem [shape: f32[1,32], index: 7, kind: input, shape index: {}]   ;;  %s4998_s8 = inlined_call_operand.vmem [shape: f32[1,32], index: 8, kind: input, shape index: {}]   ;;  %s4999_s9 = inlined_call_operand.vmem [shape: f32[1,32], index: 9, kind: input, shape index: {}]   ;;  %s5000_s10 = inlined_call_operand.vmem [shape: bf16[32,128], index: 10, kind: input, shape index: {}]   ;;  %s5001_s11 = inlined_call_operand.vmem [shape: f32[1,128], index: 11, kind: input, shape index: {}]   ;;  %s5002_s12 = inlined_call_operand.vmem [shape: bf16[128,32], index: 12, kind: input, shape index: {}]   ;;  %s5003_s13 = inlined_call_operand.vmem [shape: f32[1,32], index: 13, kind: input, shape index: {}]   ;;  %s5004_s14 = inlined_call_operand.hbm [shape: f32[8,4,32], index: 14, kind: output, shape index: {}]  }
   0x1   :  { %v49_v0 = vld [vmem:[%s4990_s0] sm:$0x1]  ;;  %v50_v1 = vld [vmem:[%s4990_s0 + $0x4] sm:$0x1]  ;;  %v51_v2 = vld [vmem:[%s4990_s0 + $0x8] sm:$0x1] }
   0x2   :  { %v52_v3 = vld [vmem:[%s4990_s0 + $0xc] sm:$0x1]  ;;  %v53_v4 = vld [vmem:[%s4990_s0 + $0x10] sm:$0x1]  ;;  %v54_v5 = vld [vmem:[%s4990_s0 + $0x14] sm:$0x1] }
   0x3   :  { %v55_v6 = vld [vmem:[%s4990_s0 + $0x18] sm:$0x1]  ;;  %v89_v7 = vrot.slane %v50_v1, 7  ;;  %v56_v8 = vld [vmem:[%s4990_s0 + $0x1c] sm:$0x1]  ;;  %v92_v9 = vrot.slane %v51_v2, 6 }
   0x4   :  { %v95_v10 = vrot.slane %v52_v3, 5  ;;  %v98_v12 = vrot.slane %v53_v4, 4  ;;  %v101_v13 = vrot.slane %v54_v5, 3  ;;  %v66_v14 = vld [vmem:[%s4990_s0 + $0x6] sm:$0x1]  ;;  %vm102_vm4 = vcmask 1045509  }
   0x5   :  { %v91_v11 = vsel %vm90_vm0, %v89_v7, %v49_v0  ;;  %v104_v16 = vrot.slane %v55_v6, 2  ;;  %vm105_vm5 = vcmask 1046534   ;;  %v65_v17 = vld [vmem:[%s4990_s0 + $0x2] sm:$0x1]  ;;  %v67_v18 = vld [vmem:[%s4990_s0 + $0xa] sm:$0x1] }
   0x6   :  { %v94_v15 = vsel %vm93_vm1, %v92_v9, %v91_v11  ;;  %v107_v20 = vrot.slane %v56_v8, 1  ;;  %vm108_vm6 = vcmask 1047559   ;;  %vm188_vm7 = vcmask 261120   ;;  %v68_v21 = vld [vmem:[%s4990_s0 + $0xe] sm:$0x1] }
   0x7   :  { %v97_v19 = vsel %vm96_vm2, %v95_v10, %v94_v15  ;;  %v69_v23 = vld [vmem:[%s4990_s0 + $0x12] sm:$0x1]  ;;  %v70_v24 = vld [vmem:[%s4990_s0 + $0x16] sm:$0x1]  ;;  %v71_v25 = vld [vmem:[%s4990_s0 + $0x1a] sm:$0x1] }
   0x8   :  { %v100_v22 = vsel %vm99_vm3, %v98_v12, %v97_v19  ;;  %v72_v27 = vld [vmem:[%s4990_s0 + $0x1e] sm:$0x1]  ;;  %v142_v28 = vrot.slane %v66_v14, 7  ;;  %v144_v29 = vrot.slane %v67_v18, 6  ;;  %v146_v30 = vrot.slane %v68_v21, 5 }
   0x9   :  { %v103_v26 = vsel %vm102_vm4, %v101_v13, %v100_v22  ;;  %v148_v32 = vrot.slane %v69_v23, 4  ;;  %v150_v33 = vrot.slane %v70_v24, 3  ;;  %v57_v34 = vld [vmem:[%s4990_s0 + $0x1] sm:$0x1]  ;;  %v152_v37 = vrot.slane %v71_v25, 2 }
   0xa   :  { %v106_v31 = vsel %vm105_vm5, %v104_v16, %v103_v26  ;;  %v143_v36 = vsel %vm90_vm0, %v142_v28, %v65_v17  ;;  %v154_v38 = vrot.slane %v72_v27, 1  ;;  %v58_v39 = vld [vmem:[%s4990_s0 + $0x5] sm:$0x1]  ;;  %v59_v40 = vld [vmem:[%s4990_s0 + $0x9] sm:$0x1] }
   0xb   :  { %v4038_v35 = vsel %vm108_vm6, %v107_v20, %v106_v31  ;;  %v145_v42 = vsel %vm93_vm1, %v144_v29, %v143_v36  ;;  %v60_v43 = vld [vmem:[%s4990_s0 + $0xd] sm:$0x1]  ;;  %v61_v44 = vld [vmem:[%s4990_s0 + $0x11] sm:$0x1]  ;;  %v119_v45 = vrot.slane %v58_v39, 7  ;;  %v121_v52 = vrot.slane %v59_v40, 6 }
   0xc   :  { %5018 = vst [vmem:[#allocation5_spill] sm:$0xff] %v4038_v35  ;;  %v189_v41 = vsel %vm188_vm7, %v4038_v35, 0.0  ;;  %v147_v46 = vsel %vm96_vm2, %v146_v30, %v145_v42  ;;  %v62_v47 = vld [vmem:[%s4990_s0 + $0x15] sm:$0x1]  ;;  %v63_v48 = vld [vmem:[%s4990_s0 + $0x19] sm:$0x1] }
   0xd   :  { %190 = vadd.xlane.f32.xlu0 %v189_v41  ;;  %v64_v49 = vld [vmem:[%s4990_s0 + $0x1d] sm:$0x1]  ;;  %v149_v50 = vsel %vm99_vm3, %v148_v32, %v147_v46  ;;  %v120_v51 = vsel %vm90_vm0, %v119_v45, %v57_v34  ;;  %v123_v53 = vrot.slane %v60_v43, 5  ;;  %v73_v54 = vld [vmem:[%s4990_s0 + $0x3] sm:$0x1]  ;;  %v125_v57 = vrot.slane %v61_v44, 4 }
   0xe   :  { %v74_v55 = vld [vmem:[%s4990_s0 + $0x7] sm:$0x1]  ;;  %v151_v56 = vsel %vm102_vm4, %v150_v33, %v149_v50  ;;  %v127_v58 = vrot.slane %v62_v47, 3  ;;  %v129_v59 = vrot.slane %v63_v48, 2  ;;  %v75_v60 = vld [vmem:[%s4990_s0 + $0xb] sm:$0x1]  ;;  %v122_v62 = vsel %vm93_vm1, %v121_v52, %v120_v51 }
   0xf   :  { %v153_v61 = vsel %vm105_vm5, %v152_v37, %v151_v56  ;;  %v131_v63 = vrot.slane %v64_v49, 1  ;;  %v76_v0 = vld [vmem:[%s4990_s0 + $0xf] sm:$0x1]  ;;  %v77_v1 = vld [vmem:[%s4990_s0 + $0x13] sm:$0x1]  ;;  %v165_v2 = vrot.slane %v74_v55, 7  ;;  %v124_v4 = vsel %vm96_vm2, %v123_v53, %v122_v62 }
  0x10   :  { %v4087_v3 = vsel %vm108_vm6, %v154_v38, %v153_v61  ;;  %v78_v5 = vld [vmem:[%s4990_s0 + $0x17] sm:$0x1]  ;;  %v79_v6 = vld [vmem:[%s4990_s0 + $0x1b] sm:$0x1]  ;;  %v80_v7 = vld [vmem:[%s4990_s0 + $0x1f] sm:$0x1]  ;;  %v126_v9 = vsel %vm99_vm3, %v125_v57, %v124_v4 }
  0x11   :  { %5019 = vst [vmem:[#allocation6_spill] sm:$0xff] %v4087_v3  ;;  %v195_v8 = vsel %vm188_vm7, %v4087_v3, 0.0  ;;  %v166_v10 = vsel %vm90_vm0, %v165_v2, %v73_v54  ;;  %v167_v11 = vrot.slane %v75_v60, 6  ;;  %v128_v12 = vsel %vm102_vm4, %v127_v58, %v126_v9 }
  0x12   :  { %196 = vadd.xlane.f32.xlu1 %v195_v8  ;;  %v169_v13 = vrot.slane %v76_v0, 5  ;;  %v171_v14 = vrot.slane %v77_v1, 4  ;;  %v173_v15 = vrot.slane %v78_v5, 3  ;;  %v130_v16 = vsel %vm105_vm5, %v129_v59, %v128_v12 }
  0x13   :  { %v168_v17 = vsel %vm93_vm1, %v167_v11, %v166_v10  ;;  %v175_v18 = vrot.slane %v79_v6, 2  ;;  %v177_v19 = vrot.slane %v80_v7, 1  ;;  %v4107_v20 = vsel %vm108_vm6, %v131_v63, %v130_v16 }
  0x14   :  { %5020 = vst [vmem:[#allocation7_spill] sm:$0xff] %v4107_v20  ;;  %v170_v21 = vsel %vm96_vm2, %v169_v13, %v168_v17  ;;  %v192_v22 = vsel %vm188_vm7, %v4107_v20, 0.0 }
  0x15   :  { %v172_v23 = vsel %vm99_vm3, %v171_v14, %v170_v21  ;;  %193 = vadd.xlane.f32.xlu0 %v192_v22 }
  0x16   :  { %v174_v24 = vsel %vm102_vm4, %v173_v15, %v172_v23 }
  0x17   :  { %v176_v25 = vsel %vm105_vm5, %v175_v18, %v174_v24 }
  0x18   :  { %v4116_v26 = vsel %vm108_vm6, %v177_v19, %v176_v25 }
  0x19   :  { %5021 = vst [vmem:[#allocation8_spill] sm:$0xff] %v4116_v26  ;;  %v198_v27 = vsel %vm188_vm7, %v4116_v26, 0.0 }
  0x1a   :  { %199 = vadd.xlane.f32.xlu1 %v198_v27 }
  0x1b   :  { %19 = vsyncpa [#allocation3], 0  ;;  %v180_v40 = vld [vmem:[%s4991_s1] sm:$0xf]  ;;  %vm262_vm8 = vcmask 257024   ;;  %v3718_v52 = vld [vmem:[%s4994_s4 + $0x8] sm:$0xff]  }
  0x1c   :  { %v263_v46 = vsel %vm262_vm8, %v180_v40, 0.0  ;;  %v3717_v51 = vld [vmem:[%s4994_s4] sm:$0xff]   ;;  %s3885_s17 = smov 96   ;;  %vm3887_vm9 = vmmov 0   ;;  %vm452_vm10 = vcmask 64512   ;;  %vm792_vm11 = vcmask 1043456  }
  0x1d   :  { %3423 = vmatprep.subr.bf16.mxu1 %v3717_v51  ;;  %v3259_v10 = vld [vmem:[%s4992_s2] ss:$0 sm:$0xff]  ;;  %s3891_s21 = smov 88   ;;  %s3892_s22 = smov 120   ;;  %vm2568_vm12 = vcmask 130048   ;;  %vm2573_vm13 = vcmask 195584  }
  0x1e   :  { %3424 = vmatpush3.bf16.msra.mxu1 %v3717_v51  ;;  %v3260_v15 = vld [vmem:[%s4993_s3] ss:$0 sm:$0xff]  ;;  %s3893_s23 = smov 56   ;;  %s3894_s24 = smov 80   ;;  %vm3036_vm14 = vcmask 253952  }
  0x1f   :  { %3425 = vmatprep.subr.bf16.mxu1 %v3718_v52  ;;  %s3895_s25 = smov 112   ;;  %s3896_s26 = smov 48  }
  0x20   :  { %s3897_s27 = smov 72   ;;  %s3898_s28 = smov 104  }
  0x21   :  { %s3899_s0 = smov 40   ;;  %s3900_s29 = smov 8  }
  0x22   :  { %3426 = vmatpush3.bf16.msra.mxu1 %v3718_v52  ;;  %s3901_s1 = smov 16   ;;  %s3902_s4 = smov 24  }
  0x9a   :  { %v191_v28 = vpop.xlane.xlu0 %190 }
  0x9b   :  { %v202_v29 = vmul.f32 0.03125, %v191_v28 }
  0x9d   :  { %v206_v30 = vsub.f32 %v4038_v35, %v202_v29 }
  0x9f   :  { %v210_v31 = vmul.f32 %v206_v30, %v206_v30  ;;  %v197_v32 = vpop.xlane.xlu1 %196 }
  0xa0   :  { %v204_v33 = vmul.f32 0.03125, %v197_v32 }
  0xa1   :  { %v214_v34 = vsel %vm188_vm7, %v210_v31, 0.0 }
  0xa2   :  { %215 = vadd.xlane.f32.xlu0 %v214_v34  ;;  %v208_v36 = vsub.f32 %v4087_v3, %v204_v33  ;;  %v194_v37 = vpop.xlane.xlu0 %193 }
  0xa3   :  { %v203_v38 = vmul.f32 0.03125, %v194_v37 }
  0xa4   :  { %v212_v39 = vmul.f32 %v208_v36, %v208_v36 }
  0xa5   :  { %v207_v41 = vsub.f32 %v4107_v20, %v203_v38 }
  0xa6   :  { %v220_v42 = vsel %vm188_vm7, %v212_v39, 0.0 }
  0xa7   :  { %v200_v43 = vpop.xlane.xlu1 %199  ;;  %221 = vadd.xlane.f32.xlu0 %v220_v42  ;;  %v211_v45 = vmul.f32 %v207_v41, %v207_v41 }
  0xa8   :  { %v205_v44 = vmul.f32 0.03125, %v200_v43 }
  0xa9   :  { %v217_v48 = vsel %vm188_vm7, %v211_v45, 0.0 }
  0xaa   :  { %v209_v47 = vsub.f32 %v4116_v26, %v205_v44  ;;  %218 = vadd.xlane.f32.xlu1 %v217_v48 }
  0xab   :  { %264 = vadd.xlane.f32.xlu0 %v263_v46 }
  0xac   :  { %v213_v49 = vmul.f32 %v209_v47, %v209_v47 }
  0xae   :  { %v223_v50 = vsel %vm188_vm7, %v213_v49, 0.0 }
  0xaf   :  { %224 = vadd.xlane.f32.xlu1 %v223_v50 }
  0xc1   :  { %356 = vrot.lane.b32.xlu0 %v3717_v51, %s3885_s17 }
 0x12f   :  { %v216_v53 = vpop.xlane.xlu0 %215 }
 0x130   :  { %v226_v54 = vmul.f32 0.03125, %v216_v53 }
 0x132   :  { %v230_v55 = vadd.f32 1e-05, %v226_v54 }
 0x134   :  { %v222_v56 = vpop.xlane.xlu0 %221  ;;  %3731 = vrsqrt.f32 %v230_v55 }
 0x135   :  { %v228_v57 = vmul.f32 0.03125, %v222_v56 }
 0x137   :  { %v232_v58 = vadd.f32 1e-05, %v228_v57  ;;  %v219_v59 = vpop.xlane.xlu1 %218 }
 0x138   :  { %v265_v60 = vpop.xlane.xlu0 %264  ;;  %v227_v61 = vmul.f32 0.03125, %v219_v59 }
 0x139   :  { %v266_v62 = vmul.f32 0.03125, %v265_v60  ;;  %3733 = vrsqrt.f32 %v232_v58 }
 0x13a   :  { %v231_v63 = vadd.f32 1e-05, %v227_v61 }
 0x13b   :  { %v267_v0 = vsub.f32 %v180_v40, %v266_v62 }
 0x13c   :  { %v225_v1 = vpop.xlane.xlu1 %224  ;;  %3735 = vrsqrt.f32 %v231_v63  ;;  %v357_v29 = vpop.permute.xlu0 %356 }
 0x13d   :  { %v229_v2 = vmul.f32 0.03125, %v225_v1  ;;  %v268_v4 = vmul.f32 %v267_v0, %v267_v0 }
 0x13e   :  { %v3732_v7 = vpop.eup %3731 }
 0x13f   :  { %v233_v5 = vadd.f32 1e-05, %v229_v2  ;;  %v269_v6 = vsel %vm262_vm8, %v268_v4, 0.0  ;;  %v238_v8 = vmul.f32 %v3732_v7, %v206_v30  ;;  %v5005_v30 = vmov 0.0  }
 0x140   :  { %270 = vadd.xlane.f32.xlu1 %v269_v6  ;;  %3431 = vmatprep.subr.bf16.mxu1 %v5005_v30  ;;  %v427_v2 = vlaneseq  ;;  %v3890_v7 = vmov 286326784  }
 0x141   :  { %3737 = vrsqrt.f32 %v233_v5  ;;  %v248_v13 = vmul.f32 %v3259_v10, %v238_v8  ;;  %3451 = vmatprep.subr.bf16.mxu0 %v5005_v30  ;;  %3453 = vmatprep.mubr.msk.bf16.mxu0 %vm3887_vm9, %v5005_v30  ;;  %v648_v8 = vunpack.c.l.s4 %v3890_v7 }
 0x142   :  { %v428_v5 = vshrl.u32 %v427_v2, 7 }
 0x143   :  { %v3734_v9 = vpop.eup %3733  ;;  %v258_v18 = vadd.f32 %v3260_v15, %v248_v13 }
 0x144   :  { %v240_v14 = vmul.f32 %v3734_v9, %v208_v36 }
 0x146   :  { %v3736_v11 = vpop.eup %3735  ;;  %v250_v22 = vmul.f32 %v3259_v10, %v240_v14  ;;  %v649_v14 = vunpack.c.0.s8 %v648_v8 }
 0x147   :  { %v239_v12 = vmul.f32 %v3736_v11, %v207_v41  ;;  %v3261_v41 = vld [vmem:[%s4995_s5] ss:$0 sm:$0xff]  ;;  %s3888_s5 = smov 64  }
 0x148   :  { %v260_v25 = vadd.f32 %v3260_v15, %v250_v22 }
 0x149   :  { %v249_v16 = vmul.f32 %v3259_v10, %v239_v12 }
 0x14b   :  { %v3738_v17 = vpop.eup %3737  ;;  %v259_v19 = vadd.f32 %v3260_v15, %v249_v16 }
 0x14c   :  { %v241_v21 = vmul.f32 %v3738_v17, %v209_v47 }
 0x14d   :  { %v278_v23 = vpack.c.bf16 %v259_v19, %v258_v18  ;;  %v652_v18 = vsub.s32 %v649_v14, %v428_v5 }
 0x14e   :  { %v251_v24 = vmul.f32 %v3259_v10, %v241_v21 }
 0x14f   :  { %3427 = vmatprep.mubr.msk.bf16.mxu1 %vm188_vm7, %v278_v23 }
 0x150   :  { %v261_v27 = vadd.f32 %v3260_v15, %v251_v24 }
 0x151   :  { %358 = vrot.lane.b32.xlu1 %v3718_v52, %s3885_s17 }
 0x152   :  { %v279_v28 = vpack.c.bf16 %v261_v27, %v260_v25  ;;  %v689_v25 = vsub.s32 0, %v428_v5 }
 0x154   :  { %3428 = vmatmul.mubr.msk.bf16.vlgmr.msra.gmra.mrb[0].mxu1 %vm188_vm7, %v279_v28 }
 0x155   :  { %3435 = vmatprep.mubr.msk.bf16.mxu1 %vm3887_vm9, %v5005_v30  ;;  %3432 = vmatpush3.bf16.msra.mxu1 %v357_v29 }
 0x156   :  { %3433 = vmatprep.subr.bf16.mxu1 %v5005_v30 }
 0x1cd   :  { %v271_v31 = vpop.xlane.xlu1 %270 }
 0x1ce   :  { %v272_v32 = vmul.f32 0.03125, %v271_v31 }
 0x1d0   :  { %v273_v33 = vadd.f32 1e-05, %v272_v32 }
 0x1d1   :  { %v359_v34 = vpop.permute.xlu1 %358 }
 0x1d2   :  { %3739 = vrsqrt.f32 %v273_v33  ;;  %3434 = vmatpush3.bf16.msra.mxu1 %v359_v34 }
 0x1d3   :  { %3439 = vmatprep.subr.bf16.mxu1 %v5005_v30 }
 0x1dc   :  { %v3740_v36 = vpop.eup %3739 }
 0x1dd   :  { %v275_v37 = vmul.f32 %v3740_v36, %v267_v0  ;;  %v3889_v0 = vmov 1966171168  }
 0x1de   :  { %v425_v1 = vunpack.c.l.s4 %v3889_v0 }
 0x1df   :  { %v276_v38 = vmul.f32 %v3259_v10, %v275_v37 }
 0x1e0   :  { %v426_v4 = vunpack.c.0.s8 %v425_v1 }
 0x1e1   :  { %v277_v39 = vadd.f32 %v3260_v15, %v276_v38 }
 0x1e2   :  { %v4206_v10 = vsub.s32 %v426_v4, %v428_v5 }
 0x1e3   :  { %v355_v40 = vpack.c.bf16 %v277_v39, %v277_v39 }
 0x1e4   :  { %5022 = vst [vmem:[#allocation9_spill] sm:$0xff] %v4206_v10 }
 0x1e5   :  { %3436 = vmatmul.mubr.msk.bf16.vlgmr.msra.gmra.mrb[4].mxu1 %vm188_vm7, %v355_v40 }
 0x1e6   :  { %3441 = vmatprep.mubr.msk.bf16.mxu1 %vm3887_vm9, %v5005_v30 }
 0x227   :  { %v3429_v42 = vpop.f32.mrb[0].mxu1 }
 0x228   :  { %v347_v43 = vadd.f32 %v3429_v42, %v3261_v41  ;;  %v338_v44 = vpop.f32.mrb[1].mxu1 }
 0x229   :  { %v339_v45 = vadd.f32 %v3261_v41, %v338_v44  ;;  %v3430_v46 = vpop.f32.mrb[2].mxu1 }
 0x22a   :  { %v4163_v47 = vpack.c.bf16 %v347_v43, %v347_v43  ;;  %v341_v48 = vpop.f32.mrb[3].mxu1  ;;  %v350_v51 = vadd.f32 %v3430_v46, %v3261_v41 }
 0x22b   :  { %v4165_v49 = vpack.c.bf16 %v339_v45, %v339_v45  ;;  %v342_v50 = vadd.f32 %v3261_v41, %v341_v48 }
 0x22c   :  { %547 = vrot.lane.b32.xlu0 %v4163_v47, %s3885_s17  ;;  %v4176_v53 = vpack.c.bf16 %v350_v51, %v350_v51  ;;  %v685_v43 = vunpack.c.l.bf16 %v4163_v47 }
 0x22d   :  { %450 = vrot.lane.b32.xlu1 %v4165_v49, %s3885_s17  ;;  %v4171_v52 = vpack.c.bf16 %v342_v50, %v342_v50  ;;  %v683_v37 = vunpack.c.l.bf16 %v4165_v49 }
 0x22e   :  { %v686_v50 = vunpack.c.l.bf16 %v4176_v53 }
 0x22f   :  { %v684_v42 = vunpack.c.l.bf16 %v4171_v52 }
 0x230   :  { %362 = vrot.lane.b32.xlu0 %v3261_v41, %s3885_s17 }
 0x231   :  { %499 = vrot.lane.b32.xlu1 %v4171_v52, %s3885_s17 }
 0x235   :  { %595 = vrot.lane.b32.xlu1 %v4176_v53, %s3885_s17 }
 0x239   :  { %783 = vrot.lane.b32.xlu1 %v4165_v49, %s3888_s5 }
 0x29e   :  { %v548_v54 = vpop.permute.xlu0 %547 }
 0x29f   :  { %v451_v55 = vpop.permute.xlu1 %450  ;;  %v553_v56 = vsel %vm452_vm10, %v548_v54, 0 }
 0x2a0   :  { %v457_v57 = vsel %vm452_vm10, %v451_v55, 0  ;;  %3452 = vmatpush3.bf16.xpose.msra.mxu0 %v553_v56 }
 0x2a1   :  { %3440 = vmatpush3.bf16.xpose.msra.mxu1 %v457_v57  ;;  %3463 = vmatprep.subr.bf16.mxu0 %v5005_v30 }
 0x2a2   :  { %3445 = vmatprep.subr.bf16.mxu1 %v5005_v30  ;;  %v363_v6 = vpop.permute.xlu0 %362 }
 0x2a3   :  { %v500_v58 = vpop.permute.xlu1 %499 }
 0x2a4   :  { %v505_v60 = vsel %vm452_vm10, %v500_v58, 0 }
 0x2a7   :  { %v596_v59 = vpop.permute.xlu1 %595  ;;  %3454 = vmatmul.mubr.msk.bf16.vlgmr.msra.gmra.mrb[0].mxu0 %vm452_vm10, %v4163_v47 }
 0x2a8   :  { %3442 = vmatmul.mubr.msk.bf16.vlgmr.msra.gmra.mrb[8].mxu1 %vm452_vm10, %v4165_v49  ;;  %3465 = vmatprep.mubr.msk.bf16.mxu0 %vm3887_vm9, %v5005_v30  ;;  %v601_v63 = vsel %vm452_vm10, %v596_v59, 0 }
 0x2a9   :  { %3446 = vmatpush3.bf16.xpose.msra.mxu1 %v505_v60  ;;  %3447 = vmatprep.mubr.msk.bf16.mxu1 %vm3887_vm9, %v5005_v30 }
 0x2aa   :  { %3457 = vmatprep.subr.bf16.mxu1 %v5005_v30 }
 0x2ab   :  { %v784_v61 = vpop.permute.xlu1 %783 }
 0x2ac   :  { %v794_v62 = vsel %vm792_vm11, %v784_v61, 0 }
 0x2ad   :  { %3464 = vmatpush3.bf16.msra.mxu0 %v794_v62 }
 0x2ae   :  { %3475 = vmatprep.subr.bf16.mxu0 %v5005_v30 }
 0x2b0   :  { %3448 = vmatmul.mubr.msk.bf16.vlgmr.msra.gmra.mrb[12].mxu1 %vm452_vm10, %v4171_v52 }
 0x2b1   :  { %3458 = vmatpush3.bf16.xpose.msra.mxu1 %v601_v63  ;;  %3459 = vmatprep.mubr.msk.bf16.mxu1 %vm3887_vm9, %v5005_v30 }
 0x2b2   :  { %3469 = vmatprep.subr.bf16.mxu1 %v5005_v30 }
 0x2b8   :  { %3460 = vmatmul.mubr.msk.bf16.vlgmr.msra.gmra.mrb[16].mxu1 %vm452_vm10, %v4176_v53  ;;  %v402_v9 = vpop.f32.mrb[4].mxu1 }
 0x2b9   :  { %v403_v11 = vadd.f32 %v402_v9, %v363_v6  ;;  %v3437_v12 = vpop.f32.mrb[5].mxu1  ;;  %3471 = vmatprep.mubr.msk.bf16.mxu1 %vm3887_vm9, %v5005_v30 }
 0x2ba   :  { %v405_v13 = vpop.f32.mrb[6].mxu1 }
 0x2bb   :  { %v408_v15 = vpack.c.bf16 %v403_v11, %v403_v11  ;;  %v3438_v16 = vpop.f32.mrb[7].mxu1 }
 0x2bd   :  { %v430_v17 = vrot.slane %v408_v15, %v4206_v10 }
 0x2bf   :  { %v431_v19 = vcombine.high %v430_v17, %v430_v17  ;;  %v438_v21 = vrot.slane %v430_v17, %v4206_v10 }
 0x2c1   :  { %v445_v22 = vrot.slane %v431_v19, %v4206_v10  ;;  %v447_v23 = vunpack.i.h.s16 %v438_v21  ;;  %v3275_v24 = vpack.i.b16 %v438_v21, %v438_v21 }
 0x2c3   :  { %v449_v27 = vunpack.i.h.s16 %v445_v22  ;;  %v644_v28 = vpack.i.b16 %v447_v23, %v447_v23  ;;  %v3276_v29 = vpack.i.b16 %v445_v22, %v445_v22  ;;  %v653_v31 = vrot.slane %v3275_v24, %v652_v18 }
 0x2c5   :  { %v646_v32 = vpack.i.b16 %v449_v27, %v449_v27  ;;  %v660_v33 = vrot.slane %v644_v28, %v652_v18  ;;  %v667_v34 = vrot.slane %v3276_v29, %v652_v18  ;;  %v679_v36 = vunpack.c.l.bf16 %v653_v31 }
 0x2c7   :  { %v674_v38 = vrot.slane %v646_v32, %v652_v18  ;;  %v680_v39 = vunpack.c.l.bf16 %v660_v33  ;;  %v681_v40 = vunpack.c.l.bf16 %v667_v34  ;;  %v4214_v41 = vrot.slane %v679_v36, %v689_v25 }
 0x2c9   :  { %v682_v44 = vunpack.c.l.bf16 %v674_v38  ;;  %v4218_v45 = vrot.slane %v680_v39, %v689_v25  ;;  %v4220_v46 = vrot.slane %v681_v40, %v689_v25  ;;  %v4223_v48 = vmul.f32 %v4214_v41, %v683_v37 }
 0x2cb   :  { %v4226_v51 = vrot.slane %v682_v44, %v689_v25  ;;  %v707_v54 = vsel %vm452_vm10, %v4223_v48, 0.0  ;;  %v4231_v55 = vmul.f32 %v4218_v45, %v684_v42  ;;  %v4234_v56 = vmul.f32 %v4220_v46, %v685_v43 }
 0x2cc   :  { %708 = vadd.xlane.f32.xlu1 %v707_v54 }
 0x2cd   :  { %v710_v57 = vsel %vm452_vm10, %v4231_v55, 0.0  ;;  %v4239_v58 = vmul.f32 %v4226_v51, %v686_v50  ;;  %v713_v59 = vsel %vm452_vm10, %v4234_v56, 0.0 }
 0x2ce   :  { %711 = vadd.xlane.f32.xlu0 %v710_v57 }
 0x2cf   :  { %v716_v60 = vsel %vm452_vm10, %v4239_v58, 0.0 }
 0x2d0   :  { %714 = vadd.xlane.f32.xlu1 %v713_v59 }
 0x2d2   :  { %717 = vadd.xlane.f32.xlu0 %v716_v60 }
 0x359   :  { %v4271_v19 = vpop.xlane.xlu1 %708 }
 0x35b   :  { %v4273_v21 = vpop.xlane.xlu0 %711 }
 0x35c   :  { %5023 = vst [vmem:[#allocation10_spill] sm:$0xff] %v4273_v21 }
 0x35d   :  { %v4275_v22 = vpop.xlane.xlu1 %714 }
 0x35f   :  { %v4277_v23 = vpop.xlane.xlu0 %717 }
 0x360   :  { %5024 = vst [vmem:[#allocation11_spill] sm:$0xff] %v4277_v23 }
 0x37a   :  { %v589_v61 = vpop.f32.mrb[0].mxu0 }
 0x37b   :  { %v493_v62 = vpop.f32.mrb[8].mxu1  ;;  %v3455_v63 = vpop.f32.mrb[1].mxu0  ;;  %v725_v0 = vsel %vm452_vm10, %v589_v61, -inf }
 0x37c   :  { %v3443_v1 = vpop.f32.mrb[9].mxu1  ;;  %v592_v2 = vpop.f32.mrb[2].mxu0  ;;  %726 = vmax.xlane.f32.xlu1 %v725_v0  ;;  %v719_v4 = vsel %vm452_vm10, %v493_v62, -inf }
 0x37d   :  { %v496_v5 = vpop.f32.mrb[10].mxu1  ;;  %v3456_v6 = vpop.f32.mrb[3].mxu0  ;;  %720 = vmax.xlane.f32.xlu0 %v719_v4 }
 0x37e   :  { %v3444_v7 = vpop.f32.mrb[11].mxu1 }
 0x383   :  { %v541_v8 = vpop.f32.mrb[12].mxu1 }
 0x384   :  { %v3449_v9 = vpop.f32.mrb[13].mxu1  ;;  %v722_v11 = vsel %vm452_vm10, %v541_v8, -inf }
 0x385   :  { %v544_v12 = vpop.f32.mrb[14].mxu1  ;;  %723 = vmax.xlane.f32.xlu0 %v722_v11 }
 0x386   :  { %v3450_v13 = vpop.f32.mrb[15].mxu1 }
 0x38b   :  { %v637_v14 = vpop.f32.mrb[16].mxu1 }
 0x38c   :  { %v3461_v15 = vpop.f32.mrb[17].mxu1  ;;  %v728_v16 = vsel %vm452_vm10, %v637_v14, -inf }
 0x38d   :  { %v640_v17 = vpop.f32.mrb[18].mxu1  ;;  %888 = vrot.lane.b32.xlu1 %v4163_v47, %s3888_s5  ;;  %729 = vmax.xlane.f32.xlu0 %v728_v16 }
 0x38e   :  { %v3462_v18 = vpop.f32.mrb[19].mxu1 }
 0x391   :  { %940 = vrot.lane.b32.xlu1 %v4176_v53, %s3888_s5 }
 0x395   :  { %1002 = vrot.lane.b32.xlu1 %v4165_v49, %s3891_s21 }
 0x399   :  { %1000 = vrot.lane.b32.xlu1 %v4165_v49, %s3892_s22 }
 0x39d   :  { %1102 = vrot.lane.b32.xlu1 %v4163_v47, %s3891_s21 }
 0x3a1   :  { %1100 = vrot.lane.b32.xlu1 %v4163_v47, %s3892_s22 }
 0x3a3   :  { %836 = vrot.lane.b32.xlu0 %v4171_v52, %s3888_s5 }
 0x3a5   :  { %1204 = vrot.lane.b32.xlu1 %v4223_v48, %s3892_s22 }
 0x3a7   :  { %1052 = vrot.lane.b32.xlu0 %v4171_v52, %s3891_s21 }
 0x3a9   :  { %1208 = vrot.lane.b32.xlu1 %v4234_v56, %s3892_s22 }
 0x3ab   :  { %1050 = vrot.lane.b32.xlu0 %v4171_v52, %s3892_s22 }
 0x3af   :  { %1152 = vrot.lane.b32.xlu0 %v4176_v53, %s3891_s21 }
 0x3b3   :  { %1150 = vrot.lane.b32.xlu0 %v4176_v53, %s3892_s22 }
 0x3b7   :  { %1206 = vrot.lane.b32.xlu0 %v4231_v55, %s3892_s22 }
 0x3bb   :  { %1210 = vrot.lane.b32.xlu0 %v4239_v58, %s3892_s22 }
 0x409   :  { %v727_v24 = vpop.xlane.xlu1 %726 }
 0x40a   :  { %v721_v25 = vpop.xlane.xlu0 %720  ;;  %v4283_v28 = vmax.f32 %v727_v24, %v4275_v22 }
 0x40b   :  { %v4280_v27 = vmax.f32 %v721_v25, %v4271_v19 }
 0x40c   :  { %v737_v33 = vsub.f32 %v589_v61, %v4283_v28 }
 0x40d   :  { %v735_v29 = vsub.f32 %v493_v62, %v4280_v27  ;;  %v889_v31 = vpop.permute.xlu1 %888 }
 0x40e   :  { %v743_v38 = vmul.f32 1.442695, %v737_v33  ;;  %v898_v62 = vsel %vm792_vm11, %v889_v31, 0 }
 0x40f   :  { %v739_v32 = vmul.f32 1.442695, %v735_v29 }
 0x411   :  { %v941_v34 = vpop.permute.xlu1 %940  ;;  %3741 = vpow2.f32 %v739_v32 }
 0x412   :  { %v724_v36 = vpop.xlane.xlu0 %723  ;;  %3743 = vpow2.f32 %v743_v38  ;;  %v950_v9 = vsel %vm792_vm11, %v941_v34, 0 }
 0x413   :  { %v4288_v37 = vmax.f32 %v724_v36, %v4273_v21 }
 0x415   :  { %5025 = vst [vmem:[#allocation12_spill] sm:$0xff] %v4288_v37  ;;  %v736_v39 = vsub.f32 %v541_v8, %v4288_v37  ;;  %v1003_v40 = vpop.permute.xlu1 %1002 }
 0x416   :  { %v1008_v13 = vsel %vm452_vm10, %v1003_v40, 0 }
 0x417   :  { %v741_v42 = vmul.f32 1.442695, %v736_v39 }
 0x419   :  { %3745 = vpow2.f32 %v741_v42  ;;  %v1001_v43 = vpop.permute.xlu1 %1000 }
 0x41a   :  { %v730_v44 = vpop.xlane.xlu0 %729 }
 0x41b   :  { %v4292_v50 = vmax.f32 %v730_v44, %v4277_v23  ;;  %v4294_v54 = vpop.eup %3741 }
 0x41c   :  { %v775_v60 = vpack.c.bf16 %v4294_v54, %v4294_v54  ;;  %v4305_v2 = vpop.eup %3743 }
 0x41d   :  { %5026 = vst [vmem:[#allocation13_spill] sm:$0xff] %v4292_v50  ;;  %v738_v57 = vsub.f32 %v637_v14, %v4292_v50  ;;  %v1103_v59 = vpop.permute.xlu1 %1102  ;;  %v777_v8 = vpack.c.bf16 %v4305_v2, %v4305_v2 }
 0x41e   :  { %v837_v61 = vpop.permute.xlu0 %836  ;;  %3466 = vmatmul.mubr.msk.bf16.vlgmr.msra.gmra.mrb[4].mxu0 %vm452_vm10, %v775_v60  ;;  %v1108_v29 = vsel %vm452_vm10, %v1103_v59, 0 }
 0x41f   :  { %v745_v63 = vmul.f32 1.442695, %v738_v57  ;;  %v846_v0 = vsel %vm792_vm11, %v837_v61, 0  ;;  %3476 = vmatpush3.bf16.msra.mxu0 %v898_v62  ;;  %3477 = vmatprep.mubr.msk.bf16.mxu0 %vm3887_vm9, %v5005_v30 }
 0x420   :  { %3470 = vmatpush3.bf16.msra.mxu1 %v846_v0  ;;  %3487 = vmatprep.subr.bf16.mxu0 %v5005_v30 }
 0x421   :  { %3747 = vpow2.f32 %v745_v63  ;;  %v1101_v1 = vpop.permute.xlu1 %1100  ;;  %3481 = vmatprep.subr.bf16.mxu1 %v5005_v30 }
 0x422   :  { %v1053_v4 = vpop.permute.xlu0 %1052 }
 0x423   :  { %v4308_v5 = vpop.eup %3745  ;;  %v1058_v25 = vsel %vm452_vm10, %v1053_v4, 0 }
 0x424   :  { %v776_v6 = vpack.c.bf16 %v4308_v5, %v4308_v5 }
 0x425   :  { %v1205_v7 = vpop.permute.xlu1 %1204 }
 0x426   :  { %3472 = vmatmul.mubr.msk.bf16.vlgmr.msra.gmra.mrb[20].mxu1 %vm452_vm10, %v776_v6  ;;  %v1051_v11 = vpop.permute.xlu0 %1050  ;;  %v1216_v12 = vsel %vm452_vm10, %v1205_v7, 0.0  ;;  %3478 = vmatmul.mubr.msk.bf16.vlgmr.msra.gmra.mrb[8].mxu0 %vm452_vm10, %v777_v8 }
 0x427   :  { %3482 = vmatpush3.bf16.msra.mxu1 %v950_v9  ;;  %1217 = vadd.xlane.f32.xlu1 %v1216_v12 }
 0x428   :  { %3483 = vmatprep.mubr.msk.bf16.mxu1 %vm3887_vm9, %v5005_v30  ;;  %3488 = vmatpush3.bf16.xpose.msra.mxu0 %v1008_v13 }
 0x429   :  { %v1209_v14 = vpop.permute.xlu1 %1208  ;;  %3489 = vmatprep.mubr.msk.bf16.mxu0 %vm3887_vm9, %v5005_v30  ;;  %3493 = vmatprep.subr.bf16.mxu1 %v5005_v30 }
 0x42a   :  { %v1153_v15 = vpop.permute.xlu0 %1152  ;;  %v1222_v16 = vsel %vm452_vm10, %v1209_v14, 0.0  ;;  %3499 = vmatprep.subr.bf16.mxu0 %v5005_v30 }
 0x42b   :  { %v4326_v17 = vpop.eup %3747  ;;  %1223 = vadd.xlane.f32.xlu1 %v1222_v16  ;;  %v1158_v34 = vsel %vm452_vm10, %v1153_v15, 0 }
 0x42c   :  { %5027 = vst [vmem:[#allocation14_spill] sm:$0xff] %v4326_v17  ;;  %v778_v18 = vpack.c.bf16 %v4326_v17, %v4326_v17 }
 0x42e   :  { %3484 = vmatmul.mubr.msk.bf16.vlgmr.msra.gmra.mrb[24].mxu1 %vm452_vm10, %v778_v18  ;;  %v1151_v24 = vpop.permute.xlu0 %1150 }
 0x42f   :  { %3495 = vmatprep.mubr.msk.bf16.mxu1 %vm3887_vm9, %v5005_v30  ;;  %3490 = vmatmul.mubr.msk.bf16.vlgmr.msra.gmra.mrb[12].mxu0 %vm452_vm10, %v1001_v43 }
 0x430   :  { %3494 = vmatpush3.bf16.xpose.msra.mxu1 %v1058_v25  ;;  %3500 = vmatpush3.bf16.xpose.msra.mxu0 %v1108_v29 }
 0x431   :  { %3501 = vmatprep.mubr.msk.bf16.mxu0 %vm3887_vm9, %v5005_v30  ;;  %3505 = vmatprep.subr.bf16.mxu1 %v5005_v30 }
 0x432   :  { %v1207_v31 = vpop.permute.xlu0 %1206  ;;  %3511 = vmatprep.subr.bf16.mxu0 %v5005_v30 }
 0x433   :  { %v1219_v32 = vsel %vm452_vm10, %v1207_v31, 0.0 }
 0x434   :  { %1220 = vadd.xlane.f32.xlu0 %v1219_v32 }
 0x436   :  { %v1211_v33 = vpop.permute.xlu0 %1210 }
 0x437   :  { %3496 = vmatmul.mubr.msk.bf16.vlgmr.msra.gmra.mrb[28].mxu1 %vm452_vm10, %v1051_v11  ;;  %v1225_v36 = vsel %vm452_vm10, %v1211_v33, 0.0  ;;  %3502 = vmatmul.mubr.msk.bf16.vlgmr.msra.gmra.mrb[16].mxu0 %vm452_vm10, %v1101_v1 }
 0x438   :  { %3506 = vmatpush3.bf16.xpose.msra.mxu1 %v1158_v34  ;;  %1226 = vadd.xlane.f32.xlu0 %v1225_v36 }
 0x439   :  { %3507 = vmatprep.mubr.msk.bf16.mxu1 %vm3887_vm9, %v5005_v30  ;;  %3513 = vmatprep.mubr.msk.bf16.mxu0 %vm3887_vm9, %v5005_v30 }
 0x43a   :  { %3517 = vmatprep.subr.bf16.mxu1 %v5005_v30 }
 0x43c   :  { %1292 = vrot.lane.b32.xlu1 %v4165_v49, %s3893_s23 }
 0x43f   :  { %3508 = vmatmul.mubr.msk.bf16.vlgmr.msra.gmra.mrb[32].mxu1 %vm452_vm10, %v1151_v24 }
 0x440   :  { %3519 = vmatprep.mubr.msk.bf16.mxu1 %vm3887_vm9, %v5005_v30 }
 0x4b4   :  { %v4355_v38 = vpop.xlane.xlu1 %1217 }
 0x4b8   :  { %v4357_v39 = vpop.xlane.xlu1 %1223 }
 0x4bc   :  { %v1293_v40 = vpop.permute.xlu1 %1292 }
 0x4bd   :  { %v1302_v42 = vsel %vm792_vm11, %v1293_v40, 0 }
 0x4be   :  { %3512 = vmatpush3.bf16.msra.mxu0 %v1302_v42 }
 0x4bf   :  { %3523 = vmatprep.subr.bf16.mxu0 %v5005_v30 }
 0x4f1   :  { %v4361_v43 = vpop.f32.mrb[4].mxu0 }
 0x4f2   :  { %5028 = vst [vmem:[#allocation15_spill] sm:$0xff] %v4361_v43  ;;  %v3467_v44 = vpop.f32.mrb[5].mxu0 }
 0x4f3   :  { %v833_v57 = vpop.f32.mrb[6].mxu0 }
 0x4f4   :  { %v3468_v59 = vpop.f32.mrb[7].mxu0 }
 0x4f9   :  { %v4363_v60 = vpop.f32.mrb[20].mxu1  ;;  %v4365_v61 = vpop.f32.mrb[8].mxu0 }
 0x4fa   :  { %5029 = vst [vmem:[#allocation16_spill] sm:$0xff] %v4363_v60  ;;  %5030 = vst [vmem:[#allocation17_spill] sm:$0xff] %v4365_v61  ;;  %v3473_v62 = vpop.f32.mrb[21].mxu1  ;;  %v3479_v63 = vpop.f32.mrb[9].mxu0 }
 0x4fb   :  { %v885_v0 = vpop.f32.mrb[22].mxu1  ;;  %v937_v1 = vpop.f32.mrb[10].mxu0 }
 0x4fc   :  { %v3474_v4 = vpop.f32.mrb[23].mxu1  ;;  %v3480_v6 = vpop.f32.mrb[11].mxu0 }
 0x4fd   :  { %v4395_v63 = vpop.xlane.xlu0 %1220 }
 0x501   :  { %v4367_v7 = vpop.f32.mrb[24].mxu1  ;;  %v4397_v0 = vpop.xlane.xlu0 %1226 }
 0x502   :  { %5031 = vst [vmem:[#allocation18_spill] sm:$0xff] %v4367_v7  ;;  %v3485_v8 = vpop.f32.mrb[25].mxu1  ;;  %v1044_v9 = vpop.f32.mrb[12].mxu0 }
 0x503   :  { %v989_v11 = vpop.f32.mrb[26].mxu1  ;;  %v3491_v12 = vpop.f32.mrb[13].mxu0  ;;  %v1228_v13 = vsel %vm452_vm10, %v1044_v9, -inf }
 0x504   :  { %v3486_v14 = vpop.f32.mrb[27].mxu1  ;;  %v1047_v15 = vpop.f32.mrb[14].mxu0  ;;  %1229 = vmax.xlane.f32.xlu0 %v1228_v13 }
 0x505   :  { %v3492_v16 = vpop.f32.mrb[15].mxu0 }
 0x50a   :  { %v1094_v18 = vpop.f32.mrb[28].mxu1  ;;  %v1144_v24 = vpop.f32.mrb[16].mxu0 }
 0x50b   :  { %v3497_v25 = vpop.f32.mrb[29].mxu1  ;;  %v1231_v29 = vsel %vm452_vm10, %v1094_v18, -inf  ;;  %v3503_v31 = vpop.f32.mrb[17].mxu0  ;;  %v1234_v32 = vsel %vm452_vm10, %v1144_v24, -inf }
 0x50c   :  { %v1097_v33 = vpop.f32.mrb[30].mxu1  ;;  %1232 = vmax.xlane.f32.xlu0 %v1231_v29  ;;  %1235 = vmax.xlane.f32.xlu1 %v1234_v32  ;;  %v1147_v34 = vpop.f32.mrb[18].mxu0 }
 0x50d   :  { %v3498_v36 = vpop.f32.mrb[31].mxu1  ;;  %v3504_v40 = vpop.f32.mrb[19].mxu0 }
 0x512   :  { %v1194_v42 = vpop.f32.mrb[32].mxu1 }
 0x513   :  { %v3509_v44 = vpop.f32.mrb[33].mxu1  ;;  %v1237_v57 = vsel %vm452_vm10, %v1194_v42, -inf }
 0x514   :  { %v1197_v59 = vpop.f32.mrb[34].mxu1  ;;  %1238 = vmax.xlane.f32.xlu0 %v1237_v57 }
 0x515   :  { %v3510_v62 = vpop.f32.mrb[35].mxu1 }
 0x51d   :  { %1396 = vrot.lane.b32.xlu1 %v4163_v47, %s3893_s23 }
 0x521   :  { %1448 = vrot.lane.b32.xlu1 %v4176_v53, %s3893_s23 }
 0x525   :  { %1510 = vrot.lane.b32.xlu1 %v4165_v49, %s3894_s24 }
 0x529   :  { %1508 = vrot.lane.b32.xlu1 %v4165_v49, %s3895_s25 }
 0x52a   :  { %1344 = vrot.lane.b32.xlu0 %v4171_v52, %s3893_s23 }
 0x52d   :  { %1610 = vrot.lane.b32.xlu1 %v4163_v47, %s3894_s24 }
 0x52e   :  { %1560 = vrot.lane.b32.xlu0 %v4171_v52, %s3894_s24 }
 0x531   :  { %1608 = vrot.lane.b32.xlu1 %v4163_v47, %s3895_s25 }
 0x532   :  { %1558 = vrot.lane.b32.xlu0 %v4171_v52, %s3895_s25 }
 0x535   :  { %1708 = vrot.lane.b32.xlu1 %v4223_v48, %s3895_s25 }
 0x536   :  { %1660 = vrot.lane.b32.xlu0 %v4176_v53, %s3894_s24 }
 0x539   :  { %1712 = vrot.lane.b32.xlu1 %v4234_v56, %s3895_s25 }
 0x53a   :  { %1658 = vrot.lane.b32.xlu0 %v4176_v53, %s3895_s25 }
 0x53e   :  { %1710 = vrot.lane.b32.xlu0 %v4231_v55, %s3895_s25 }
 0x542   :  { %1714 = vrot.lane.b32.xlu0 %v4239_v58, %s3895_s25 }
 0x591   :  { %v1230_v1 = vpop.xlane.xlu0 %1229 }
 0x592   :  { %v4400_v4 = vmax.f32 %v1230_v1, %v4355_v38 }
 0x594   :  { %v1244_v6 = vsub.f32 %v1044_v9, %v4400_v4 }
 0x596   :  { %v1248_v8 = vmul.f32 1.442695, %v1244_v6 }
 0x598   :  { %3749 = vpow2.f32 %v1248_v8 }
 0x599   :  { %v1233_v11 = vpop.xlane.xlu0 %1232  ;;  %v1236_v12 = vpop.xlane.xlu1 %1235 }
 0x59a   :  { %v4404_v13 = vmax.f32 %v1233_v11, %v4395_v63  ;;  %v4407_v14 = vmax.f32 %v1236_v12, %v4357_v39 }
 0x59c   :  { %v1245_v15 = vsub.f32 %v1094_v18, %v4404_v13  ;;  %v1246_v16 = vsub.f32 %v1144_v24, %v4407_v14 }
 0x59d   :  { %v1397_v29 = vpop.permute.xlu1 %1396 }
 0x59e   :  { %v1250_v25 = vmul.f32 1.442695, %v1245_v15  ;;  %v1252_v31 = vmul.f32 1.442695, %v1246_v16  ;;  %v1406_v24 = vsel %vm792_vm11, %v1397_v29, 0 }
 0x5a0   :  { %3751 = vpow2.f32 %v1250_v25 }
 0x5a1   :  { %3753 = vpow2.f32 %v1252_v31  ;;  %v1239_v9 = vpop.xlane.xlu0 %1238  ;;  %v1449_v32 = vpop.permute.xlu1 %1448 }
 0x5a2   :  { %v4412_v33 = vmax.f32 %v1239_v9, %v4397_v0  ;;  %v4414_v34 = vpop.eup %3749  ;;  %v1458_v12 = vsel %vm792_vm11, %v1449_v32, 0 }
 0x5a3   :  { %v1284_v40 = vpack.c.bf16 %v4414_v34, %v4414_v34 }
 0x5a4   :  { %v1247_v36 = vsub.f32 %v1194_v42, %v4412_v33 }
 0x5a5   :  { %v1345_v18 = vpop.permute.xlu0 %1344  ;;  %v1511_v57 = vpop.permute.xlu1 %1510  ;;  %3514 = vmatmul.mubr.msk.bf16.vlgmr.msra.gmra.mrb[20].mxu0 %vm452_vm10, %v1284_v40 }
 0x5a6   :  { %v1254_v44 = vmul.f32 1.442695, %v1247_v36  ;;  %v1354_v59 = vsel %vm792_vm11, %v1345_v18, 0  ;;  %3524 = vmatpush3.bf16.msra.mxu0 %v1406_v24  ;;  %3525 = vmatprep.mubr.msk.bf16.mxu0 %vm3887_vm9, %v5005_v30  ;;  %v1516_v25 = vsel %vm452_vm10, %v1511_v57, 0 }
 0x5a7   :  { %3518 = vmatpush3.bf16.msra.mxu1 %v1354_v59  ;;  %3535 = vmatprep.subr.bf16.mxu0 %v5005_v30 }
 0x5a8   :  { %3755 = vpow2.f32 %v1254_v44  ;;  %3529 = vmatprep.subr.bf16.mxu1 %v5005_v30 }
 0x5a9   :  { %v1561_v42 = vpop.permute.xlu0 %1560  ;;  %v1509_v1 = vpop.permute.xlu1 %1508 }
 0x5aa   :  { %v4426_v62 = vpop.eup %3751  ;;  %v1566_v40 = vsel %vm452_vm10, %v1561_v42, 0 }
 0x5ab   :  { %v4428_v6 = vpop.eup %3753  ;;  %v1285_v8 = vpack.c.bf16 %v4426_v62, %v4426_v62 }
 0x5ac   :  { %v1286_v11 = vpack.c.bf16 %v4428_v6, %v4428_v6 }
 0x5ad   :  { %3520 = vmatmul.mubr.msk.bf16.vlgmr.msra.gmra.mrb[36].mxu1 %vm452_vm10, %v1285_v8  ;;  %v1559_v15 = vpop.permute.xlu0 %1558  ;;  %v1611_v16 = vpop.permute.xlu1 %1610 }
 0x5ae   :  { %3526 = vmatmul.mubr.msk.bf16.vlgmr.msra.gmra.mrb[24].mxu0 %vm452_vm10, %v1286_v11  ;;  %3530 = vmatpush3.bf16.msra.mxu1 %v1458_v12  ;;  %v1616_v24 = vsel %vm452_vm10, %v1611_v16, 0 }
 0x5af   :  { %3531 = vmatprep.mubr.msk.bf16.mxu1 %vm3887_vm9, %v5005_v30  ;;  %3537 = vmatprep.mubr.msk.bf16.mxu0 %vm3887_vm9, %v5005_v30 }
 0x5b0   :  { %3536 = vmatpush3.bf16.xpose.msra.mxu0 %v1516_v25  ;;  %3541 = vmatprep.subr.bf16.mxu1 %v5005_v30 }
 0x5b1   :  { %v1661_v29 = vpop.permute.xlu0 %1660  ;;  %3547 = vmatprep.subr.bf16.mxu0 %v5005_v30  ;;  %v1609_v9 = vpop.permute.xlu1 %1608 }
 0x5b2   :  { %v4444_v31 = vpop.eup %3755  ;;  %v1666_v11 = vsel %vm452_vm10, %v1661_v29, 0 }
 0x5b3   :  { %v1287_v32 = vpack.c.bf16 %v4444_v31, %v4444_v31 }
 0x5b5   :  { %3532 = vmatmul.mubr.msk.bf16.vlgmr.msra.gmra.mrb[40].mxu1 %vm452_vm10, %v1287_v32  ;;  %v1659_v36 = vpop.permute.xlu0 %1658  ;;  %v1709_v18 = vpop.permute.xlu1 %1708 }
 0x5b6   :  { %3543 = vmatprep.mubr.msk.bf16.mxu1 %vm3887_vm9, %v5005_v30  ;;  %v1720_v44 = vsel %vm452_vm10, %v1709_v18, 0.0 }
 0x5b7   :  { %3538 = vmatmul.mubr.msk.bf16.vlgmr.msra.gmra.mrb[28].mxu0 %vm452_vm10, %v1509_v1  ;;  %3542 = vmatpush3.bf16.xpose.msra.mxu1 %v1566_v40 }
 0x5b8   :  { %3548 = vmatpush3.bf16.xpose.msra.mxu0 %v1616_v24  ;;  %1721 = vadd.xlane.f32.xlu1 %v1720_v44 }
 0x5b9   :  { %v1711_v57 = vpop.permute.xlu0 %1710  ;;  %3549 = vmatprep.mubr.msk.bf16.mxu0 %vm3887_vm9, %v5005_v30  ;;  %3553 = vmatprep.subr.bf16.mxu1 %v5005_v30  ;;  %v1713_v59 = vpop.permute.xlu1 %1712 }
 0x5ba   :  { %v1723_v42 = vsel %vm452_vm10, %v1711_v57, 0.0  ;;  %3559 = vmatprep.subr.bf16.mxu0 %v5005_v30  ;;  %v1726_v8 = vsel %vm452_vm10, %v1713_v59, 0.0 }
 0x5bb   :  { %1724 = vadd.xlane.f32.xlu0 %v1723_v42 }
 0x5bc   :  { %1727 = vadd.xlane.f32.xlu1 %v1726_v8 }
 0x5bd   :  { %v1715_v1 = vpop.permute.xlu0 %1714 }
 0x5be   :  { %3544 = vmatmul.mubr.msk.bf16.vlgmr.msra.gmra.mrb[44].mxu1 %vm452_vm10, %v1559_v15  ;;  %v1729_v12 = vsel %vm452_vm10, %v1715_v1, 0.0 }
 0x5bf   :  { %3550 = vmatmul.mubr.msk.bf16.vlgmr.msra.gmra.mrb[32].mxu0 %vm452_vm10, %v1609_v9  ;;  %3554 = vmatpush3.bf16.xpose.msra.mxu1 %v1666_v11 }
 0x5c0   :  { %1730 = vadd.xlane.f32.xlu0 %v1729_v12  ;;  %3555 = vmatprep.mubr.msk.bf16.mxu1 %vm3887_vm9, %v5005_v30 }
 0x5c1   :  { %3561 = vmatprep.mubr.msk.bf16.mxu0 %vm3887_vm9, %v5005_v30  ;;  %3565 = vmatprep.subr.bf16.mxu1 %v5005_v30 }
 0x5c6   :  { %3556 = vmatmul.mubr.msk.bf16.vlgmr.msra.gmra.mrb[48].mxu1 %vm452_vm10, %v1659_v36 }
 0x5c7   :  { %3567 = vmatprep.mubr.msk.bf16.mxu1 %vm3887_vm9, %v5005_v30 }
 0x5cd   :  { %1796 = vrot.lane.b32.xlu1 %v4165_v49, %s3896_s26 }
 0x645   :  { %v4475_v15 = vpop.xlane.xlu1 %1721 }
 0x649   :  { %v4477_v16 = vpop.xlane.xlu1 %1727 }
 0x64d   :  { %v1797_v25 = vpop.permute.xlu1 %1796 }
 0x64e   :  { %v1806_v29 = vsel %vm792_vm11, %v1797_v25, 0 }
 0x64f   :  { %3560 = vmatpush3.bf16.msra.mxu0 %v1806_v29 }
 0x650   :  { %3571 = vmatprep.subr.bf16.mxu0 %v5005_v30 }
 0x678   :  { %v4481_v9 = vpop.f32.mrb[20].mxu0 }
 0x679   :  { %v3515_v32 = vpop.f32.mrb[21].mxu0 }
 0x67a   :  { %v1341_v36 = vpop.f32.mrb[22].mxu0 }
 0x67b   :  { %v3516_v40 = vpop.f32.mrb[23].mxu0 }
 0x680   :  { %v4483_v18 = vpop.f32.mrb[36].mxu1 }
 0x681   :  { %v4485_v24 = vpop.f32.mrb[24].mxu0  ;;  %v3521_v44 = vpop.f32.mrb[37].mxu1 }
 0x682   :  { %v3527_v57 = vpop.f32.mrb[25].mxu0  ;;  %v1393_v59 = vpop.f32.mrb[38].mxu1 }
 0x683   :  { %v1445_v42 = vpop.f32.mrb[26].mxu0  ;;  %v3522_v8 = vpop.f32.mrb[39].mxu1 }
 0x684   :  { %v3528_v1 = vpop.f32.mrb[27].mxu0 }
 0x688   :  { %v4487_v11 = vpop.f32.mrb[40].mxu1 }
 0x689   :  { %v3533_v12 = vpop.f32.mrb[41].mxu1 }
 0x68a   :  { %v1552_v25 = vpop.f32.mrb[28].mxu0  ;;  %v1497_v29 = vpop.f32.mrb[42].mxu1 }
 0x68b   :  { %v3539_v30 = vpop.f32.mrb[29].mxu0  ;;  %v1732_v32 = vsel %vm452_vm10, %v1552_v25, -inf  ;;  %v3534_v36 = vpop.f32.mrb[43].mxu1 }
 0x68c   :  { %v1555_v40 = vpop.f32.mrb[30].mxu0  ;;  %1733 = vmax.xlane.f32.xlu0 %v1732_v32 }
 0x68d   :  { %v3540_v10 = vpop.f32.mrb[31].mxu0 }
 0x691   :  { %v1602_v26 = vpop.f32.mrb[44].mxu1 }
 0x692   :  { %v1652_v20 = vpop.f32.mrb[32].mxu0  ;;  %v3545_v44 = vpop.f32.mrb[45].mxu1  ;;  %v1735_v57 = vsel %vm452_vm10, %v1602_v26, -inf }
 0x693   :  { %v3551_v59 = vpop.f32.mrb[33].mxu0  ;;  %v1738_v42 = vsel %vm452_vm10, %v1652_v20, -inf  ;;  %v1605_v8 = vpop.f32.mrb[46].mxu1  ;;  %1736 = vmax.xlane.f32.xlu0 %v1735_v57 }
 0x694   :  { %1739 = vmax.xlane.f32.xlu1 %v1738_v42  ;;  %v1655_v1 = vpop.f32.mrb[34].mxu0  ;;  %v3546_v12 = vpop.f32.mrb[47].mxu1 }
 0x695   :  { %v3552_v30 = vpop.f32.mrb[35].mxu0 }
 0x699   :  { %v1702_v29 = vpop.f32.mrb[48].mxu1 }
 0x69a   :  { %v3557_v35 = vpop.f32.mrb[49].mxu1  ;;  %v1741_v36 = vsel %vm452_vm10, %v1702_v29, -inf }
 0x69b   :  { %v1705_v32 = vpop.f32.mrb[50].mxu1  ;;  %1742 = vmax.xlane.f32.xlu0 %v1741_v36  ;;  %v4515_v35 = vpop.xlane.xlu0 %1724 }
 0x69c   :  { %v3558_v10 = vpop.f32.mrb[51].mxu1 }
 0x69f   :  { %v4517_v40 = vpop.xlane.xlu0 %1730 }
 0x6a5   :  { %1900 = vrot.lane.b32.xlu1 %v4163_v47, %s3896_s26 }
 0x6a9   :  { %1952 = vrot.lane.b32.xlu1 %v4176_v53, %s3896_s26 }
 0x6ad   :  { %2014 = vrot.lane.b32.xlu1 %v4165_v49, %s3897_s27 }
 0x6b1   :  { %2012 = vrot.lane.b32.xlu1 %v4165_v49, %s3898_s28  ;;  %1848 = vrot.lane.b32.xlu0 %v4171_v52, %s3896_s26 }
 0x6b5   :  { %2114 = vrot.lane.b32.xlu1 %v4163_v47, %s3897_s27  ;;  %2064 = vrot.lane.b32.xlu0 %v4171_v52, %s3897_s27 }
 0x6b9   :  { %2112 = vrot.lane.b32.xlu1 %v4163_v47, %s3898_s28  ;;  %2062 = vrot.lane.b32.xlu0 %v4171_v52, %s3898_s28 }
 0x6bd   :  { %2212 = vrot.lane.b32.xlu1 %v4223_v48, %s3898_s28  ;;  %2164 = vrot.lane.b32.xlu0 %v4176_v53, %s3897_s27 }
 0x6c1   :  { %2216 = vrot.lane.b32.xlu1 %v4234_v56, %s3898_s28  ;;  %2162 = vrot.lane.b32.xlu0 %v4176_v53, %s3898_s28 }
 0x6c5   :  { %2214 = vrot.lane.b32.xlu0 %v4231_v55, %s3898_s28 }
 0x6c9   :  { %2218 = vrot.lane.b32.xlu0 %v4239_v58, %s3898_s28 }
 0x719   :  { %v1734_v44 = vpop.xlane.xlu0 %1733 }
 0x71a   :  { %v4520_v57 = vmax.f32 %v1734_v44, %v4475_v15 }
 0x71c   :  { %v1748_v48 = vsub.f32 %v1552_v25, %v4520_v57 }
 0x71e   :  { %v1752_v59 = vmul.f32 1.442695, %v1748_v48 }
 0x720   :  { %3757 = vpow2.f32 %v1752_v59  ;;  %v1737_v42 = vpop.xlane.xlu0 %1736 }
 0x721   :  { %v1740_v56 = vpop.xlane.xlu1 %1739  ;;  %v4524_v8 = vmax.f32 %v1737_v42, %v4515_v35 }
 0x722   :  { %v4527_v55 = vmax.f32 %v1740_v56, %v4477_v16 }
 0x723   :  { %v1749_v58 = vsub.f32 %v1602_v26, %v4524_v8 }
 0x724   :  { %v1750_v1 = vsub.f32 %v1652_v20, %v4527_v55 }
 0x725   :  { %v1754_v12 = vmul.f32 1.442695, %v1749_v58  ;;  %v1901_v30 = vpop.permute.xlu1 %1900 }
 0x726   :  { %v1756_v36 = vmul.f32 1.442695, %v1750_v1  ;;  %v1910_v42 = vsel %vm792_vm11, %v1901_v30, 0 }
 0x727   :  { %3759 = vpow2.f32 %v1754_v12  ;;  %v5032_v12 = vmov 0.0  }
 0x728   :  { %3761 = vpow2.f32 %v1756_v36  ;;  %v1743_v25 = vpop.xlane.xlu0 %1742 }
 0x729   :  { %v1953_v32 = vpop.permute.xlu1 %1952  ;;  %v4532_v10 = vmax.f32 %v1743_v25, %v4517_v40 }
 0x72a   :  { %v4534_v44 = vpop.eup %3757 }
 0x72b   :  { %v1751_v48 = vsub.f32 %v1702_v29, %v4532_v10  ;;  %v1788_v20 = vpack.c.bf16 %v4534_v44, %v4534_v44 }
 0x72c   :  { %v1849_v26 = vpop.permute.xlu0 %1848 }
 0x72d   :  { %v1758_v56 = vmul.f32 1.442695, %v1751_v48  ;;  %v2015_v58 = vpop.permute.xlu1 %2014  ;;  %3562 = vmatmul.mubr.msk.bf16.vlgmr.msra.gmra.mrb[36].mxu0 %vm452_vm10, %v1788_v20  ;;  %v1858_v1 = vsel %vm792_vm11, %v1849_v26, 0  ;;  %v1962_v26 = vsel %vm792_vm11, %v1953_v32, 0 }
 0x72e   :  { %3572 = vmatpush3.bf16.msra.mxu0 %v1910_v42  ;;  %3566 = vmatpush3.bf16.msra.mxu1 %v1858_v1  ;;  %v2020_v1 = vsel %vm452_vm10, %v2015_v58, 0 }
 0x72f   :  { %3763 = vpow2.f32 %v1758_v56  ;;  %3573 = vmatprep.mubr.msk.bf16.mxu0 %vm3887_vm9, %v5032_v12  ;;  %3577 = vmatprep.subr.bf16.mxu1 %v5032_v12 }
 0x730   :  { %v2065_v29 = vpop.permute.xlu0 %2064  ;;  %3583 = vmatprep.subr.bf16.mxu0 %v5032_v12 }
 0x731   :  { %v4548_v36 = vpop.eup %3759  ;;  %v2013_v30 = vpop.permute.xlu1 %2012 }
 0x732   :  { %v4550_v25 = vpop.eup %3761  ;;  %v1789_v48 = vpack.c.bf16 %v4548_v36, %v4548_v36 }
 0x733   :  { %v1790_v20 = vpack.c.bf16 %v4550_v25, %v4550_v25 }
 0x734   :  { %3568 = vmatmul.mubr.msk.bf16.vlgmr.msra.gmra.mrb[52].mxu1 %vm452_vm10, %v1789_v48  ;;  %v2063_v42 = vpop.permute.xlu0 %2062 }
 0x735   :  { %v2115_v56 = vpop.permute.xlu1 %2114  ;;  %3574 = vmatmul.mubr.msk.bf16.vlgmr.msra.gmra.mrb[40].mxu0 %vm452_vm10, %v1790_v20  ;;  %3578 = vmatpush3.bf16.msra.mxu1 %v1962_v26  ;;  %v2070_v26 = vsel %vm452_vm10, %v2065_v29, 0 }
 0x736   :  { %3579 = vmatprep.mubr.msk.bf16.mxu1 %vm3887_vm9, %v5032_v12  ;;  %3585 = vmatprep.mubr.msk.bf16.mxu0 %vm3887_vm9, %v5032_v12 }
 0x737   :  { %3584 = vmatpush3.bf16.xpose.msra.mxu0 %v2020_v1  ;;  %3589 = vmatprep.subr.bf16.mxu1 %v5032_v12  ;;  %v2120_v1 = vsel %vm452_vm10, %v2115_v56, 0 }
 0x738   :  { %v2165_v59 = vpop.permute.xlu0 %2164  ;;  %3595 = vmatprep.subr.bf16.mxu0 %v5032_v12 }
 0x739   :  { %v4566_v32 = vpop.eup %3763  ;;  %v2113_v48 = vpop.permute.xlu1 %2112 }
 0x73a   :  { %v1791_v20 = vpack.c.bf16 %v4566_v32, %v4566_v32 }
 0x73c   :  { %3580 = vmatmul.mubr.msk.bf16.vlgmr.msra.gmra.mrb[56].mxu1 %vm452_vm10, %v1791_v20  ;;  %v2163_v58 = vpop.permute.xlu0 %2162 }
 0x73d   :  { %v2213_v3 = vpop.permute.xlu1 %2212  ;;  %3591 = vmatprep.mubr.msk.bf16.mxu1 %vm3887_vm9, %v5032_v12 }
 0x73e   :  { %3586 = vmatmul.mubr.msk.bf16.vlgmr.msra.gmra.mrb[44].mxu0 %vm452_vm10, %v2013_v30  ;;  %3590 = vmatpush3.bf16.xpose.msra.mxu1 %v2070_v26  ;;  %v2224_v7 = vsel %vm452_vm10, %v2213_v3, 0.0  ;;  %v2170_v3 = vsel %vm452_vm10, %v2165_v59, 0 }
 0x73f   :  { %3596 = vmatpush3.bf16.xpose.msra.mxu0 %v2120_v1  ;;  %2225 = vadd.xlane.f32.xlu1 %v2224_v7 }
 0x740   :  { %v2215_v43 = vpop.permute.xlu0 %2214  ;;  %3597 = vmatprep.mubr.msk.bf16.mxu0 %vm3887_vm9, %v5032_v12  ;;  %3601 = vmatprep.subr.bf16.mxu1 %v5032_v12 }
 0x741   :  { %v2217_v29 = vpop.permute.xlu1 %2216  ;;  %v2227_v20 = vsel %vm452_vm10, %v2215_v43, 0.0  ;;  %3607 = vmatprep.subr.bf16.mxu0 %v5032_v12 }
 0x742   :  { %v2230_v56 = vsel %vm452_vm10, %v2217_v29, 0.0  ;;  %2228 = vadd.xlane.f32.xlu0 %v2227_v20 }
 0x743   :  { %2231 = vadd.xlane.f32.xlu1 %v2230_v56 }
 0x744   :  { %v2219_v30 = vpop.permute.xlu0 %2218 }
 0x745   :  { %3592 = vmatmul.mubr.msk.bf16.vlgmr.msra.gmra.mrb[60].mxu1 %vm452_vm10, %v2063_v42  ;;  %v2233_v7 = vsel %vm452_vm10, %v2219_v30, 0.0 }
 0x746   :  { %3598 = vmatmul.mubr.msk.bf16.vlgmr.msra.gmra.mrb[48].mxu0 %vm452_vm10, %v2113_v48  ;;  %3602 = vmatpush3.bf16.xpose.msra.mxu1 %v2170_v3 }
 0x747   :  { %2234 = vadd.xlane.f32.xlu0 %v2233_v7  ;;  %3603 = vmatprep.mubr.msk.bf16.mxu1 %vm3887_vm9, %v5032_v12 }
 0x748   :  { %3609 = vmatprep.mubr.msk.bf16.mxu0 %vm3887_vm9, %v5032_v12  ;;  %3613 = vmatprep.subr.bf16.mxu1 %v5032_v12 }
 0x74d   :  { %3604 = vmatmul.mubr.msk.bf16.vlgmr.msra.gmra.mrb[64].mxu1 %vm452_vm10, %v2163_v58 }
 0x74e   :  { %3615 = vmatprep.mubr.msk.bf16.mxu1 %vm3887_vm9, %v5032_v12 }
 0x754   :  { %2300 = vrot.lane.b32.xlu1 %v4165_v49, %s3899_s0 }
 0x7cc   :  { %v4597_v43 = vpop.xlane.xlu1 %2225 }
 0x7d0   :  { %v4599_v59 = vpop.xlane.xlu1 %2231 }
 0x7d4   :  { %v2301_v42 = vpop.permute.xlu1 %2300 }
 0x7d5   :  { %v2310_v48 = vsel %vm792_vm11, %v2301_v42, 0 }
 0x7d6   :  { %3608 = vmatpush3.bf16.msra.mxu0 %v2310_v48 }
 0x7d7   :  { %3619 = vmatprep.subr.bf16.mxu0 %v5032_v12 }
 0x800   :  { %v4603_v26 = vpop.f32.mrb[36].mxu0 }
 0x801   :  { %v3563_v58 = vpop.f32.mrb[37].mxu0 }
 0x802   :  { %v1845_v1 = vpop.f32.mrb[38].mxu0 }
 0x803   :  { %v3564_v29 = vpop.f32.mrb[39].mxu0 }
 0x807   :  { %v4605_v20 = vpop.f32.mrb[52].mxu1 }
 0x808   :  { %v4607_v56 = vpop.f32.mrb[40].mxu0  ;;  %v3569_v49 = vpop.f32.mrb[53].mxu1 }
 0x809   :  { %v3575_v30 = vpop.f32.mrb[41].mxu0  ;;  %v1897_v3 = vpop.f32.mrb[54].mxu1 }
 0x80a   :  { %v1949_v7 = vpop.f32.mrb[42].mxu0  ;;  %v3570_v60 = vpop.f32.mrb[55].mxu1 }
 0x80b   :  { %v3576_v61 = vpop.f32.mrb[43].mxu0 }
 0x80f   :  { %v4609_v17 = vpop.f32.mrb[56].mxu1 }
 0x810   :  { %v3581_v42 = vpop.f32.mrb[57].mxu1 }
 0x811   :  { %v4611_v48 = vpop.f32.mrb[44].mxu0  ;;  %v2001_v21 = vpop.f32.mrb[58].mxu1 }
 0x812   :  { %v3587_v37 = vpop.f32.mrb[45].mxu0  ;;  %v2236_v58 = vsel %vm452_vm10, %v4611_v48, -inf  ;;  %v3582_v1 = vpop.f32.mrb[59].mxu1 }
 0x813   :  { %v2059_v29 = vpop.f32.mrb[46].mxu0  ;;  %2237 = vmax.xlane.f32.xlu0 %v2236_v58 }
 0x814   :  { %v3588_v23 = vpop.f32.mrb[47].mxu0 }
 0x818   :  { %v4615_v49 = vpop.f32.mrb[60].mxu1 }
 0x819   :  { %v4617_v30 = vpop.f32.mrb[48].mxu0  ;;  %v3593_v60 = vpop.f32.mrb[61].mxu1  ;;  %v2239_v61 = vsel %vm452_vm10, %v4615_v49, -inf }
 0x81a   :  { %v3599_v3 = vpop.f32.mrb[49].mxu0  ;;  %v2242_v21 = vsel %vm452_vm10, %v4617_v30, -inf  ;;  %v2109_v37 = vpop.f32.mrb[62].mxu1  ;;  %2240 = vmax.xlane.f32.xlu0 %v2239_v61  ;;  %v1268_v61 = vsel %vm452_vm10, %v4414_v34, 0.0  ;;  %v1778_v34 = vsel %vm452_vm10, %v4550_v25, 0.0 }
 0x81b   :  { %2243 = vmax.xlane.f32.xlu1 %v2242_v21  ;;  %v2159_v7 = vpop.f32.mrb[50].mxu0  ;;  %v3594_v42 = vpop.f32.mrb[63].mxu1  ;;  %v1256_v3 = vsub.f32 %v4355_v38, %v4400_v4  ;;  %v1271_v21 = vsel %vm452_vm10, %v4426_v62, 0.0  ;;  %v1259_v4 = vsub.f32 %v4397_v0, %v4412_v33  ;;  %v1277_v62 = vsel %vm452_vm10, %v4444_v31, 0.0 }
 0x81c   :  { %v3600_v1 = vpop.f32.mrb[51].mxu0  ;;  %v1762_v0 = vsub.f32 %v4477_v16, %v4527_v55  ;;  %v1781_v33 = vsel %vm452_vm10, %v4566_v32, 0.0 }
 0x820   :  { %v4623_v58 = vpop.f32.mrb[64].mxu1 }
 0x821   :  { %v3605_v23 = vpop.f32.mrb[65].mxu1  ;;  %v2245_v29 = vsel %vm452_vm10, %v4623_v58, -inf }
 0x822   :  { %v2209_v60 = vpop.f32.mrb[66].mxu1  ;;  %2246 = vmax.xlane.f32.xlu0 %v2245_v29 }
 0x823   :  { %v3606_v50 = vpop.f32.mrb[67].mxu1 }
 0x824   :  { %v1772_v50 = vsel %vm452_vm10, %v4534_v44, 0.0  ;;  %v1266_v44 = vmul.f32 1.442695, %v1259_v4 }
 0x82c   :  { %2404 = vrot.lane.b32.xlu1 %v4163_v47, %s3899_s0  ;;  %v1260_v47 = vmul.f32 1.442695, %v1256_v3 }
 0x82e   :  { %3765 = vpow2.f32 %v1260_v47 }
 0x830   :  { %2456 = vrot.lane.b32.xlu1 %v4176_v53, %s3899_s0  ;;  %v1258_v53 = vsub.f32 %v4357_v39, %v4407_v14  ;;  %v1760_v39 = vsub.f32 %v4475_v15, %v4520_v57  ;;  %v1775_v14 = vsel %vm452_vm10, %v4548_v36, 0.0  ;;  %v1768_v15 = vmul.f32 1.442695, %v1762_v0 }
 0x831   :  { %v1761_v57 = vsub.f32 %v4515_v35, %v4524_v8  ;;  %v5033_v35 = vsub.f32 %v4517_v40, %v4532_v10 }
 0x832   :  { %v1264_v38 = vmul.f32 1.442695, %v1258_v53  ;;  %v1764_v25 = vmul.f32 1.442695, %v1760_v39 }
 0x833   :  { %v1766_v16 = vmul.f32 1.442695, %v1761_v57  ;;  %v1770_v8 = vmul.f32 1.442695, %v5033_v35 }
 0x834   :  { %3767 = vpow2.f32 %v1264_v38 }
 0x835   :  { %3769 = vpow2.f32 %v1266_v44 }
 0x836   :  { %3771 = vpow2.f32 %v1764_v25 }
 0x838   :  { %2352 = vrot.lane.b32.xlu0 %v4171_v52, %s3899_s0  ;;  %v1274_v52 = vsel %vm452_vm10, %v4428_v6, 0.0  ;;  %v1257_v6 = vsub.f32 %v4395_v63, %v4404_v13  ;;  %v4661_v31 = vpop.eup %3765 }
 0x839   :  { %v1288_v63 = vmul.f32 %v4661_v31, %v4214_v41 }
 0x83a   :  { %v1262_v37 = vmul.f32 1.442695, %v1257_v6 }
 0x83c   :  { %3773 = vpow2.f32 %v1262_v37 }
 0x83d   :  { %3775 = vpow2.f32 %v1768_v15 }
 0x83e   :  { %v4667_v13 = vpop.eup %3767  ;;  %3777 = vpow2.f32 %v1766_v16 }
 0x83f   :  { %v1290_v55 = vmul.f32 %v4667_v13, %v4220_v46  ;;  %v4672_v36 = vpop.eup %3769  ;;  %3779 = vpow2.f32 %v1770_v8 }
 0x840   :  { %v1291_v32 = vmul.f32 %v4672_v36, %v4226_v51  ;;  %v4680_v7 = vpop.eup %3771 }
 0x841   :  { %v1792_v1 = vmul.f32 %v4680_v7, %v4214_v41 }
 0x846   :  { %v4683_v42 = vpop.eup %3773 }
 0x847   :  { %v4687_v23 = vpop.eup %3775  ;;  %v1289_v10 = vmul.f32 %v4683_v42, %v4218_v45 }
 0x848   :  { %v1794_v40 = vmul.f32 %v4687_v23, %v4220_v46  ;;  %v4694_v29 = vpop.eup %3777 }
 0x849   :  { %v1793_v60 = vmul.f32 %v4694_v29, %v4218_v45 }
 0x854   :  { %1269 = vadd.xlane.f32.xlu1 %v1268_v61  ;;  %v4700_v61 = vpop.eup %3779 }
 0x855   :  { %v1795_v3 = vmul.f32 %v4700_v61, %v4226_v51 }
 0x857   :  { %1272 = vadd.xlane.f32.xlu0 %v1271_v21  ;;  %v2229_v21 = vpop.xlane.xlu0 %2228 }
 0x858   :  { %1773 = vadd.xlane.f32.xlu1 %v1772_v50 }
 0x85b   :  { %1275 = vadd.xlane.f32.xlu0 %v1274_v52  ;;  %v4706_v50 = vpop.xlane.xlu0 %2234 }
 0x85c   :  { %1779 = vadd.xlane.f32.xlu1 %v1778_v34 }
 0x85f   :  { %1278 = vadd.xlane.f32.xlu0 %v1277_v62 }
 0x863   :  { %1776 = vadd.xlane.f32.xlu0 %v1775_v14 }
 0x867   :  { %1782 = vadd.xlane.f32.xlu0 %v1781_v33 }
 0x86d   :  { %1295 = vrot.lane.b32.xlu1 %v1288_v63, %s3891_s21 }
 0x871   :  { %1399 = vrot.lane.b32.xlu1 %v1290_v55, %s3891_s21 }
 0x875   :  { %1451 = vrot.lane.b32.xlu1 %v1291_v32, %s3891_s21 }
 0x879   :  { %1799 = vrot.lane.b32.xlu1 %v1792_v1, %s3894_s24 }
 0x87d   :  { %1903 = vrot.lane.b32.xlu1 %v1794_v40, %s3894_s24  ;;  %1347 = vrot.lane.b32.xlu0 %v1289_v10, %s3891_s21 }
 0x881   :  { %1851 = vrot.lane.b32.xlu0 %v1793_v60, %s3894_s24 }
 0x885   :  { %1955 = vrot.lane.b32.xlu0 %v1795_v3, %s3894_s24 }
 0x8a0   :  { %v2238_v47 = vpop.xlane.xlu0 %2237 }
 0x8a1   :  { %v2248_v53 = vmax.f32 %v2238_v47, %v4597_v43 }
 0x8a3   :  { %v2252_v52 = vsub.f32 %v4611_v48, %v2248_v53  ;;  %v2264_v25 = vsub.f32 %v4597_v43, %v2248_v53 }
 0x8a5   :  { %v2256_v34 = vmul.f32 1.442695, %v2252_v52  ;;  %v2268_v15 = vmul.f32 1.442695, %v2264_v25 }
 0x8a7   :  { %3781 = vpow2.f32 %v2256_v34  ;;  %v2241_v38 = vpop.xlane.xlu0 %2240 }
 0x8a8   :  { %v2244_v4 = vpop.xlane.xlu1 %2243  ;;  %v2249_v62 = vmax.f32 %v2241_v38, %v2229_v21 }
 0x8a9   :  { %v2250_v44 = vmax.f32 %v2244_v4, %v4599_v59 }
 0x8aa   :  { %v2253_v39 = vsub.f32 %v4615_v49, %v2249_v62  ;;  %v2265_v40 = vsub.f32 %v2229_v21, %v2249_v62 }
 0x8ab   :  { %v2254_v14 = vsub.f32 %v4617_v30, %v2250_v44 }
 0x8ac   :  { %v2258_v6 = vmul.f32 1.442695, %v2253_v39  ;;  %v2405_v57 = vpop.permute.xlu1 %2404  ;;  %v2270_v53 = vmul.f32 1.442695, %v2265_v40  ;;  %v2266_v39 = vsub.f32 %v4599_v59, %v2250_v44  ;;  %v762_v44 = vsel %vm452_vm10, %v4308_v5, 0.0 }
 0x8ad   :  { %v2260_v0 = vmul.f32 1.442695, %v2254_v14  ;;  %v2414_v55 = vsel %vm792_vm11, %v2405_v57, 0 }
 0x8ae   :  { %3783 = vpow2.f32 %v2258_v6  ;;  %v2272_v25 = vmul.f32 1.442695, %v2266_v39 }
 0x8af   :  { %3785 = vpow2.f32 %v2260_v0  ;;  %v2247_v33 = vpop.xlane.xlu0 %2246 }
 0x8b0   :  { %v4715_v48 = vmax.f32 %v2247_v33, %v4706_v50  ;;  %3787 = vpow2.f32 %v2268_v15  ;;  %v2457_v32 = vpop.permute.xlu1 %2456 }
 0x8b1   :  { %v3782_v37 = vpop.eup %3781  ;;  %v2466_v47 = vsel %vm792_vm11, %v2457_v32, 0 }
 0x8b2   :  { %v2255_v63 = vsub.f32 %v4623_v58, %v4715_v48  ;;  %v2267_v49 = vsub.f32 %v4706_v50, %v4715_v48  ;;  %v2276_v30 = vsel %vm452_vm10, %v3782_v37, 0.0  ;;  %v2292_v16 = vpack.c.bf16 %v3782_v37, %v3782_v37 }
 0x8b3   :  { %2277 = vadd.xlane.f32.xlu1 %v2276_v30  ;;  %v2353_v43 = vpop.permute.xlu0 %2352 }
 0x8b4   :  { %v2262_v35 = vmul.f32 1.442695, %v2255_v63  ;;  %3610 = vmatmul.mubr.msk.bf16.vlgmr.msra.gmra.mrb[52].mxu0 %vm452_vm10, %v2292_v16  ;;  %v2362_v8 = vsel %vm792_vm11, %v2353_v43, 0 }
 0x8b5   :  { %3620 = vmatpush3.bf16.msra.mxu0 %v2414_v55  ;;  %3614 = vmatpush3.bf16.msra.mxu1 %v2362_v8 }
 0x8b6   :  { %3789 = vpow2.f32 %v2262_v35  ;;  %3621 = vmatprep.mubr.msk.bf16.mxu0 %vm3887_vm9, %v5032_v12  ;;  %3625 = vmatprep.subr.bf16.mxu1 %v5032_v12 }
 0x8b7   :  { %3791 = vpow2.f32 %v2270_v53 }
 0x8b8   :  { %v3784_v58 = vpop.eup %3783  ;;  %3793 = vpow2.f32 %v2272_v25 }
 0x8b9   :  { %v3786_v1 = vpop.eup %3785  ;;  %v2279_v10 = vsel %vm452_vm10, %v3784_v58, 0.0  ;;  %v2293_v60 = vpack.c.bf16 %v3784_v58, %v3784_v58 }
 0x8ba   :  { %2280 = vadd.xlane.f32.xlu0 %v2279_v10  ;;  %v2294_v3 = vpack.c.bf16 %v3786_v1, %v3786_v1  ;;  %v4734_v52 = vpop.eup %3787  ;;  %v2282_v0 = vsel %vm452_vm10, %v3786_v1, 0.0 }
 0x8bb   :  { %3616 = vmatmul.mubr.msk.bf16.vlgmr.msra.gmra.mrb[68].mxu1 %vm452_vm10, %v2293_v60  ;;  %v2296_v38 = vmul.f32 %v4734_v52, %v4214_v41 }
 0x8bc   :  { %3622 = vmatmul.mubr.msk.bf16.vlgmr.msra.gmra.mrb[56].mxu0 %vm452_vm10, %v2294_v3  ;;  %3626 = vmatpush3.bf16.msra.mxu1 %v2466_v47 }
 0x8bd   :  { %3627 = vmatprep.mubr.msk.bf16.mxu1 %vm3887_vm9, %v5032_v12 }
 0x8c0   :  { %v3790_v34 = vpop.eup %3789 }
 0x8c1   :  { %v2295_v21 = vpack.c.bf16 %v3790_v34, %v3790_v34  ;;  %v4740_v4 = vpop.eup %3791 }
 0x8c2   :  { %v2297_v62 = vmul.f32 %v4740_v4, %v4218_v45  ;;  %v4757_v35 = vpop.eup %3793 }
 0x8c3   :  { %3628 = vmatmul.mubr.msk.bf16.vlgmr.msra.gmra.mrb[72].mxu1 %vm452_vm10, %v2295_v21 }
 0x8c4   :  { %2303 = vrot.lane.b32.xlu1 %v2296_v38, %s3897_s27 }
 0x8d0   :  { %2355 = vrot.lane.b32.xlu0 %v2297_v62, %s3897_s27 }
 0x8e1   :  { %v1270_v12 = vpop.xlane.xlu1 %1269 }
 0x8e2   :  { %v1280_v57 = vadd.f32 %v4661_v31, %v1270_v12 }
 0x8e4   :  { %v1273_v14 = vpop.xlane.xlu0 %1272 }
 0x8e5   :  { %v1774_v6 = vpop.xlane.xlu1 %1773  ;;  %v1281_v63 = vadd.f32 %v4683_v42, %v1273_v14  ;;  %v765_v42 = vsel %vm452_vm10, %v4305_v2, 0.0  ;;  %v2298_v2 = vmul.f32 %v4757_v35, %v4220_v46 }
 0x8e6   :  { %v1784_v43 = vadd.f32 %v4680_v7, %v1774_v6  ;;  %v2285_v7 = vsel %vm452_vm10, %v3790_v34, 0.0 }
 0x8e8   :  { %2283 = vadd.xlane.f32.xlu1 %v2282_v0  ;;  %v1276_v33 = vpop.xlane.xlu0 %1275 }
 0x8e9   :  { %v1780_v37 = vpop.xlane.xlu1 %1779  ;;  %v1282_v15 = vadd.f32 %v4667_v13, %v1276_v33 }
 0x8eb   :  { %3795 = vrcp.f32 %v1282_v15 }
 0x8ec   :  { %v1279_v30 = vpop.xlane.xlu0 %1278  ;;  %3797 = vrcp.f32 %v1280_v57 }
 0x8ed   :  { %v1296_v16 = vpop.permute.xlu1 %1295  ;;  %v1283_v59 = vadd.f32 %v4672_v36, %v1279_v30  ;;  %v1786_v36 = vadd.f32 %v4687_v23, %v1780_v37 }
 0x8ee   :  { %v1339_v1 = vadd.f32 %v4481_v9, %v1296_v16  ;;  %v2274_v9 = vmul.f32 1.442695, %v2267_v49 }
 0x8ef   :  { %3799 = vrcp.f32 %v1283_v59  ;;  %763 = vadd.xlane.f32.xlu0 %v762_v44  ;;  %v759_v44 = vsel %vm452_vm10, %v4294_v54, 0.0 }
 0x8f0   :  { %3801 = vrcp.f32 %v1281_v63  ;;  %v1777_v13 = vpop.xlane.xlu0 %1776 }
 0x8f1   :  { %v1400_v55 = vpop.permute.xlu1 %1399  ;;  %v1785_v31 = vadd.f32 %v4694_v29, %v1777_v13  ;;  %v5035_v13 = vld [vmem:[#allocation11_spill] sm:$0xff] }
 0x8f2   :  { %v1443_v40 = vadd.f32 %v4485_v24, %v1400_v55 }
 0x8f3   :  { %3803 = vrcp.f32 %v1785_v31  ;;  %766 = vadd.xlane.f32.xlu0 %v765_v42 }
 0x8f4   :  { %3805 = vrcp.f32 %v1784_v43  ;;  %v1783_v5 = vpop.xlane.xlu0 %1782  ;;  %v5034_v43 = vld [vmem:[#allocation13_spill] sm:$0xff] }
 0x8f5   :  { %v1452_v8 = vpop.permute.xlu1 %1451  ;;  %v1787_v58 = vadd.f32 %v4700_v61, %v1783_v5  ;;  %v3796_v32 = vpop.eup %3795  ;;  %v750_v55 = vsub.f32 %v5035_v13, %v5034_v43  ;;  %v5038_v5 = vld [vmem:[#allocation14_spill] sm:$0xff] }
 0x8f6   :  { %v3798_v29 = vpop.eup %3797  ;;  %v1495_v23 = vadd.f32 %v4487_v11, %v1452_v8  ;;  %v1506_v53 = vmul.f32 %v3796_v32, %v1443_v40 }
 0x8f7   :  { %3807 = vrcp.f32 %v1787_v58  ;;  %2286 = vadd.xlane.f32.xlu0 %v2285_v7  ;;  %v1504_v21 = vmul.f32 %v3798_v29, %v1339_v1  ;;  %v757_v31 = vmul.f32 1.442695, %v750_v55 }
 0x8f8   :  { %3809 = vrcp.f32 %v1786_v36  ;;  %v1348_v10 = vpop.permute.xlu0 %1347  ;;  %v5036_v36 = vld [vmem:[#allocation12_spill] sm:$0xff] }
 0x8f9   :  { %v3800_v60 = vpop.eup %3799  ;;  %v1800_v3 = vpop.permute.xlu1 %1799  ;;  %2407 = vrot.lane.b32.xlu1 %v2298_v2, %s3897_s27  ;;  %v1391_v61 = vadd.f32 %v4483_v18, %v1348_v10  ;;  %3811 = vpow2.f32 %v2274_v9 }
 0x8fa   :  { %v3802_v47 = vpop.eup %3801  ;;  %v1507_v34 = vmul.f32 %v3800_v60, %v1495_v23  ;;  %v1843_v38 = vadd.f32 %v4603_v26, %v1800_v3 }
 0x8fb   :  { %v1505_v24 = vmul.f32 %v3802_v47, %v1391_v61 }
 0x8fc   :  { %v3692_v62 = vpack.i.bf16 %v1507_v34, %v1506_v53  ;;  %v1852_v11 = vpop.permute.xlu0 %1851 }
 0x8fd   :  { %v3804_v12 = vpop.eup %3803  ;;  %v3687_v39 = vpack.i.bf16 %v1505_v24, %v1504_v21  ;;  %v1904_v14 = vpop.permute.xlu1 %1903  ;;  %v1895_v6 = vadd.f32 %v4605_v20, %v1852_v11  ;;  %v747_v20 = vsub.f32 %v4271_v19, %v4280_v27  ;;  %v5037_v19 = vld [vmem:[#allocation10_spill] sm:$0xff] }
 0x8fe   :  { %v3806_v25 = vpop.eup %3805  ;;  %v1947_v0 = vadd.f32 %v4607_v56, %v1904_v14  ;;  %v749_v56 = vsub.f32 %v4275_v22, %v4283_v28  ;;  %v748_v27 = vsub.f32 %v5037_v19, %v5036_v36  ;;  %v768_v22 = vsel %vm452_vm10, %v5038_v5, 0.0  ;;  %v5039_v19 = vld [vmem:[#allocation17_spill] sm:$0xff] }
 0x8ff   :  { %v2008_v18 = vmul.f32 %v3806_v25, %v1843_v38  ;;  %v2009_v50 = vmul.f32 %v3804_v12, %v1895_v6  ;;  %v751_v59 = vmul.f32 1.442695, %v747_v20  ;;  %v3719_v38 = vld [vmem:[%s4996_s6] sm:$0xff]  }
 0x900   :  { %v1956_v48 = vpop.permute.xlu0 %1955  ;;  %v753_v8 = vmul.f32 1.442695, %v748_v27  ;;  %3631 = vmatprep.subr.bf16.mxu0 %v3719_v38 }
 0x901   :  { %v3808_v49 = vpop.eup %3807  ;;  %v3697_v33 = vpack.i.bf16 %v2009_v50, %v2008_v18  ;;  %v1999_v37 = vadd.f32 %v4609_v17, %v1956_v48  ;;  %v755_v17 = vmul.f32 1.442695, %v749_v56  ;;  %3813 = vpow2.f32 %v751_v59  ;;  %3632 = vmatpush3.bf16.msra.mxu0 %v3719_v38  ;;  %v3720_v48 = vld [vmem:[%s4996_s6 + $0x8] sm:$0xff]  }
 0x902   :  { %v3810_v26 = vpop.eup %3809  ;;  %3633 = vmatprep.subr.bf16.mxu0 %v3720_v48 }
 0x903   :  { %v2010_v15 = vmul.f32 %v3810_v26, %v1947_v0  ;;  %v2011_v57 = vmul.f32 %v3808_v49, %v1999_v37  ;;  %v3812_v30 = vpop.eup %3811  ;;  %3815 = vpow2.f32 %v755_v17 }
 0x904   :  { %v2299_v16 = vmul.f32 %v3812_v30, %v4226_v51  ;;  %3817 = vpow2.f32 %v757_v31 }
 0x905   :  { %v3702_v63 = vpack.i.bf16 %v2011_v57, %v2010_v15  ;;  %3819 = vpow2.f32 %v753_v8  ;;  %3634 = vmatpush3.bf16.msra.mxu0 %v3720_v48 }
 0x90b   :  { %v4786_v42 = vpop.eup %3813 }
 0x90c   :  { %v779_v28 = vmul.f32 %v4786_v42, %v4214_v41 }
 0x90d   :  { %2459 = vrot.lane.b32.xlu0 %v2299_v16, %s3897_s27  ;;  %v4794_v54 = vpop.eup %3815 }
 0x90e   :  { %v781_v58 = vmul.f32 %v4794_v54, %v4220_v46  ;;  %v4799_v7 = vpop.eup %3817 }
 0x90f   :  { %v782_v32 = vmul.f32 %v4799_v7, %v4226_v51  ;;  %v4805_v41 = vpop.eup %3819 }
 0x910   :  { %v780_v1 = vmul.f32 %v4805_v41, %v4218_v45 }
 0x91d   :  { %760 = vadd.xlane.f32.xlu1 %v759_v44 }
 0x92c   :  { %769 = vadd.xlane.f32.xlu0 %v768_v22 }
 0x92e   :  { %786 = vrot.lane.b32.xlu1 %v779_v28, %s3885_s17 }
 0x932   :  { %891 = vrot.lane.b32.xlu1 %v781_v58, %s3885_s17  ;;  %v5040_v58 = vld [vmem:[#allocation16_spill] sm:$0xff] }
 0x936   :  { %943 = vrot.lane.b32.xlu1 %v782_v32, %s3885_s17 }
 0x93a   :  { %3688 = vrot.lane.b32.xlu1 %v3687_v39, %s3900_s29 }
 0x93e   :  { %3698 = vrot.lane.b32.xlu1 %v3697_v33, %s3901_s1 }
 0x940   :  { %v2278_v29 = vpop.xlane.xlu1 %2277 }
 0x941   :  { %v2288_v51 = vadd.f32 %v4734_v52, %v2278_v29 }
 0x942   :  { %839 = vrot.lane.b32.xlu0 %v780_v1, %s3885_s17 }
 0x943   :  { %3821 = vrcp.f32 %v2288_v51 }
 0x944   :  { %v2304_v10 = vpop.permute.xlu1 %2303 }
 0x946   :  { %3693 = vrot.lane.b32.xlu0 %v3692_v62, %s3900_s29 }
 0x947   :  { %v2281_v46 = vpop.xlane.xlu0 %2280 }
 0x948   :  { %v2289_v60 = vadd.f32 %v4740_v4, %v2281_v46 }
 0x94a   :  { %3703 = vrot.lane.b32.xlu0 %v3702_v63, %s3901_s1  ;;  %3823 = vrcp.f32 %v2289_v60 }
 0x94b   :  { %v2356_v2 = vpop.permute.xlu0 %2355 }
 0x94d   :  { %v3822_v24 = vpop.eup %3821 }
 0x954   :  { %v3824_v39 = vpop.eup %3823 }
 0x975   :  { %v2284_v3 = vpop.xlane.xlu1 %2283 }
 0x976   :  { %v2290_v9 = vadd.f32 %v4757_v35, %v2284_v3 }
 0x978   :  { %3825 = vrcp.f32 %v2290_v9 }
 0x979   :  { %v2408_v33 = vpop.permute.xlu1 %2407 }
 0x97c   :  { %v764_v40 = vpop.xlane.xlu0 %763 }
 0x97d   :  { %v772_v31 = vadd.f32 %v4805_v41, %v764_v40 }
 0x980   :  { %v767_v23 = vpop.xlane.xlu0 %766 }
 0x981   :  { %v773_v43 = vadd.f32 %v4794_v54, %v767_v23  ;;  %v5041_v23 = vld [vmem:[#allocation15_spill] sm:$0xff] }
 0x982   :  { %v3826_v57 = vpop.eup %3825 }
 0x984   :  { %v2287_v61 = vpop.xlane.xlu0 %2286 }
 0x985   :  { %v2291_v34 = vadd.f32 %v3812_v30, %v2287_v61 }
 0x987   :  { %v2346_v47 = vpop.f32.mrb[52].mxu0  ;;  %3827 = vrcp.f32 %v2291_v34 }
 0x988   :  { %v3611_v45 = vpop.f32.mrb[53].mxu0  ;;  %v2347_v52 = vadd.f32 %v2346_v47, %v2304_v10  ;;  %v2460_v26 = vpop.permute.xlu0 %2459  ;;  %3829 = vrcp.f32 %v773_v43  ;;  %v5043_v43 = vld [vmem:[#allocation6_spill] sm:$0xff] }
 0x989   :  { %v2349_v53 = vpop.f32.mrb[54].mxu0  ;;  %3831 = vrcp.f32 %v772_v31  ;;  %v5044_v31 = vld [vmem:[#allocation5_spill] sm:$0xff] }
 0x98a   :  { %v3612_v21 = vpop.f32.mrb[55].mxu0  ;;  %v2512_v6 = vmul.f32 %v3822_v24, %v2347_v52 }
 0x98b   :  { %v5042_v21 = vld [vmem:[#allocation18_spill] sm:$0xff] }
 0x98e   :  { %v2398_v4 = vpop.f32.mrb[68].mxu1 }
 0x98f   :  { %v2399_v62 = vadd.f32 %v2398_v4, %v2356_v2  ;;  %v2450_v11 = vpop.f32.mrb[56].mxu0  ;;  %v3617_v12 = vpop.f32.mrb[69].mxu1 }
 0x990   :  { %v3623_v14 = vpop.f32.mrb[57].mxu0  ;;  %v2401_v35 = vpop.f32.mrb[70].mxu1  ;;  %v2451_v37 = vadd.f32 %v2450_v11, %v2408_v33 }
 0x991   :  { %v2513_v25 = vmul.f32 %v3824_v39, %v2399_v62  ;;  %v2453_v18 = vpop.f32.mrb[58].mxu0  ;;  %v3618_v0 = vpop.f32.mrb[71].mxu1 }
 0x992   :  { %v3624_v50 = vpop.f32.mrb[59].mxu0  ;;  %v3828_v16 = vpop.eup %3827  ;;  %v2514_v56 = vmul.f32 %v3826_v57, %v2451_v37 }
 0x993   :  { %v3707_v49 = vpack.i.bf16 %v2513_v25, %v2512_v6  ;;  %v3830_v5 = vpop.eup %3829 }
 0x994   :  { %v3832_v1 = vpop.eup %3831 }
 0x995   :  { %3708 = vrot.lane.b32.xlu1 %v3707_v49, %s3902_s4 }
 0x996   :  { %v2502_v15 = vpop.f32.mrb[72].mxu1 }
 0x997   :  { %v2503_v63 = vadd.f32 %v2502_v15, %v2460_v26  ;;  %v3629_v30 = vpop.f32.mrb[73].mxu1 }
 0x998   :  { %v2505_v20 = vpop.f32.mrb[74].mxu1 }
 0x999   :  { %v2515_v59 = vmul.f32 %v3828_v16, %v2503_v63  ;;  %v3630_v44 = vpop.f32.mrb[75].mxu1  ;;  %v3305_v16 = vld [vmem:[%s4997_s7] ss:$0 sm:$0xff] }
 0x99b   :  { %v3712_v17 = vpack.i.bf16 %v2515_v59, %v2514_v56 }
 0x99d   :  { %3713 = vrot.lane.b32.xlu0 %v3712_v17, %s3902_s4 }
 0x9aa   :  { %v761_v13 = vpop.xlane.xlu1 %760 }
 0x9ab   :  { %v771_v2 = vadd.f32 %v4786_v42, %v761_v13 }
 0x9ad   :  { %3833 = vrcp.f32 %v771_v2 }
 0x9ae   :  { %v787_v55 = vpop.permute.xlu1 %786 }
 0x9af   :  { %v831_v10 = vadd.f32 %v5041_v23, %v787_v55 }
 0x9b2   :  { %v892_v36 = vpop.permute.xlu1 %891 }
 0x9b3   :  { %v935_v27 = vadd.f32 %v5039_v19, %v892_v36 }
 0x9b5   :  { %v998_v22 = vmul.f32 %v3830_v5, %v935_v27 }
 0x9b6   :  { %v944_v54 = vpop.permute.xlu1 %943 }
 0x9b7   :  { %v3834_v40 = vpop.eup %3833 }
 0x9b8   :  { %v996_v45 = vmul.f32 %v3834_v40, %v831_v10 }
 0x9b9   :  { %v770_v28 = vpop.xlane.xlu0 %769 }
 0x9ba   :  { %v774_v29 = vadd.f32 %v4799_v7, %v770_v28  ;;  %v3689_v51 = vpop.permute.xlu1 %3688  ;;  %v987_v7 = vadd.f32 %v5042_v21, %v944_v54 }
 0x9bb   :  { %v3691_v60 = vunpack.i.h.bf16 %v3689_v51  ;;  %v3690_v3 = vunpack.i.l.bf16 %v3689_v51 }
 0x9bc   :  { %3835 = vrcp.f32 %v774_v29 }
 0x9bd   :  { %v840_v8 = vpop.permute.xlu0 %839  ;;  %v2564_v38 = vsel %vm452_vm10, %v996_v45, %v3690_v3 }
 0x9be   :  { %v883_v32 = vadd.f32 %v5040_v58, %v840_v8  ;;  %v3699_v41 = vpop.permute.xlu1 %3698 }
 0x9bf   :  { %v3700_v47 = vunpack.i.l.bf16 %v3699_v41  ;;  %v3701_v42 = vunpack.i.h.bf16 %v3699_v41 }
 0x9c0   :  { %v997_v46 = vmul.f32 %v3832_v1, %v883_v32  ;;  %v5046_v32 = vld [vmem:[#allocation8_spill] sm:$0xff] }
 0x9c1   :  { %v3694_v61 = vpop.permute.xlu0 %3693  ;;  %v2569_v24 = vsel %vm2568_vm12, %v2564_v38, %v3700_v47 }
 0x9c2   :  { %v2565_v9 = vsel %vm452_vm10, %v997_v46, %v3691_v60  ;;  %v3696_v6 = vunpack.i.h.bf16 %v3694_v61  ;;  %v3695_v25 = vunpack.i.l.bf16 %v3694_v61 }
 0x9c3   :  { %v2570_v62 = vsel %vm2568_vm12, %v2565_v9, %v3701_v42 }
 0x9c4   :  { %v2566_v49 = vsel %vm452_vm10, %v998_v22, %v3695_v25  ;;  %v5045_v22 = vld [vmem:[#allocation7_spill] sm:$0xff] }
 0x9c5   :  { %v3704_v12 = vpop.permute.xlu0 %3703 }
 0x9c6   :  { %v3836_v53 = vpop.eup %3835  ;;  %v3705_v18 = vunpack.i.l.bf16 %v3704_v12  ;;  %v3706_v50 = vunpack.i.h.bf16 %v3704_v12 }
 0x9c7   :  { %v999_v11 = vmul.f32 %v3836_v53, %v987_v7 }
 0x9c8   :  { %v2571_v26 = vsel %vm2568_vm12, %v2566_v49, %v3705_v18 }
 0x9c9   :  { %v2567_v0 = vsel %vm452_vm10, %v999_v11, %v3696_v6 }
 0x9ca   :  { %v2572_v15 = vsel %vm2568_vm12, %v2567_v0, %v3706_v50 }
 0xa07   :  { %v3709_v34 = vpop.permute.xlu1 %3708 }
 0xa08   :  { %v3711_v52 = vunpack.i.h.bf16 %v3709_v34  ;;  %v3710_v4 = vunpack.i.l.bf16 %v3709_v34 }
 0xa0a   :  { %v2574_v39 = vsel %vm2573_vm13, %v2569_v24, %v3710_v4  ;;  %v2575_v14 = vsel %vm2573_vm13, %v2570_v62, %v3711_v52  ;;  %v3721_v52 = vld [vmem:[%s5000_s10] sm:$0xff]   ;;  %v3722_v4 = vld [vmem:[%s5000_s10 + $0x8] sm:$0xff]  }
 0xa0b   :  { %v2578_v35 = vpack.c.bf16 %v2575_v14, %v2574_v39  ;;  %3639 = vmatprep.subr.bf16.mxu1 %v3721_v52 }
 0xa0c   :  { %3640 = vmatpush3.bf16.msra.mxu1 %v3721_v52 }
 0xa0d   :  { %3635 = vmatprep.mubr.msk.bf16.mxu0 %vm188_vm7, %v2578_v35  ;;  %3641 = vmatprep.subr.bf16.mxu1 %v3722_v4 }
 0xa0f   :  { %v3714_v48 = vpop.permute.xlu0 %3713 }
 0xa10   :  { %v3716_v33 = vunpack.i.h.bf16 %v3714_v48  ;;  %v3715_v37 = vunpack.i.l.bf16 %v3714_v48  ;;  %3642 = vmatpush3.bf16.msra.mxu1 %v3722_v4 }
 0xa12   :  { %v2576_v57 = vsel %vm2573_vm13, %v2571_v26, %v3715_v37  ;;  %v2577_v63 = vsel %vm2573_vm13, %v2572_v15, %v3716_v33  ;;  %v3310_v33 = vld [vmem:[%s4998_s8] ss:$0 sm:$0xff] }
 0xa13   :  { %v2579_v30 = vpack.c.bf16 %v2577_v63, %v2576_v57 }
 0xa15   :  { %3636 = vmatmul.mubr.msk.bf16.vlgmr.msra.gmra.mrb[60].mxu0 %vm188_vm7, %v2579_v30  ;;  %v3311_v30 = vld [vmem:[%s4999_s9] ss:$0 sm:$0xff] }
 0xae8   :  { %v3637_v20 = vpop.f32.mrb[60].mxu0 }
 0xae9   :  { %v2652_v56 = vadd.f32 %v3637_v20, %v3305_v16  ;;  %v2643_v59 = vpop.f32.mrb[61].mxu0 }
 0xaea   :  { %v2644_v44 = vadd.f32 %v3305_v16, %v2643_v59  ;;  %v3638_v17 = vpop.f32.mrb[62].mxu0 }
 0xaeb   :  { %v4845_v13 = vadd.f32 %v2652_v56, %v5043_v43  ;;  %v2646_v55 = vpop.f32.mrb[63].mxu0  ;;  %v2655_v27 = vadd.f32 %v3638_v17, %v3305_v16 }
 0xaec   :  { %v4848_v36 = vadd.f32 %v2644_v44, %v5044_v31  ;;  %v2647_v19 = vadd.f32 %v3305_v16, %v2646_v55 }
 0xaed   :  { %v2670_v5 = vsel %vm188_vm7, %v4845_v13, 0.0  ;;  %v4860_v1 = vadd.f32 %v2655_v27, %v5046_v32  ;;  %v3727_v32 = vld [vmem:[%s5002_s12 + $0x20] sm:$0xff]  }
 0xaee   :  { %v4853_v28 = vadd.f32 %v2647_v19, %v5045_v22  ;;  %2671 = vadd.xlane.f32.xlu0 %v2670_v5  ;;  %v2664_v8 = vsel %vm188_vm7, %v4848_v36, 0.0  ;;  %v3723_v5 = vld [vmem:[%s5002_s12] sm:$0xff]   ;;  %v3724_v22 = vld [vmem:[%s5002_s12 + $0x8] sm:$0xff]  }
 0xaef   :  { %2665 = vadd.xlane.f32.xlu1 %v2664_v8  ;;  %v2673_v46 = vsel %vm188_vm7, %v4860_v1, 0.0  ;;  %3647 = vmatprep.subr.bf16.mxu0 %v3723_v5  ;;  %v3725_v8 = vld [vmem:[%s5002_s12 + $0x10] sm:$0xff]  }
 0xaf0   :  { %v2667_v58 = vsel %vm188_vm7, %v4853_v28, 0.0  ;;  %3648 = vmatpush3.bf16.msra.mxu0 %v3723_v5 }
 0xaf1   :  { %3649 = vmatprep.subr.bf16.mxu0 %v3724_v22 }
 0xaf2   :  { %2668 = vadd.xlane.f32.xlu0 %v2667_v58  ;;  %v3726_v58 = vld [vmem:[%s5002_s12 + $0x18] sm:$0xff]  }
 0xaf4   :  { %3650 = vmatpush3.bf16.msra.mxu0 %v3724_v22 }
 0xaf5   :  { %3651 = vmatprep.subr.bf16.mxu0 %v3725_v8 }
 0xaf6   :  { %2674 = vadd.xlane.f32.xlu0 %v2673_v46  ;;  %v3728_v46 = vld [vmem:[%s5002_s12 + $0x28] sm:$0xff]  }
 0xaf8   :  { %3652 = vmatpush3.bf16.msra.mxu0 %v3725_v8 }
 0xaf9   :  { %3653 = vmatprep.subr.bf16.mxu0 %v3726_v58 }
 0xafc   :  { %3654 = vmatpush3.bf16.msra.mxu0 %v3726_v58 }
 0xafd   :  { %3655 = vmatprep.subr.bf16.mxu0 %v3727_v32 }
 0xb00   :  { %3656 = vmatpush3.bf16.msra.mxu0 %v3727_v32 }
 0xb01   :  { %3657 = vmatprep.subr.bf16.mxu0 %v3728_v46 }
 0xb04   :  { %3658 = vmatpush3.bf16.msra.mxu0 %v3728_v46 }
 0xb7b   :  { %v2672_v2 = vpop.xlane.xlu0 %2671 }
 0xb7c   :  { %v2678_v54 = vmul.f32 0.03125, %v2672_v2  ;;  %v2666_v29 = vpop.xlane.xlu1 %2665  ;;  %v3729_v2 = vld [vmem:[%s5002_s12 + $0x30] sm:$0xff]  }
 0xb7d   :  { %v2676_v51 = vmul.f32 0.03125, %v2666_v29  ;;  %3659 = vmatprep.subr.bf16.mxu0 %v3729_v2  ;;  %v3312_v29 = vld [vmem:[%s5001_s11] ss:$0 sm:$0xff] }
 0xb7e   :  { %v2682_v41 = vsub.f32 %v4845_v13, %v2678_v54  ;;  %3660 = vmatpush3.bf16.msra.mxu0 %v3729_v2  ;;  %v3730_v54 = vld [vmem:[%s5002_s12 + $0x38] sm:$0xff]  }
 0xb7f   :  { %v2680_v40 = vsub.f32 %v4848_v36, %v2676_v51  ;;  %v2669_v23 = vpop.xlane.xlu0 %2668  ;;  %3661 = vmatprep.subr.bf16.mxu0 %v3730_v54 }
 0xb80   :  { %v2677_v10 = vmul.f32 0.03125, %v2669_v23  ;;  %v2686_v45 = vmul.f32 %v2682_v41, %v2682_v41 }
 0xb81   :  { %v2684_v60 = vmul.f32 %v2680_v40, %v2680_v40 }
 0xb82   :  { %v2681_v3 = vsub.f32 %v4853_v28, %v2677_v10  ;;  %v2694_v21 = vsel %vm188_vm7, %v2686_v45, 0.0  ;;  %3662 = vmatpush3.bf16.msra.mxu0 %v3730_v54 }
 0xb83   :  { %v2675_v61 = vpop.xlane.xlu0 %2674  ;;  %v2688_v47 = vsel %vm188_vm7, %v2684_v60, 0.0 }
 0xb84   :  { %v2679_v9 = vmul.f32 0.03125, %v2675_v61  ;;  %2689 = vadd.xlane.f32.xlu1 %v2688_v47  ;;  %v2685_v53 = vmul.f32 %v2681_v3, %v2681_v3 }
 0xb86   :  { %v2683_v42 = vsub.f32 %v4860_v1, %v2679_v9  ;;  %v2691_v34 = vsel %vm188_vm7, %v2685_v53, 0.0 }
 0xb87   :  { %2692 = vadd.xlane.f32.xlu0 %v2691_v34 }
 0xb88   :  { %2695 = vadd.xlane.f32.xlu1 %v2694_v21  ;;  %v2687_v7 = vmul.f32 %v2683_v42, %v2683_v42 }
 0xb8a   :  { %v2697_v38 = vsel %vm188_vm7, %v2687_v7, 0.0 }
 0xb8b   :  { %2698 = vadd.xlane.f32.xlu0 %v2697_v38 }
 0xc11   :  { %v2690_v24 = vpop.xlane.xlu1 %2689 }
 0xc12   :  { %v2700_v62 = vmul.f32 0.03125, %v2690_v24 }
 0xc14   :  { %v2704_v11 = vadd.f32 1e-05, %v2700_v62  ;;  %v2693_v12 = vpop.xlane.xlu0 %2692 }
 0xc15   :  { %v2701_v39 = vmul.f32 0.03125, %v2693_v12  ;;  %v2696_v14 = vpop.xlane.xlu1 %2695 }
 0xc16   :  { %3837 = vrsqrt.f32 %v2704_v11  ;;  %v2702_v35 = vmul.f32 0.03125, %v2696_v14 }
 0xc17   :  { %v2705_v6 = vadd.f32 1e-05, %v2701_v39 }
 0xc18   :  { %v2706_v25 = vadd.f32 1e-05, %v2702_v35  ;;  %v2699_v18 = vpop.xlane.xlu0 %2698 }
 0xc19   :  { %3839 = vrsqrt.f32 %v2705_v6  ;;  %v2703_v0 = vmul.f32 0.03125, %v2699_v18 }
 0xc1a   :  { %3841 = vrsqrt.f32 %v2706_v25 }
 0xc1b   :  { %v2707_v50 = vadd.f32 1e-05, %v2703_v0 }
 0xc1d   :  { %3843 = vrsqrt.f32 %v2707_v50 }
 0xc20   :  { %v3838_v48 = vpop.eup %3837 }
 0xc21   :  { %v2712_v49 = vmul.f32 %v3838_v48, %v2680_v40 }
 0xc23   :  { %v3840_v37 = vpop.eup %3839  ;;  %v2722_v57 = vmul.f32 %v3310_v33, %v2712_v49 }
 0xc24   :  { %v3842_v26 = vpop.eup %3841  ;;  %v2713_v15 = vmul.f32 %v3840_v37, %v2681_v3 }
 0xc25   :  { %v2714_v63 = vmul.f32 %v3842_v26, %v2682_v41  ;;  %v2732_v44 = vadd.f32 %v3311_v30, %v2722_v57  ;;  %v3329_v26 = vld [vmem:[%s5003_s13] ss:$0 sm:$0xff]  ;;  %s3903_s13 = smov [#allocation2]  }
 0xc26   :  { %v2723_v16 = vmul.f32 %v3310_v33, %v2713_v15  ;;  %s3248_s7 = sshll.u32 %s3903_s13, 4  ;;  %s3249_s7 = int_to_ptr.vmem [resolvable:$true] %s3248_s7 }
 0xc27   :  { %v3844_v20 = vpop.eup %3843  ;;  %v2724_v56 = vmul.f32 %v3310_v33, %v2714_v63  ;;  %s3861_s19 = scalar_lea.vmem %s3249_s7, 512  ;;  %p3866_p1 = scmp.lt.s32.totalorder %s3249_s7, %s3249_s7 }
 0xc28   :  { %v2715_v59 = vmul.f32 %v3844_v20, %v2683_v42  ;;  %v2733_v17 = vadd.f32 %v3311_v30, %v2723_v16  ;;  %p3862_p0 = scmp.ne.s32.totalorder %s3249_s7, %s3861_s19  ;;  %p3867_p2 = scmp.lt.s32.totalorder %s3861_s19, %s3861_s19 }
 0xc29   :  { %v2734_v31 = vadd.f32 %v3311_v30, %v2724_v56 }
 0xc2a   :  { %v2725_v43 = vmul.f32 %v3310_v33, %v2715_v59  ;;  %v2736_v55 = vpack.c.bf16 %v2733_v17, %v2732_v44  ;;  %p3868_p3 = por %p3867_p2, %p3866_p1 }
 0xc2c   :  { %3643 = vmatprep.mubr.msk.bf16.mxu1 %vm188_vm7, %v2736_v55  ;;  %v2735_v19 = vadd.f32 %v3311_v30, %v2725_v43  ;;  %v5047_v43 = vld [vmem:[#allocation9_spill] sm:$0xff]  ;;  %p3869_p4 = pnand %p3868_p3, %p3862_p0 }
 0xc2e   :  { %v2737_v27 = vpack.c.bf16 %v2735_v19, %v2734_v31 }
 0xc30   :  { %3644 = vmatmul.mubr.msk.bf16.vlgmr.msra.gmra.mrb[76].mxu1 %vm188_vm7, %v2737_v27 }
 0xd03   :  { %v3645_v51 = vpop.f32.mrb[76].mxu1 }
 0xd04   :  { %v2810_v41 = vadd.f32 %v3645_v51, %v3312_v29  ;;  %v2801_v40 = vpop.f32.mrb[77].mxu1 }
 0xd05   :  { %v2802_v23 = vadd.f32 %v3312_v29, %v2801_v40  ;;  %v3646_v10 = vpop.f32.mrb[78].mxu1 }
 0xd06   :  { %v3319_v60 = vmul.f32 -1.702, %v2810_v41  ;;  %v2813_v3 = vadd.f32 %v3646_v10, %v3312_v29  ;;  %v2804_v61 = vpop.f32.mrb[79].mxu1 }
 0xd07   :  { %v3317_v47 = vmul.f32 -1.702, %v2802_v23  ;;  %v2805_v45 = vadd.f32 %v3312_v29, %v2804_v61 }
 0xd08   :  { %v2828_v9 = vmul.f32 1.442695, %v3319_v60  ;;  %v3320_v53 = vmul.f32 -1.702, %v2813_v3 }
 0xd09   :  { %v2824_v42 = vmul.f32 1.442695, %v3317_v47  ;;  %v3318_v34 = vmul.f32 -1.702, %v2805_v45 }
 0xd0a   :  { %3845 = vpow2.f32 %v2828_v9  ;;  %v2830_v21 = vmul.f32 1.442695, %v3320_v53 }
 0xd0b   :  { %3847 = vpow2.f32 %v2824_v42  ;;  %v2826_v7 = vmul.f32 1.442695, %v3318_v34 }
 0xd0c   :  { %3849 = vpow2.f32 %v2830_v21 }
 0xd0d   :  { %3851 = vpow2.f32 %v2826_v7 }
 0xd14   :  { %v3846_v38 = vpop.eup %3845 }
 0xd15   :  { %v3848_v52 = vpop.eup %3847  ;;  %v2834_v4 = vadd.f32 1.0, %v3846_v38 }
 0xd16   :  { %v3850_v24 = vpop.eup %3849  ;;  %v2832_v62 = vadd.f32 1.0, %v3848_v52 }
 0xd17   :  { %v3852_v11 = vpop.eup %3851  ;;  %3853 = vrcp.f32 %v2834_v4  ;;  %v2835_v12 = vadd.f32 1.0, %v3850_v24 }
 0xd18   :  { %3855 = vrcp.f32 %v2832_v62  ;;  %v2833_v39 = vadd.f32 1.0, %v3852_v11 }
 0xd19   :  { %3857 = vrcp.f32 %v2835_v12 }
 0xd1a   :  { %3859 = vrcp.f32 %v2833_v39 }
 0xd21   :  { %v3854_v14 = vpop.eup %3853 }
 0xd22   :  { %v3856_v35 = vpop.eup %3855  ;;  %v2846_v18 = vmul.f32 %v3854_v14, %v2810_v41 }
 0xd23   :  { %v3858_v6 = vpop.eup %3857  ;;  %v2844_v50 = vmul.f32 %v3856_v35, %v2802_v23 }
 0xd24   :  { %v3860_v25 = vpop.eup %3859  ;;  %v2847_v0 = vmul.f32 %v3858_v6, %v2813_v3 }
 0xd25   :  { %v2845_v48 = vmul.f32 %v3860_v25, %v2805_v45 }
 0xd26   :  { %v2849_v49 = vpack.c.bf16 %v2847_v0, %v2846_v18 }
 0xd27   :  { %v2848_v33 = vpack.c.bf16 %v2845_v48, %v2844_v50 }
 0xd29   :  { %3663 = vmatprep.mubr.bf16.mxu0 %v2848_v33 }
 0xd2a   :  { %3664 = vmatmul.mubr.bf16.vlgmr.msra.gmra.mrb[64].mxu0 %v2849_v49 }
 0xdfd   :  { %v3665_v37 = vpop.f32.mrb[64].mxu0 }
 0xdfe   :  { %v2965_v15 = vadd.f32 %v3665_v37, %v4845_v13  ;;  %v2948_v57 = vpop.f32.mrb[65].mxu0 }
 0xdff   :  { %v2963_v63 = vadd.f32 %v2948_v57, %v4848_v36  ;;  %v3666_v30 = vpop.f32.mrb[66].mxu0 }
 0xe00   :  { %v2976_v16 = vadd.f32 %v3329_v26, %v2965_v15  ;;  %v2966_v20 = vadd.f32 %v3666_v30, %v4860_v1  ;;  %v2951_v56 = vpop.f32.mrb[67].mxu0 }
 0xe01   :  { %v2974_v59 = vadd.f32 %v3329_v26, %v2963_v63  ;;  %v2964_v44 = vadd.f32 %v2951_v56, %v4853_v28 }
 0xe02   :  { %v3112_v17 = vcombine.high %v2976_v16, %v2976_v16  ;;  %v3119_v55 = vrot.slane %v2976_v16, %v5047_v43  ;;  %v2977_v31 = vadd.f32 %v3329_v26, %v2966_v20 }
 0xe03   :  { %v2979_v19 = vcombine.high %v2974_v59, %v2974_v59  ;;  %v2986_v27 = vrot.slane %v2974_v59, %v5047_v43  ;;  %v2975_v13 = vadd.f32 %v3329_v26, %v2964_v44 }
 0xe04   :  { %v3126_v5 = vrot.slane %v3112_v17, %v5047_v43  ;;  %v3127_v36 = vcombine.high %v3119_v55, %v3119_v55  ;;  %v3135_v22 = vrot.slane %v3119_v55, %v5047_v43  ;;  %v3178_v8 = vcombine.high %v2977_v31, %v2977_v31 }
 0xe05   :  { %v2993_v1 = vrot.slane %v2979_v19, %v5047_v43  ;;  %v2994_v58 = vcombine.high %v2986_v27, %v2986_v27  ;;  %v3002_v28 = vrot.slane %v2986_v27, %v5047_v43  ;;  %v3185_v32 = vrot.slane %v2977_v31, %v5047_v43 }
 0xe06   :  { %v3128_v46 = vcombine.high %v3126_v5, %v3126_v5  ;;  %v3142_v2 = vrot.slane %v3126_v5, %v5047_v43  ;;  %v3149_v54 = vrot.slane %v3127_v36, %v5047_v43  ;;  %v3157_v29 = vcombine.high %v3135_v22, %v3135_v22  ;;  %3169 = vst.msk [vmem:[#allocation2 + $0x2] sm:$0x1] %vm3036_vm14, %v3135_v22 }
 0xe07   :  { %v2995_v51 = vcombine.high %v2993_v1, %v2993_v1  ;;  %v3009_v41 = vrot.slane %v2993_v1, %v5047_v43  ;;  %v3016_v40 = vrot.slane %v2994_v58, %v5047_v43  ;;  %v3024_v23 = vcombine.high %v3002_v28, %v3002_v28  ;;  %3037 = vst.msk [vmem:[#allocation2] sm:$0x1] %vm3036_vm14, %v3002_v28 }
 0xe08   :  { %v3156_v10 = vrot.slane %v3128_v46, %v5047_v43  ;;  %v3158_v60 = vcombine.high %v3142_v2, %v3142_v2  ;;  %v3159_v3 = vcombine.high %v3149_v54, %v3149_v54  ;;  %3170 = vst.msk [vmem:[#allocation2 + $0x6] sm:$0x1] %vm3036_vm14, %v3149_v54  ;;  %3171 = vst.msk [vmem:[#allocation2 + $0xa] sm:$0x1] %vm3036_vm14, %v3157_v29 }
 0xe09   :  { %3173 = vst.msk [vmem:[#allocation2 + $0x12] sm:$0x1] %vm3036_vm14, %v3142_v2  ;;  %v3192_v61 = vrot.slane %v3178_v8, %v5047_v43  ;;  %v3023_v47 = vrot.slane %v2995_v51, %v5047_v43  ;;  %v3025_v45 = vcombine.high %v3009_v41, %v3009_v41  ;;  %v3026_v9 = vcombine.high %v3016_v40, %v3016_v40 }
 0xe0a   :  { %3038 = vst.msk [vmem:[#allocation2 + $0x4] sm:$0x1] %vm3036_vm14, %v3016_v40  ;;  %3039 = vst.msk [vmem:[#allocation2 + $0x8] sm:$0x1] %vm3036_vm14, %v3024_v23  ;;  %v3193_v53 = vcombine.high %v3185_v32, %v3185_v32  ;;  %v3160_v42 = vcombine.high %v3156_v10, %v3156_v10  ;;  %v3201_v21 = vrot.slane %v3185_v32, %v5047_v43 }
 0xe0b   :  { %3041 = vst.msk [vmem:[#allocation2 + $0x10] sm:$0x1] %vm3036_vm14, %v3009_v41  ;;  %3172 = vst.msk [vmem:[#allocation2 + $0xe] sm:$0x1] %vm3036_vm14, %v3159_v3  ;;  %v3194_v34 = vcombine.high %v3192_v61, %v3192_v61  ;;  %v3208_v7 = vrot.slane %v3192_v61, %v5047_v43  ;;  %v3027_v38 = vcombine.high %v3023_v47, %v3023_v47 }
 0xe0c   :  { %3174 = vst.msk [vmem:[#allocation2 + $0x16] sm:$0x1] %vm3036_vm14, %v3156_v10  ;;  %3175 = vst.msk [vmem:[#allocation2 + $0x1a] sm:$0x1] %vm3036_vm14, %v3158_v60  ;;  %v3215_v52 = vrot.slane %v3193_v53, %v5047_v43  ;;  %v3046_v4 = vcombine.high %v2975_v13, %v2975_v13  ;;  %v3053_v24 = vrot.slane %v2975_v13, %v5047_v43 }
 0xe0d   :  { %3040 = vst.msk [vmem:[#allocation2 + $0xc] sm:$0x1] %vm3036_vm14, %v3026_v9  ;;  %3042 = vst.msk [vmem:[#allocation2 + $0x14] sm:$0x1] %vm3036_vm14, %v3023_v47  ;;  %v3222_v62 = vrot.slane %v3194_v34, %v5047_v43  ;;  %v3223_v11 = vcombine.high %v3201_v21, %v3201_v21  ;;  %v3224_v12 = vcombine.high %v3208_v7, %v3208_v7 }
 0xe0e   :  { %3043 = vst.msk [vmem:[#allocation2 + $0x18] sm:$0x1] %vm3036_vm14, %v3025_v45  ;;  %3176 = vst.msk [vmem:[#allocation2 + $0x1e] sm:$0x1] %vm3036_vm14, %v3160_v42  ;;  %v3225_v39 = vcombine.high %v3215_v52, %v3215_v52  ;;  %v3060_v14 = vrot.slane %v3046_v4, %v5047_v43  ;;  %v3061_v35 = vcombine.high %v3053_v24, %v3053_v24 }
 0xe0f   :  { %3235 = vst.msk [vmem:[#allocation2 + $0x3] sm:$0x1] %vm3036_vm14, %v3201_v21  ;;  %3239 = vst.msk [vmem:[#allocation2 + $0x13] sm:$0x1] %vm3036_vm14, %v3208_v7  ;;  %v3069_v6 = vrot.slane %v3053_v24, %v5047_v43  ;;  %v3226_v25 = vcombine.high %v3222_v62, %v3222_v62 }
 0xe10   :  { %3044 = vst.msk [vmem:[#allocation2 + $0x1c] sm:$0x1] %vm3036_vm14, %v3027_v38  ;;  %3236 = vst.msk [vmem:[#allocation2 + $0x7] sm:$0x1] %vm3036_vm14, %v3215_v52  ;;  %v3062_v18 = vcombine.high %v3060_v14, %v3060_v14  ;;  %v3076_v0 = vrot.slane %v3060_v14, %v5047_v43  ;;  %v3083_v50 = vrot.slane %v3061_v35, %v5047_v43 }
 0xe11   :  { %3237 = vst.msk [vmem:[#allocation2 + $0xb] sm:$0x1] %vm3036_vm14, %v3223_v11  ;;  %3240 = vst.msk [vmem:[#allocation2 + $0x17] sm:$0x1] %vm3036_vm14, %v3222_v62  ;;  %v3091_v48 = vcombine.high %v3069_v6, %v3069_v6 }
 0xe12   :  { %3241 = vst.msk [vmem:[#allocation2 + $0x1b] sm:$0x1] %vm3036_vm14, %v3224_v12  ;;  %3238 = vst.msk [vmem:[#allocation2 + $0xf] sm:$0x1] %vm3036_vm14, %v3225_v39  ;;  %v3090_v49 = vrot.slane %v3062_v18, %v5047_v43  ;;  %v3092_v33 = vcombine.high %v3076_v0, %v3076_v0  ;;  %v3093_v37 = vcombine.high %v3083_v50, %v3083_v50 }
 0xe13   :  { %3103 = vst.msk [vmem:[#allocation2 + $0x1] sm:$0x1] %vm3036_vm14, %v3069_v6  ;;  %3242 = vst.msk [vmem:[#allocation2 + $0x1f] sm:$0x1] %vm3036_vm14, %v3226_v25 }
 0xe14   :  { %3104 = vst.msk [vmem:[#allocation2 + $0x5] sm:$0x1] %vm3036_vm14, %v3083_v50  ;;  %3105 = vst.msk [vmem:[#allocation2 + $0x9] sm:$0x1] %vm3036_vm14, %v3091_v48  ;;  %v3094_v26 = vcombine.high %v3090_v49, %v3090_v49 }
 0xe15   :  { %3107 = vst.msk [vmem:[#allocation2 + $0x11] sm:$0x1] %vm3036_vm14, %v3076_v0  ;;  %3106 = vst.msk [vmem:[#allocation2 + $0xd] sm:$0x1] %vm3036_vm14, %v3093_v37 }
 0xe16   :  { %3108 = vst.msk [vmem:[#allocation2 + $0x15] sm:$0x1] %vm3036_vm14, %v3090_v49  ;;  %3109 = vst.msk [vmem:[#allocation2 + $0x19] sm:$0x1] %vm3036_vm14, %v3092_v33 }
 0xe17   :  { %3110 = vst.msk [vmem:[#allocation2 + $0x1d] sm:$0x1] %vm3036_vm14, %v3094_v26 }
 0xe18   :  { %3872 = shalt.err (!%p3869_p4)
}
 0xe19   :  { %s3873_s10 = scalar_lea.hbm %s5004_s14, 512 }
 0xe1a   :  { %p3874_p5 = scmp.ne.s32.totalorder %s5004_s14, %s3873_s10  ;;  %p3877_p6 = scmp.lt.u32.totalorder %s3873_s10, %s5004_s14 }
 0xe1c   :  { %p3879_p7 = pnand %p3877_p6, %p3874_p5 }
 0xe1e   :  { %3882 = shalt.err (!%p3879_p7)
}
 0xe1f   :  { %s3904_s23 = smov 4  }
 0xe20   :  { %3254 = dma.vmem_to_hbm [thread:$0]  %s3249_s7, 512, %s5004_s14, [#allocation3], %s3888_s5, %s3888_s5, %s3904_s23  }
 0xe21   :  { %3883 = dma.done.wait [#allocation3], 512  }
 0xe22   :  { %3884 = vsyncadd [#allocation3], 4294966784 }
 0xe23   :  { %3258 = vsyncpa [#allocation3], 1 }

</bundles_post_ra>
